<compile_context>
chip_gen: v7x
topology: tpu7x:2x2x1
jax: 0.10.0
libtpu: 0.0.40
codegen_flags: <defaults>
</compile_context>

<pallas_src>
import jax
import jax.numpy as jnp
from jax.experimental import pallas as pl
from jax.experimental.pallas import tpu as pltpu

FEATURE_DIM = 4
CONV_CH = 64
HIDDEN = 128
KSIZE = 3
BN_EPS = 1e-5
BATCH_TILE = 8


def cnn_lstm_kernel(cols_ref, convw_ref, convb_ref,
                    bn1s_ref, bn1b_ref,
                    wih0_ref, b0_ref,
                    wcomb_ref, b1_ref,
                    bn2s_ref, bn2b_ref,
                    fcw_ref, fcb_ref,
                    out_ref, lhs_ref):
    Lc, TB, KF = cols_ref.shape            # time-major im2col block: (Lc, TB, K*F) bf16
    H = HIDDEN
    L = Lc // 2                            # AvgPool1d(2) output length

    # ---- Conv1d(F -> 64, k=3): single im2col matmul ----
    cols = cols_ref[...].reshape(Lc * TB, KF)                         # bf16
    conv = jnp.dot(cols, convw_ref[...],
                   preferred_element_type=jnp.float32)                # (Lc*TB, 64) f32
    conv = jnp.maximum(conv + convb_ref[...], 0.0)                    # bias + ReLU
    conv = conv * bn1s_ref[...] + bn1b_ref[...]                       # folded BatchNorm1d(64)

    # ---- AvgPool1d(2): pair adjacent time positions (time-major rows) ----
    conv = conv.reshape(L, 2, TB, CONV_CH)
    pooled = 0.5 * (conv[:, 0] + conv[:, 1])                          # (L, TB, 64)

    # ---- Layer-0 input projection hoisted out of the recurrence (biases folded) ----
    xproj0 = jnp.dot(pooled.reshape(L * TB, CONV_CH).astype(jnp.bfloat16),
                     wih0_ref[...], preferred_element_type=jnp.float32)
    xproj0 = (xproj0 + b0_ref[...]).reshape(L, TB, 4 * H)             # time-major (L, TB, 4H)

    wcomb = wcomb_ref[...]                                            # (2H, 8H) bf16, hoisted
    b1b = jnp.broadcast_to(b1_ref[...], (TB, 4 * H))                  # hoisted broadcast

    def sig(v):
        # EUP path: exp + approximate reciprocal, off the VALU critical chain.
        return pl.reciprocal(1.0 + jnp.exp(-v), approx=True)

    def gate_update(g, c):
        # PyTorch gate order: i, f, g, o
        i = sig(g[:, 0 * H:1 * H])
        f = sig(g[:, 1 * H:2 * H])
        gg = jnp.tanh(g[:, 2 * H:3 * H])
        o = sig(g[:, 3 * H:4 * H])
        c_new = f * c + i * gg
        return o * jnp.tanh(c_new), c_new

    # prologue: layer-0 step 0 (zero initial state -> recurrent term vanishes)
    h0, c0 = gate_update(xproj0[0], jnp.zeros((TB, H), jnp.float32))
    c1 = jnp.zeros((TB, H), jnp.float32)
    h1 = jnp.zeros((TB, H), jnp.float32)
    lhs_ref[:, 0:H] = h0.astype(jnp.bfloat16)                         # LHS = [h0 | h1] bf16
    lhs_ref[:, H:2 * H] = jnp.zeros((TB, H), jnp.bfloat16)

    # wavefront step s: layer-1 step s and layer-0 step s+1 from ONE stacked matmul:
    #   [h0(s) | h1(s-1)] @ [[Whh0, Wih1], [0, Whh1]]
    # TODO(synk): explicitly hold wcomb resident in MXU weight registers across the L steps
    #             (pltpu.matmul_push_rhs / matmul_acc_lhs); relying on Mosaic keeping the
    #             loop-invariant RHS latched for now.
    # TODO(synk): if L grows well beyond this small unroll, switch to lax.fori_loop with the
    #             h/c state carried in VMEM scratch refs to cap vreg pressure.
    for s in range(L):
        gboth = jnp.dot(lhs_ref[...], wcomb,
                        preferred_element_type=jnp.float32)           # (TB, 8H)
        h1, c1 = gate_update(gboth[:, 4 * H:] + b1b, c1)              # layer-1 step s
        lhs_ref[:, H:2 * H] = h1.astype(jnp.bfloat16)
        if s + 1 < L:                                                 # layer-0 step s+1
            h0, c0 = gate_update(gboth[:, :4 * H] + xproj0[s + 1], c0)
            lhs_ref[:, 0:H] = h0.astype(jnp.bfloat16)

    # ---- h_last = out[:, -1, :]; BatchNorm1d(128); Linear(128->1) as VPU reduce; sigmoid ----
    h_last = h1 * bn2s_ref[...] + bn2b_ref[...]                       # (TB, 128)
    logits = jnp.sum(h_last * fcw_ref[...], axis=-1, keepdims=True) + fcb_ref[...]
    out_ref[...] = jax.nn.sigmoid(logits)                             # (TB, 1)


def init_params(key, feature_dim):
    ks = list(jax.random.split(key, 24))
    nxt = iter(ks).__next__

    def u(shape, bound):
        return jax.random.uniform(nxt(), shape, jnp.float32, -bound, bound)

    p = {}
    # Conv1d(feature_dim, 64, 3)
    cb = 1.0 / jnp.sqrt(float(feature_dim * KSIZE))
    p["conv_w"] = u((CONV_CH, feature_dim, KSIZE), cb)     # PyTorch layout (O, I, K)
    p["conv_b"] = u((CONV_CH,), cb)
    # BatchNorm1d(64) (eval mode)
    p["bn1_gamma"] = 1.0 + u((CONV_CH,), 0.5)
    p["bn1_beta"] = u((CONV_CH,), 0.1)
    p["bn1_mean"] = u((CONV_CH,), 0.1)
    p["bn1_var"] = 1.0 + u((CONV_CH,), 0.5)
    # LSTM(64 -> 128, num_layers=2)
    lb = 1.0 / jnp.sqrt(float(HIDDEN))
    p["w_ih_l0"] = u((4 * HIDDEN, CONV_CH), lb)
    p["w_hh_l0"] = u((4 * HIDDEN, HIDDEN), lb)
    p["b_ih_l0"] = u((4 * HIDDEN,), lb)
    p["b_hh_l0"] = u((4 * HIDDEN,), lb)
    p["w_ih_l1"] = u((4 * HIDDEN, HIDDEN), lb)
    p["w_hh_l1"] = u((4 * HIDDEN, HIDDEN), lb)
    p["b_ih_l1"] = u((4 * HIDDEN,), lb)
    p["b_hh_l1"] = u((4 * HIDDEN,), lb)
    # BatchNorm1d(128) (eval mode)
    p["bn2_gamma"] = 1.0 + u((HIDDEN,), 0.5)
    p["bn2_beta"] = u((HIDDEN,), 0.1)
    p["bn2_mean"] = u((HIDDEN,), 0.1)
    p["bn2_var"] = 1.0 + u((HIDDEN,), 0.5)
    # Linear(128, 1)
    fb = 1.0 / jnp.sqrt(float(HIDDEN))
    p["fc_w"] = u((1, HIDDEN), fb)
    p["fc_b"] = u((1,), fb)
    return p


def _fold_bn(gamma, beta, mean, var):
    scale = gamma / jnp.sqrt(var + BN_EPS)
    shift = beta - mean * scale
    return scale.reshape(1, -1), shift.reshape(1, -1)


@jax.jit
def cnn_lstm_forward(x, params):
    B, T, F = x.shape
    H = HIDDEN
    KF = KSIZE * F
    L = (T - KSIZE + 1) // 2             # AvgPool1d(2) output length (floor)
    Lc = 2 * L                           # conv positions the pool actually consumes

    # ---- batch tiling: pad to a multiple of the tile, grid over batch ("parallel") ----
    TB = BATCH_TILE
    Bp = ((B + TB - 1) // TB) * TB
    if Bp != B:
        x = jnp.pad(x, ((0, Bp - B), (0, 0), (0, 0)))

    # ---- im2col in the wrapper (layout plumbing), time-major + bf16 ----
    cols = jnp.concatenate([x[:, k:k + Lc, :] for k in range(KSIZE)], axis=-1)  # (Bp, Lc, K*F)
    cols = jnp.transpose(cols, (1, 0, 2)).astype(jnp.bfloat16)                  # (Lc, Bp, K*F)

    # ---- fold/reshape parameters into kernel-friendly layouts (bf16 matmul weights) ----
    convw = jnp.transpose(params["conv_w"], (2, 1, 0)).reshape(KF, CONV_CH)
    convw = convw.astype(jnp.bfloat16)                                # (K*F, 64) im2col weight
    convb = params["conv_b"].reshape(1, CONV_CH).astype(jnp.float32)
    bn1s, bn1b = _fold_bn(params["bn1_gamma"], params["bn1_beta"],
                          params["bn1_mean"], params["bn1_var"])
    wih0 = params["w_ih_l0"].T.astype(jnp.bfloat16)                   # (64, 4H)
    b0 = (params["b_ih_l0"] + params["b_hh_l0"]).reshape(1, 4 * H).astype(jnp.float32)
    # Stacked recurrent weights for the wavefronted 2-layer LSTM:
    #   [h0 | h1] @ [[Whh0, Wih1], [0, Whh1]] = [h0@Whh0 | h0@Wih1 + h1@Whh1]
    top = jnp.concatenate([params["w_hh_l0"].T, params["w_ih_l1"].T], axis=1)     # (H, 8H)
    bot = jnp.concatenate([jnp.zeros((H, 4 * H), jnp.float32),
                           params["w_hh_l1"].T], axis=1)                          # (H, 8H)
    wcomb = jnp.concatenate([top, bot], axis=0).astype(jnp.bfloat16)              # (2H, 8H)
    b1 = (params["b_ih_l1"] + params["b_hh_l1"]).reshape(1, 4 * H).astype(jnp.float32)
    bn2s, bn2b = _fold_bn(params["bn2_gamma"], params["bn2_beta"],
                          params["bn2_mean"], params["bn2_var"])
    fcw = params["fc_w"].reshape(1, H).astype(jnp.float32)            # row vector for VPU reduce
    fcb = params["fc_b"].reshape(1, 1).astype(jnp.float32)

    operands = (cols, convw, convb, bn1s, bn1b, wih0, b0, wcomb, b1,
                bn2s, bn2b, fcw, fcb)

    const2 = lambda i: (0, 0)                                         # weights: resident blocks
    in_specs = [
        pl.BlockSpec((Lc, TB, KF), lambda i: (0, i, 0)),              # im2col, batch-tiled
        pl.BlockSpec((KF, CONV_CH), const2),
        pl.BlockSpec((1, CONV_CH), const2),
        pl.BlockSpec((1, CONV_CH), const2),
        pl.BlockSpec((1, CONV_CH), const2),
        pl.BlockSpec((CONV_CH, 4 * H), const2),
        pl.BlockSpec((1, 4 * H), const2),
        pl.BlockSpec((2 * H, 8 * H), const2),
        pl.BlockSpec((1, 4 * H), const2),
        pl.BlockSpec((1, H), const2),
        pl.BlockSpec((1, H), const2),
        pl.BlockSpec((1, H), const2),
        pl.BlockSpec((1, 1), const2),
    ]
    out_specs = pl.BlockSpec((TB, 1), lambda i: (i, 0))

    out = pl.pallas_call(
        cnn_lstm_kernel,
        out_shape=jax.ShapeDtypeStruct((Bp, 1), jnp.float32),
        grid=(Bp // TB,),
        in_specs=in_specs,
        out_specs=out_specs,
        scratch_shapes=[pltpu.VMEM((TB, 2 * H), jnp.bfloat16)],       # persistent bf16 LHS
        compiler_params=pltpu.CompilerParams(
            dimension_semantics=("parallel",)),                       # both TCs on v7x
    )(*operands)
    return out[:B]


if __name__ == "__main__":
    key = jax.random.PRNGKey(0)
    k_param, k_x = jax.random.split(key)

    # Small but MXU-friendly: batch is a multiple of 8 (fills sublanes, exercises the
    # parallel batch grid: 2 programs of 8 rows each).
    B, T, F = 16, 16, FEATURE_DIM
    x = jax.random.normal(k_x, (B, T, F), jnp.float32)

    params = init_params(k_param, F)
    out = cnn_lstm_forward(x, params)
    out = jax.block_until_ready(out)

    assert out.shape == (B, 1), out.shape
    assert bool(jnp.all(jnp.isfinite(out)))
    assert bool(jnp.all((out >= 0.0) & (out <= 1.0)))
    print("KERNEL_OK")
</pallas_src>

<mosaic_0001>
module attributes {stable_mosaic.version = 11 : i64} {
  func.func @cnn_lstm_kernel(%arg0: i32, %arg1: memref<14x8x12xbf16, #tpu.memory_space<vmem>>, %arg2: memref<12x64xbf16, #tpu.memory_space<vmem>>, %arg3: memref<1x64xf32, #tpu.memory_space<vmem>>, %arg4: memref<1x64xf32, #tpu.memory_space<vmem>>, %arg5: memref<1x64xf32, #tpu.memory_space<vmem>>, %arg6: memref<64x512xbf16, #tpu.memory_space<vmem>>, %arg7: memref<1x512xf32, #tpu.memory_space<vmem>>, %arg8: memref<256x1024xbf16, #tpu.memory_space<vmem>>, %arg9: memref<1x512xf32, #tpu.memory_space<vmem>>, %arg10: memref<1x128xf32, #tpu.memory_space<vmem>>, %arg11: memref<1x128xf32, #tpu.memory_space<vmem>>, %arg12: memref<1x128xf32, #tpu.memory_space<vmem>>, %arg13: memref<1x1xf32, #tpu.memory_space<vmem>>, %arg14: memref<8x1xf32, #tpu.memory_space<vmem>>, %arg15: memref<8x256xbf16, #tpu.memory_space<vmem>>) attributes {dimension_semantics = [#tpu.dimension_semantics<parallel>], iteration_bounds = array<i64: 2>, scalar_prefetch = 0 : i64, scratch_operands = 1 : i64, tpu.core_type = #tpu.core_type<tc>, window_params = [{transform_indices = @transform_0, window_bounds = array<i64: 14, 8, 12>}, {pipeline_mode = #tpu.pipeline_mode<synchronous>, transform_indices = @transform_1, window_bounds = array<i64: 12, 64>}, {pipeline_mode = #tpu.pipeline_mode<synchronous>, transform_indices = @transform_2, window_bounds = array<i64: 1, 64>}, {pipeline_mode = #tpu.pipeline_mode<synchronous>, transform_indices = @transform_3, window_bounds = array<i64: 1, 64>}, {pipeline_mode = #tpu.pipeline_mode<synchronous>, transform_indices = @transform_4, window_bounds = array<i64: 1, 64>}, {pipeline_mode = #tpu.pipeline_mode<synchronous>, transform_indices = @transform_5, window_bounds = array<i64: 64, 512>}, {pipeline_mode = #tpu.pipeline_mode<synchronous>, transform_indices = @transform_6, window_bounds = array<i64: 1, 512>}, {pipeline_mode = #tpu.pipeline_mode<synchronous>, transform_indices = @transform_7, window_bounds = array<i64: 256, 1024>}, {pipeline_mode = #tpu.pipeline_mode<synchronous>, transform_indices = @transform_8, window_bounds = array<i64: 1, 512>}, {pipeline_mode = #tpu.pipeline_mode<synchronous>, transform_indices = @transform_9, window_bounds = array<i64: 1, 128>}, {pipeline_mode = #tpu.pipeline_mode<synchronous>, transform_indices = @transform_10, window_bounds = array<i64: 1, 128>}, {pipeline_mode = #tpu.pipeline_mode<synchronous>, transform_indices = @transform_11, window_bounds = array<i64: 1, 128>}, {pipeline_mode = #tpu.pipeline_mode<synchronous>, transform_indices = @transform_12, window_bounds = array<i64: 1, 1>}, {transform_indices = @transform_13, window_bounds = array<i64: 8, 1>}]} {
    %c0 = arith.constant 0 : index
    %c0_0 = arith.constant 0 : index
    %c0_1 = arith.constant 0 : index
    %0 = vector.load %arg1[%c0, %c0_0, %c0_1] : memref<14x8x12xbf16, #tpu.memory_space<vmem>>, vector<14x8x12xbf16>
    %1 = vector.shape_cast %0 : vector<14x8x12xbf16> to vector<112x12xbf16>
    %c0_2 = arith.constant 0 : index
    %c0_3 = arith.constant 0 : index
    %2 = vector.load %arg2[%c0_2, %c0_3] : memref<12x64xbf16, #tpu.memory_space<vmem>>, vector<12x64xbf16>
    %cst = arith.constant dense<0.000000e+00> : vector<112x64xf32>
    %3 = tpu.matmul %1, %2, %cst {dimension_numbers = #tpu.dot_dimension_numbers<[1], [0], [0], [1], [0, 0, 1, 1], [], []>} : vector<112x12xbf16>, vector<12x64xbf16>, vector<112x64xf32> -> vector<112x64xf32>
    %c0_4 = arith.constant 0 : index
    %c0_5 = arith.constant 0 : index
    %4 = vector.load %arg3[%c0_4, %c0_5] : memref<1x64xf32, #tpu.memory_space<vmem>>, vector<1x64xf32>
    %5 = vector.broadcast %4 : vector<1x64xf32> to vector<112x64xf32>
    %6 = arith.addf %3, %5 : vector<112x64xf32>
    %cst_6 = arith.constant 0.000000e+00 : f32
    %7 = vector.broadcast %cst_6 : f32 to vector<112x64xf32>
    %8 = arith.maximumf %6, %7 : vector<112x64xf32>
    %c0_7 = arith.constant 0 : index
    %c0_8 = arith.constant 0 : index
    %9 = vector.load %arg4[%c0_7, %c0_8] : memref<1x64xf32, #tpu.memory_space<vmem>>, vector<1x64xf32>
    %10 = vector.broadcast %9 : vector<1x64xf32> to vector<112x64xf32>
    %11 = arith.mulf %8, %10 : vector<112x64xf32>
    %c0_9 = arith.constant 0 : index
    %c0_10 = arith.constant 0 : index
    %12 = vector.load %arg5[%c0_9, %c0_10] : memref<1x64xf32, #tpu.memory_space<vmem>>, vector<1x64xf32>
    %13 = vector.broadcast %12 : vector<1x64xf32> to vector<112x64xf32>
    %14 = arith.addf %11, %13 : vector<112x64xf32>
    %15 = vector.shape_cast %14 : vector<112x64xf32> to vector<7x2x8x64xf32>
    %16 = vector.extract_strided_slice %15 {offsets = [0, 0, 0, 0], sizes = [7, 1, 8, 64], strides = [1, 1, 1, 1]} : vector<7x2x8x64xf32> to vector<7x1x8x64xf32>
    %17 = vector.shape_cast %16 : vector<7x1x8x64xf32> to vector<7x8x64xf32>
    %18 = vector.extract_strided_slice %15 {offsets = [0, 1, 0, 0], sizes = [7, 1, 8, 64], strides = [1, 1, 1, 1]} : vector<7x2x8x64xf32> to vector<7x1x8x64xf32>
    %19 = vector.shape_cast %18 : vector<7x1x8x64xf32> to vector<7x8x64xf32>
    %20 = arith.addf %17, %19 : vector<7x8x64xf32>
    %cst_11 = arith.constant 5.000000e-01 : f32
    %21 = vector.broadcast %cst_11 : f32 to vector<7x8x64xf32>
    %22 = arith.mulf %21, %20 : vector<7x8x64xf32>
    %23 = vector.shape_cast %22 : vector<7x8x64xf32> to vector<56x64xf32>
    %24 = arith.truncf %23 : vector<56x64xf32> to vector<56x64xbf16>
    %c0_12 = arith.constant 0 : index
    %c0_13 = arith.constant 0 : index
    %25 = vector.load %arg6[%c0_12, %c0_13] : memref<64x512xbf16, #tpu.memory_space<vmem>>, vector<64x512xbf16>
    %cst_14 = arith.constant dense<0.000000e+00> : vector<56x512xf32>
    %26 = tpu.matmul %24, %25, %cst_14 {dimension_numbers = #tpu.dot_dimension_numbers<[1], [0], [0], [1], [0, 0, 1, 1], [], []>} : vector<56x64xbf16>, vector<64x512xbf16>, vector<56x512xf32> -> vector<56x512xf32>
    %c0_15 = arith.constant 0 : index
    %c0_16 = arith.constant 0 : index
    %27 = vector.load %arg7[%c0_15, %c0_16] : memref<1x512xf32, #tpu.memory_space<vmem>>, vector<1x512xf32>
    %28 = vector.broadcast %27 : vector<1x512xf32> to vector<56x512xf32>
    %29 = arith.addf %26, %28 : vector<56x512xf32>
    %30 = vector.shape_cast %29 : vector<56x512xf32> to vector<7x8x512xf32>
    %c0_17 = arith.constant 0 : index
    %c0_18 = arith.constant 0 : index
    %31 = vector.load %arg8[%c0_17, %c0_18] : memref<256x1024xbf16, #tpu.memory_space<vmem>>, vector<256x1024xbf16>
    %c0_19 = arith.constant 0 : index
    %c0_20 = arith.constant 0 : index
    %32 = vector.load %arg9[%c0_19, %c0_20] : memref<1x512xf32, #tpu.memory_space<vmem>>, vector<1x512xf32>
    %33 = vector.shape_cast %32 : vector<1x512xf32> to vector<1x512xf32>
    %34 = vector.broadcast %33 : vector<1x512xf32> to vector<8x512xf32>
    %35 = vector.extract_strided_slice %30 {offsets = [0, 0, 0], sizes = [1, 8, 512], strides = [1, 1, 1]} : vector<7x8x512xf32> to vector<1x8x512xf32>
    %36 = vector.shape_cast %35 : vector<1x8x512xf32> to vector<8x512xf32>
    %cst_21 = arith.constant 0.000000e+00 : f32
    %37 = vector.broadcast %cst_21 : f32 to vector<8x128xf32>
    %38 = vector.extract_strided_slice %36 {offsets = [0, 0], sizes = [8, 128], strides = [1, 1]} : vector<8x512xf32> to vector<8x128xf32>
    %cst_22 = arith.constant 0.000000e+00 : f32
    %39 = vector.broadcast %cst_22 : f32 to vector<8x128xf32>
    %40 = arith.subf %39, %38 : vector<8x128xf32>
    %41 = math.exp %40 : vector<8x128xf32>
    %cst_23 = arith.constant 1.000000e+00 : f32
    %42 = vector.broadcast %cst_23 : f32 to vector<8x128xf32>
    %43 = arith.addf %42, %41 : vector<8x128xf32>
    %44 = tpu.reciprocal %43 {approx = true} : vector<8x128xf32> -> vector<8x128xf32>
    %45 = vector.extract_strided_slice %36 {offsets = [0, 128], sizes = [8, 128], strides = [1, 1]} : vector<8x512xf32> to vector<8x128xf32>
    %cst_24 = arith.constant 0.000000e+00 : f32
    %46 = vector.broadcast %cst_24 : f32 to vector<8x128xf32>
    %47 = arith.subf %46, %45 : vector<8x128xf32>
    %48 = math.exp %47 : vector<8x128xf32>
    %cst_25 = arith.constant 1.000000e+00 : f32
    %49 = vector.broadcast %cst_25 : f32 to vector<8x128xf32>
    %50 = arith.addf %49, %48 : vector<8x128xf32>
    %51 = tpu.reciprocal %50 {approx = true} : vector<8x128xf32> -> vector<8x128xf32>
    %52 = vector.extract_strided_slice %36 {offsets = [0, 256], sizes = [8, 128], strides = [1, 1]} : vector<8x512xf32> to vector<8x128xf32>
    %53 = math.tanh %52 : vector<8x128xf32>
    %54 = vector.extract_strided_slice %36 {offsets = [0, 384], sizes = [8, 128], strides = [1, 1]} : vector<8x512xf32> to vector<8x128xf32>
    %cst_26 = arith.constant 0.000000e+00 : f32
    %55 = vector.broadcast %cst_26 : f32 to vector<8x128xf32>
    %56 = arith.subf %55, %54 : vector<8x128xf32>
    %57 = math.exp %56 : vector<8x128xf32>
    %cst_27 = arith.constant 1.000000e+00 : f32
    %58 = vector.broadcast %cst_27 : f32 to vector<8x128xf32>
    %59 = arith.addf %58, %57 : vector<8x128xf32>
    %60 = tpu.reciprocal %59 {approx = true} : vector<8x128xf32> -> vector<8x128xf32>
    %61 = arith.mulf %51, %37 : vector<8x128xf32>
    %62 = arith.mulf %44, %53 : vector<8x128xf32>
    %63 = arith.addf %61, %62 : vector<8x128xf32>
    %64 = math.tanh %63 : vector<8x128xf32>
    %65 = arith.mulf %60, %64 : vector<8x128xf32>
    %cst_28 = arith.constant 0.000000e+00 : f32
    %66 = vector.broadcast %cst_28 : f32 to vector<8x128xf32>
    %67 = arith.truncf %65 : vector<8x128xf32> to vector<8x128xbf16>
    %c0_29 = arith.constant 0 : index
    %c0_30 = arith.constant 0 : index
    %68 = vector.load %arg15[%c0_29, %c0_30] : memref<8x256xbf16, #tpu.memory_space<vmem>>, vector<8x128xbf16>
    tpu.vector_store %arg15[%c0_29, %c0_30], %67 {strides = array<i32>} : memref<8x256xbf16, #tpu.memory_space<vmem>>, vector<8x128xbf16>,
    %cst_31 = arith.constant 0.000000e+00 : bf16
    %69 = vector.broadcast %cst_31 : bf16 to vector<8x128xbf16>
    %c0_32 = arith.constant 0 : index
    %c128 = arith.constant 128 : index
    %70 = vector.load %arg15[%c0_32, %c128] : memref<8x256xbf16, #tpu.memory_space<vmem>>, vector<8x128xbf16>
    tpu.vector_store %arg15[%c0_32, %c128], %69 {strides = array<i32>} : memref<8x256xbf16, #tpu.memory_space<vmem>>, vector<8x128xbf16>,
    %c0_33 = arith.constant 0 : index
    %c0_34 = arith.constant 0 : index
    %71 = vector.load %arg15[%c0_33, %c0_34] : memref<8x256xbf16, #tpu.memory_space<vmem>>, vector<8x256xbf16>
    %cst_35 = arith.constant dense<0.000000e+00> : vector<8x1024xf32>
    %72 = tpu.matmul %71, %31, %cst_35 {dimension_numbers = #tpu.dot_dimension_numbers<[1], [0], [0], [1], [0, 0, 1, 1], [], []>} : vector<8x256xbf16>, vector<256x1024xbf16>, vector<8x1024xf32> -> vector<8x1024xf32>
    %73 = vector.extract_strided_slice %72 {offsets = [0, 512], sizes = [8, 512], strides = [1, 1]} : vector<8x1024xf32> to vector<8x512xf32>
    %74 = arith.addf %73, %34 : vector<8x512xf32>
    %75 = vector.extract_strided_slice %74 {offsets = [0, 0], sizes = [8, 128], strides = [1, 1]} : vector<8x512xf32> to vector<8x128xf32>
    %cst_36 = arith.constant 0.000000e+00 : f32
    %76 = vector.broadcast %cst_36 : f32 to vector<8x128xf32>
    %77 = arith.subf %76, %75 : vector<8x128xf32>
    %78 = math.exp %77 : vector<8x128xf32>
    %cst_37 = arith.constant 1.000000e+00 : f32
    %79 = vector.broadcast %cst_37 : f32 to vector<8x128xf32>
    %80 = arith.addf %79, %78 : vector<8x128xf32>
    %81 = tpu.reciprocal %80 {approx = true} : vector<8x128xf32> -> vector<8x128xf32>
    %82 = vector.extract_strided_slice %74 {offsets = [0, 128], sizes = [8, 128], strides = [1, 1]} : vector<8x512xf32> to vector<8x128xf32>
    %cst_38 = arith.constant 0.000000e+00 : f32
    %83 = vector.broadcast %cst_38 : f32 to vector<8x128xf32>
    %84 = arith.subf %83, %82 : vector<8x128xf32>
    %85 = math.exp %84 : vector<8x128xf32>
    %cst_39 = arith.constant 1.000000e+00 : f32
    %86 = vector.broadcast %cst_39 : f32 to vector<8x128xf32>
    %87 = arith.addf %86, %85 : vector<8x128xf32>
    %88 = tpu.reciprocal %87 {approx = true} : vector<8x128xf32> -> vector<8x128xf32>
    %89 = vector.extract_strided_slice %74 {offsets = [0, 256], sizes = [8, 128], strides = [1, 1]} : vector<8x512xf32> to vector<8x128xf32>
    %90 = math.tanh %89 : vector<8x128xf32>
    %91 = vector.extract_strided_slice %74 {offsets = [0, 384], sizes = [8, 128], strides = [1, 1]} : vector<8x512xf32> to vector<8x128xf32>
    %cst_40 = arith.constant 0.000000e+00 : f32
    %92 = vector.broadcast %cst_40 : f32 to vector<8x128xf32>
    %93 = arith.subf %92, %91 : vector<8x128xf32>
    %94 = math.exp %93 : vector<8x128xf32>
    %cst_41 = arith.constant 1.000000e+00 : f32
    %95 = vector.broadcast %cst_41 : f32 to vector<8x128xf32>
    %96 = arith.addf %95, %94 : vector<8x128xf32>
    %97 = tpu.reciprocal %96 {approx = true} : vector<8x128xf32> -> vector<8x128xf32>
    %98 = arith.mulf %88, %66 : vector<8x128xf32>
    %99 = arith.mulf %81, %90 : vector<8x128xf32>
    %100 = arith.addf %98, %99 : vector<8x128xf32>
    %101 = math.tanh %100 : vector<8x128xf32>
    %102 = arith.mulf %97, %101 : vector<8x128xf32>
    %103 = arith.truncf %102 : vector<8x128xf32> to vector<8x128xbf16>
    %c0_42 = arith.constant 0 : index
    %c128_43 = arith.constant 128 : index
    %104 = vector.load %arg15[%c0_42, %c128_43] : memref<8x256xbf16, #tpu.memory_space<vmem>>, vector<8x128xbf16>
    tpu.vector_store %arg15[%c0_42, %c128_43], %103 {strides = array<i32>} : memref<8x256xbf16, #tpu.memory_space<vmem>>, vector<8x128xbf16>,
    %105 = vector.extract_strided_slice %72 {offsets = [0, 0], sizes = [8, 512], strides = [1, 1]} : vector<8x1024xf32> to vector<8x512xf32>
    %106 = vector.extract_strided_slice %30 {offsets = [1, 0, 0], sizes = [1, 8, 512], strides = [1, 1, 1]} : vector<7x8x512xf32> to vector<1x8x512xf32>
    %107 = vector.shape_cast %106 : vector<1x8x512xf32> to vector<8x512xf32>
    %108 = arith.addf %105, %107 : vector<8x512xf32>
    %109 = vector.extract_strided_slice %108 {offsets = [0, 0], sizes = [8, 128], strides = [1, 1]} : vector<8x512xf32> to vector<8x128xf32>
    %cst_44 = arith.constant 0.000000e+00 : f32
    %110 = vector.broadcast %cst_44 : f32 to vector<8x128xf32>
    %111 = arith.subf %110, %109 : vector<8x128xf32>
    %112 = math.exp %111 : vector<8x128xf32>
    %cst_45 = arith.constant 1.000000e+00 : f32
    %113 = vector.broadcast %cst_45 : f32 to vector<8x128xf32>
    %114 = arith.addf %113, %112 : vector<8x128xf32>
    %115 = tpu.reciprocal %114 {approx = true} : vector<8x128xf32> -> vector<8x128xf32>
    %116 = vector.extract_strided_slice %108 {offsets = [0, 128], sizes = [8, 128], strides = [1, 1]} : vector<8x512xf32> to vector<8x128xf32>
    %cst_46 = arith.constant 0.000000e+00 : f32
    %117 = vector.broadcast %cst_46 : f32 to vector<8x128xf32>
    %118 = arith.subf %117, %116 : vector<8x128xf32>
    %119 = math.exp %118 : vector<8x128xf32>
    %cst_47 = arith.constant 1.000000e+00 : f32
    %120 = vector.broadcast %cst_47 : f32 to vector<8x128xf32>
    %121 = arith.addf %120, %119 : vector<8x128xf32>
    %122 = tpu.reciprocal %121 {approx = true} : vector<8x128xf32> -> vector<8x128xf32>
    %123 = vector.extract_strided_slice %108 {offsets = [0, 256], sizes = [8, 128], strides = [1, 1]} : vector<8x512xf32> to vector<8x128xf32>
    %124 = math.tanh %123 : vector<8x128xf32>
    %125 = vector.extract_strided_slice %108 {offsets = [0, 384], sizes = [8, 128], strides = [1, 1]} : vector<8x512xf32> to vector<8x128xf32>
    %cst_48 = arith.constant 0.000000e+00 : f32
    %126 = vector.broadcast %cst_48 : f32 to vector<8x128xf32>
    %127 = arith.subf %126, %125 : vector<8x128xf32>
    %128 = math.exp %127 : vector<8x128xf32>
    %cst_49 = arith.constant 1.000000e+00 : f32
    %129 = vector.broadcast %cst_49 : f32 to vector<8x128xf32>
    %130 = arith.addf %129, %128 : vector<8x128xf32>
    %131 = tpu.reciprocal %130 {approx = true} : vector<8x128xf32> -> vector<8x128xf32>
    %132 = arith.mulf %122, %63 : vector<8x128xf32>
    %133 = arith.mulf %115, %124 : vector<8x128xf32>
    %134 = arith.addf %132, %133 : vector<8x128xf32>
    %135 = math.tanh %134 : vector<8x128xf32>
    %136 = arith.mulf %131, %135 : vector<8x128xf32>
    %137 = arith.truncf %136 : vector<8x128xf32> to vector<8x128xbf16>
    %c0_50 = arith.constant 0 : index
    %c0_51 = arith.constant 0 : index
    %138 = vector.load %arg15[%c0_50, %c0_51] : memref<8x256xbf16, #tpu.memory_space<vmem>>, vector<8x128xbf16>
    tpu.vector_store %arg15[%c0_50, %c0_51], %137 {strides = array<i32>} : memref<8x256xbf16, #tpu.memory_space<vmem>>, vector<8x128xbf16>,
    %c0_52 = arith.constant 0 : index
    %c0_53 = arith.constant 0 : index
    %139 = vector.load %arg15[%c0_52, %c0_53] : memref<8x256xbf16, #tpu.memory_space<vmem>>, vector<8x256xbf16>
    %cst_54 = arith.constant dense<0.000000e+00> : vector<8x1024xf32>
    %140 = tpu.matmul %139, %31, %cst_54 {dimension_numbers = #tpu.dot_dimension_numbers<[1], [0], [0], [1], [0, 0, 1, 1], [], []>} : vector<8x256xbf16>, vector<256x1024xbf16>, vector<8x1024xf32> -> vector<8x1024xf32>
    %141 = vector.extract_strided_slice %140 {offsets = [0, 512], sizes = [8, 512], strides = [1, 1]} : vector<8x1024xf32> to vector<8x512xf32>
    %142 = arith.addf %141, %34 : vector<8x512xf32>
    %143 = vector.extract_strided_slice %142 {offsets = [0, 0], sizes = [8, 128], strides = [1, 1]} : vector<8x512xf32> to vector<8x128xf32>
    %cst_55 = arith.constant 0.000000e+00 : f32
    %144 = vector.broadcast %cst_55 : f32 to vector<8x128xf32>
    %145 = arith.subf %144, %143 : vector<8x128xf32>
    %146 = math.exp %145 : vector<8x128xf32>
    %cst_56 = arith.constant 1.000000e+00 : f32
    %147 = vector.broadcast %cst_56 : f32 to vector<8x128xf32>
    %148 = arith.addf %147, %146 : vector<8x128xf32>
    %149 = tpu.reciprocal %148 {approx = true} : vector<8x128xf32> -> vector<8x128xf32>
    %150 = vector.extract_strided_slice %142 {offsets = [0, 128], sizes = [8, 128], strides = [1, 1]} : vector<8x512xf32> to vector<8x128xf32>
    %cst_57 = arith.constant 0.000000e+00 : f32
    %151 = vector.broadcast %cst_57 : f32 to vector<8x128xf32>
    %152 = arith.subf %151, %150 : vector<8x128xf32>
    %153 = math.exp %152 : vector<8x128xf32>
    %cst_58 = arith.constant 1.000000e+00 : f32
    %154 = vector.broadcast %cst_58 : f32 to vector<8x128xf32>
    %155 = arith.addf %154, %153 : vector<8x128xf32>
    %156 = tpu.reciprocal %155 {approx = true} : vector<8x128xf32> -> vector<8x128xf32>
    %157 = vector.extract_strided_slice %142 {offsets = [0, 256], sizes = [8, 128], strides = [1, 1]} : vector<8x512xf32> to vector<8x128xf32>
    %158 = math.tanh %157 : vector<8x128xf32>
    %159 = vector.extract_strided_slice %142 {offsets = [0, 384], sizes = [8, 128], strides = [1, 1]} : vector<8x512xf32> to vector<8x128xf32>
    %cst_59 = arith.constant 0.000000e+00 : f32
    %160 = vector.broadcast %cst_59 : f32 to vector<8x128xf32>
    %161 = arith.subf %160, %159 : vector<8x128xf32>
    %162 = math.exp %161 : vector<8x128xf32>
    %cst_60 = arith.constant 1.000000e+00 : f32
    %163 = vector.broadcast %cst_60 : f32 to vector<8x128xf32>
    %164 = arith.addf %163, %162 : vector<8x128xf32>
    %165 = tpu.reciprocal %164 {approx = true} : vector<8x128xf32> -> vector<8x128xf32>
    %166 = arith.mulf %156, %100 : vector<8x128xf32>
    %167 = arith.mulf %149, %158 : vector<8x128xf32>
    %168 = arith.addf %166, %167 : vector<8x128xf32>
    %169 = math.tanh %168 : vector<8x128xf32>
    %170 = arith.mulf %165, %169 : vector<8x128xf32>
    %171 = arith.truncf %170 : vector<8x128xf32> to vector<8x128xbf16>
    %c0_61 = arith.constant 0 : index
    %c128_62 = arith.constant 128 : index
    %172 = vector.load %arg15[%c0_61, %c128_62] : memref<8x256xbf16, #tpu.memory_space<vmem>>, vector<8x128xbf16>
    tpu.vector_store %arg15[%c0_61, %c128_62], %171 {strides = array<i32>} : memref<8x256xbf16, #tpu.memory_space<vmem>>, vector<8x128xbf16>,
    %173 = vector.extract_strided_slice %140 {offsets = [0, 0], sizes = [8, 512], strides = [1, 1]} : vector<8x1024xf32> to vector<8x512xf32>
    %174 = vector.extract_strided_slice %30 {offsets = [2, 0, 0], sizes = [1, 8, 512], strides = [1, 1, 1]} : vector<7x8x512xf32> to vector<1x8x512xf32>
    %175 = vector.shape_cast %174 : vector<1x8x512xf32> to vector<8x512xf32>
    %176 = arith.addf %173, %175 : vector<8x512xf32>
    %177 = vector.extract_strided_slice %176 {offsets = [0, 0], sizes = [8, 128], strides = [1, 1]} : vector<8x512xf32> to vector<8x128xf32>
    %cst_63 = arith.constant 0.000000e+00 : f32
    %178 = vector.broadcast %cst_63 : f32 to vector<8x128xf32>
    %179 = arith.subf %178, %177 : vector<8x128xf32>
    %180 = math.exp %179 : vector<8x128xf32>
    %cst_64 = arith.constant 1.000000e+00 : f32
    %181 = vector.broadcast %cst_64 : f32 to vector<8x128xf32>
    %182 = arith.addf %181, %180 : vector<8x128xf32>
    %183 = tpu.reciprocal %182 {approx = true} : vector<8x128xf32> -> vector<8x128xf32>
    %184 = vector.extract_strided_slice %176 {offsets = [0, 128], sizes = [8, 128], strides = [1, 1]} : vector<8x512xf32> to vector<8x128xf32>
    %cst_65 = arith.constant 0.000000e+00 : f32
    %185 = vector.broadcast %cst_65 : f32 to vector<8x128xf32>
    %186 = arith.subf %185, %184 : vector<8x128xf32>
    %187 = math.exp %186 : vector<8x128xf32>
    %cst_66 = arith.constant 1.000000e+00 : f32
    %188 = vector.broadcast %cst_66 : f32 to vector<8x128xf32>
    %189 = arith.addf %188, %187 : vector<8x128xf32>
    %190 = tpu.reciprocal %189 {approx = true} : vector<8x128xf32> -> vector<8x128xf32>
    %191 = vector.extract_strided_slice %176 {offsets = [0, 256], sizes = [8, 128], strides = [1, 1]} : vector<8x512xf32> to vector<8x128xf32>
    %192 = math.tanh %191 : vector<8x128xf32>
    %193 = vector.extract_strided_slice %176 {offsets = [0, 384], sizes = [8, 128], strides = [1, 1]} : vector<8x512xf32> to vector<8x128xf32>
    %cst_67 = arith.constant 0.000000e+00 : f32
    %194 = vector.broadcast %cst_67 : f32 to vector<8x128xf32>
    %195 = arith.subf %194, %193 : vector<8x128xf32>
    %196 = math.exp %195 : vector<8x128xf32>
    %cst_68 = arith.constant 1.000000e+00 : f32
    %197 = vector.broadcast %cst_68 : f32 to vector<8x128xf32>
    %198 = arith.addf %197, %196 : vector<8x128xf32>
    %199 = tpu.reciprocal %198 {approx = true} : vector<8x128xf32> -> vector<8x128xf32>
    %200 = arith.mulf %190, %134 : vector<8x128xf32>
    %201 = arith.mulf %183, %192 : vector<8x128xf32>
    %202 = arith.addf %200, %201 : vector<8x128xf32>
    %203 = math.tanh %202 : vector<8x128xf32>
    %204 = arith.mulf %199, %203 : vector<8x128xf32>
    %205 = arith.truncf %204 : vector<8x128xf32> to vector<8x128xbf16>
    %c0_69 = arith.constant 0 : index
    %c0_70 = arith.constant 0 : index
    %206 = vector.load %arg15[%c0_69, %c0_70] : memref<8x256xbf16, #tpu.memory_space<vmem>>, vector<8x128xbf16>
    tpu.vector_store %arg15[%c0_69, %c0_70], %205 {strides = array<i32>} : memref<8x256xbf16, #tpu.memory_space<vmem>>, vector<8x128xbf16>,
    %c0_71 = arith.constant 0 : index
    %c0_72 = arith.constant 0 : index
    %207 = vector.load %arg15[%c0_71, %c0_72] : memref<8x256xbf16, #tpu.memory_space<vmem>>, vector<8x256xbf16>
    %cst_73 = arith.constant dense<0.000000e+00> : vector<8x1024xf32>
    %208 = tpu.matmul %207, %31, %cst_73 {dimension_numbers = #tpu.dot_dimension_numbers<[1], [0], [0], [1], [0, 0, 1, 1], [], []>} : vector<8x256xbf16>, vector<256x1024xbf16>, vector<8x1024xf32> -> vector<8x1024xf32>
    %209 = vector.extract_strided_slice %208 {offsets = [0, 512], sizes = [8, 512], strides = [1, 1]} : vector<8x1024xf32> to vector<8x512xf32>
    %210 = arith.addf %209, %34 : vector<8x512xf32>
    %211 = vector.extract_strided_slice %210 {offsets = [0, 0], sizes = [8, 128], strides = [1, 1]} : vector<8x512xf32> to vector<8x128xf32>
    %cst_74 = arith.constant 0.000000e+00 : f32
    %212 = vector.broadcast %cst_74 : f32 to vector<8x128xf32>
    %213 = arith.subf %212, %211 : vector<8x128xf32>
    %214 = math.exp %213 : vector<8x128xf32>
    %cst_75 = arith.constant 1.000000e+00 : f32
    %215 = vector.broadcast %cst_75 : f32 to vector<8x128xf32>
    %216 = arith.addf %215, %214 : vector<8x128xf32>
    %217 = tpu.reciprocal %216 {approx = true} : vector<8x128xf32> -> vector<8x128xf32>
    %218 = vector.extract_strided_slice %210 {offsets = [0, 128], sizes = [8, 128], strides = [1, 1]} : vector<8x512xf32> to vector<8x128xf32>
    %cst_76 = arith.constant 0.000000e+00 : f32
    %219 = vector.broadcast %cst_76 : f32 to vector<8x128xf32>
    %220 = arith.subf %219, %218 : vector<8x128xf32>
    %221 = math.exp %220 : vector<8x128xf32>
    %cst_77 = arith.constant 1.000000e+00 : f32
    %222 = vector.broadcast %cst_77 : f32 to vector<8x128xf32>
    %223 = arith.addf %222, %221 : vector<8x128xf32>
    %224 = tpu.reciprocal %223 {approx = true} : vector<8x128xf32> -> vector<8x128xf32>
    %225 = vector.extract_strided_slice %210 {offsets = [0, 256], sizes = [8, 128], strides = [1, 1]} : vector<8x512xf32> to vector<8x128xf32>
    %226 = math.tanh %225 : vector<8x128xf32>
    %227 = vector.extract_strided_slice %210 {offsets = [0, 384], sizes = [8, 128], strides = [1, 1]} : vector<8x512xf32> to vector<8x128xf32>
    %cst_78 = arith.constant 0.000000e+00 : f32
    %228 = vector.broadcast %cst_78 : f32 to vector<8x128xf32>
    %229 = arith.subf %228, %227 : vector<8x128xf32>
    %230 = math.exp %229 : vector<8x128xf32>
    %cst_79 = arith.constant 1.000000e+00 : f32
    %231 = vector.broadcast %cst_79 : f32 to vector<8x128xf32>
    %232 = arith.addf %231, %230 : vector<8x128xf32>
    %233 = tpu.reciprocal %232 {approx = true} : vector<8x128xf32> -> vector<8x128xf32>
    %234 = arith.mulf %224, %168 : vector<8x128xf32>
    %235 = arith.mulf %217, %226 : vector<8x128xf32>
    %236 = arith.addf %234, %235 : vector<8x128xf32>
    %237 = math.tanh %236 : vector<8x128xf32>
    %238 = arith.mulf %233, %237 : vector<8x128xf32>
    %239 = arith.truncf %238 : vector<8x128xf32> to vector<8x128xbf16>
    %c0_80 = arith.constant 0 : index
    %c128_81 = arith.constant 128 : index
    %240 = vector.load %arg15[%c0_80, %c128_81] : memref<8x256xbf16, #tpu.memory_space<vmem>>, vector<8x128xbf16>
    tpu.vector_store %arg15[%c0_80, %c128_81], %239 {strides = array<i32>} : memref<8x256xbf16, #tpu.memory_space<vmem>>, vector<8x128xbf16>,
    %241 = vector.extract_strided_slice %208 {offsets = [0, 0], sizes = [8, 512], strides = [1, 1]} : vector<8x1024xf32> to vector<8x512xf32>
    %242 = vector.extract_strided_slice %30 {offsets = [3, 0, 0], sizes = [1, 8, 512], strides = [1, 1, 1]} : vector<7x8x512xf32> to vector<1x8x512xf32>
    %243 = vector.shape_cast %242 : vector<1x8x512xf32> to vector<8x512xf32>
    %244 = arith.addf %241, %243 : vector<8x512xf32>
    %245 = vector.extract_strided_slice %244 {offsets = [0, 0], sizes = [8, 128], strides = [1, 1]} : vector<8x512xf32> to vector<8x128xf32>
    %cst_82 = arith.constant 0.000000e+00 : f32
    %246 = vector.broadcast %cst_82 : f32 to vector<8x128xf32>
    %247 = arith.subf %246, %245 : vector<8x128xf32>
    %248 = math.exp %247 : vector<8x128xf32>
    %cst_83 = arith.constant 1.000000e+00 : f32
    %249 = vector.broadcast %cst_83 : f32 to vector<8x128xf32>
    %250 = arith.addf %249, %248 : vector<8x128xf32>
    %251 = tpu.reciprocal %250 {approx = true} : vector<8x128xf32> -> vector<8x128xf32>
    %252 = vector.extract_strided_slice %244 {offsets = [0, 128], sizes = [8, 128], strides = [1, 1]} : vector<8x512xf32> to vector<8x128xf32>
    %cst_84 = arith.constant 0.000000e+00 : f32
    %253 = vector.broadcast %cst_84 : f32 to vector<8x128xf32>
    %254 = arith.subf %253, %252 : vector<8x128xf32>
    %255 = math.exp %254 : vector<8x128xf32>
    %cst_85 = arith.constant 1.000000e+00 : f32
    %256 = vector.broadcast %cst_85 : f32 to vector<8x128xf32>
    %257 = arith.addf %256, %255 : vector<8x128xf32>
    %258 = tpu.reciprocal %257 {approx = true} : vector<8x128xf32> -> vector<8x128xf32>
    %259 = vector.extract_strided_slice %244 {offsets = [0, 256], sizes = [8, 128], strides = [1, 1]} : vector<8x512xf32> to vector<8x128xf32>
    %260 = math.tanh %259 : vector<8x128xf32>
    %261 = vector.extract_strided_slice %244 {offsets = [0, 384], sizes = [8, 128], strides = [1, 1]} : vector<8x512xf32> to vector<8x128xf32>
    %cst_86 = arith.constant 0.000000e+00 : f32
    %262 = vector.broadcast %cst_86 : f32 to vector<8x128xf32>
    %263 = arith.subf %262, %261 : vector<8x128xf32>
    %264 = math.exp %263 : vector<8x128xf32>
    %cst_87 = arith.constant 1.000000e+00 : f32
    %265 = vector.broadcast %cst_87 : f32 to vector<8x128xf32>
    %266 = arith.addf %265, %264 : vector<8x128xf32>
    %267 = tpu.reciprocal %266 {approx = true} : vector<8x128xf32> -> vector<8x128xf32>
    %268 = arith.mulf %258, %202 : vector<8x128xf32>
    %269 = arith.mulf %251, %260 : vector<8x128xf32>
    %270 = arith.addf %268, %269 : vector<8x128xf32>
    %271 = math.tanh %270 : vector<8x128xf32>
    %272 = arith.mulf %267, %271 : vector<8x128xf32>
    %273 = arith.truncf %272 : vector<8x128xf32> to vector<8x128xbf16>
    %c0_88 = arith.constant 0 : index
    %c0_89 = arith.constant 0 : index
    %274 = vector.load %arg15[%c0_88, %c0_89] : memref<8x256xbf16, #tpu.memory_space<vmem>>, vector<8x128xbf16>
    tpu.vector_store %arg15[%c0_88, %c0_89], %273 {strides = array<i32>} : memref<8x256xbf16, #tpu.memory_space<vmem>>, vector<8x128xbf16>,
    %c0_90 = arith.constant 0 : index
    %c0_91 = arith.constant 0 : index
    %275 = vector.load %arg15[%c0_90, %c0_91] : memref<8x256xbf16, #tpu.memory_space<vmem>>, vector<8x256xbf16>
    %cst_92 = arith.constant dense<0.000000e+00> : vector<8x1024xf32>
    %276 = tpu.matmul %275, %31, %cst_92 {dimension_numbers = #tpu.dot_dimension_numbers<[1], [0], [0], [1], [0, 0, 1, 1], [], []>} : vector<8x256xbf16>, vector<256x1024xbf16>, vector<8x1024xf32> -> vector<8x1024xf32>
    %277 = vector.extract_strided_slice %276 {offsets = [0, 512], sizes = [8, 512], strides = [1, 1]} : vector<8x1024xf32> to vector<8x512xf32>
    %278 = arith.addf %277, %34 : vector<8x512xf32>
    %279 = vector.extract_strided_slice %278 {offsets = [0, 0], sizes = [8, 128], strides = [1, 1]} : vector<8x512xf32> to vector<8x128xf32>
    %cst_93 = arith.constant 0.000000e+00 : f32
    %280 = vector.broadcast %cst_93 : f32 to vector<8x128xf32>
    %281 = arith.subf %280, %279 : vector<8x128xf32>
    %282 = math.exp %281 : vector<8x128xf32>
    %cst_94 = arith.constant 1.000000e+00 : f32
    %283 = vector.broadcast %cst_94 : f32 to vector<8x128xf32>
    %284 = arith.addf %283, %282 : vector<8x128xf32>
    %285 = tpu.reciprocal %284 {approx = true} : vector<8x128xf32> -> vector<8x128xf32>
    %286 = vector.extract_strided_slice %278 {offsets = [0, 128], sizes = [8, 128], strides = [1, 1]} : vector<8x512xf32> to vector<8x128xf32>
    %cst_95 = arith.constant 0.000000e+00 : f32
    %287 = vector.broadcast %cst_95 : f32 to vector<8x128xf32>
    %288 = arith.subf %287, %286 : vector<8x128xf32>
    %289 = math.exp %288 : vector<8x128xf32>
    %cst_96 = arith.constant 1.000000e+00 : f32
    %290 = vector.broadcast %cst_96 : f32 to vector<8x128xf32>
    %291 = arith.addf %290, %289 : vector<8x128xf32>
    %292 = tpu.reciprocal %291 {approx = true} : vector<8x128xf32> -> vector<8x128xf32>
    %293 = vector.extract_strided_slice %278 {offsets = [0, 256], sizes = [8, 128], strides = [1, 1]} : vector<8x512xf32> to vector<8x128xf32>
    %294 = math.tanh %293 : vector<8x128xf32>
    %295 = vector.extract_strided_slice %278 {offsets = [0, 384], sizes = [8, 128], strides = [1, 1]} : vector<8x512xf32> to vector<8x128xf32>
    %cst_97 = arith.constant 0.000000e+00 : f32
    %296 = vector.broadcast %cst_97 : f32 to vector<8x128xf32>
    %297 = arith.subf %296, %295 : vector<8x128xf32>
    %298 = math.exp %297 : vector<8x128xf32>
    %cst_98 = arith.constant 1.000000e+00 : f32
    %299 = vector.broadcast %cst_98 : f32 to vector<8x128xf32>
    %300 = arith.addf %299, %298 : vector<8x128xf32>
    %301 = tpu.reciprocal %300 {approx = true} : vector<8x128xf32> -> vector<8x128xf32>
    %302 = arith.mulf %292, %236 : vector<8x128xf32>
    %303 = arith.mulf %285, %294 : vector<8x128xf32>
    %304 = arith.addf %302, %303 : vector<8x128xf32>
    %305 = math.tanh %304 : vector<8x128xf32>
    %306 = arith.mulf %301, %305 : vector<8x128xf32>
    %307 = arith.truncf %306 : vector<8x128xf32> to vector<8x128xbf16>
    %c0_99 = arith.constant 0 : index
    %c128_100 = arith.constant 128 : index
    %308 = vector.load %arg15[%c0_99, %c128_100] : memref<8x256xbf16, #tpu.memory_space<vmem>>, vector<8x128xbf16>
    tpu.vector_store %arg15[%c0_99, %c128_100], %307 {strides = array<i32>} : memref<8x256xbf16, #tpu.memory_space<vmem>>, vector<8x128xbf16>,
    %309 = vector.extract_strided_slice %276 {offsets = [0, 0], sizes = [8, 512], strides = [1, 1]} : vector<8x1024xf32> to vector<8x512xf32>
    %310 = vector.extract_strided_slice %30 {offsets = [4, 0, 0], sizes = [1, 8, 512], strides = [1, 1, 1]} : vector<7x8x512xf32> to vector<1x8x512xf32>
    %311 = vector.shape_cast %310 : vector<1x8x512xf32> to vector<8x512xf32>
    %312 = arith.addf %309, %311 : vector<8x512xf32>
    %313 = vector.extract_strided_slice %312 {offsets = [0, 0], sizes = [8, 128], strides = [1, 1]} : vector<8x512xf32> to vector<8x128xf32>
    %cst_101 = arith.constant 0.000000e+00 : f32
    %314 = vector.broadcast %cst_101 : f32 to vector<8x128xf32>
    %315 = arith.subf %314, %313 : vector<8x128xf32>
    %316 = math.exp %315 : vector<8x128xf32>
    %cst_102 = arith.constant 1.000000e+00 : f32
    %317 = vector.broadcast %cst_102 : f32 to vector<8x128xf32>
    %318 = arith.addf %317, %316 : vector<8x128xf32>
    %319 = tpu.reciprocal %318 {approx = true} : vector<8x128xf32> -> vector<8x128xf32>
    %320 = vector.extract_strided_slice %312 {offsets = [0, 128], sizes = [8, 128], strides = [1, 1]} : vector<8x512xf32> to vector<8x128xf32>
    %cst_103 = arith.constant 0.000000e+00 : f32
    %321 = vector.broadcast %cst_103 : f32 to vector<8x128xf32>
    %322 = arith.subf %321, %320 : vector<8x128xf32>
    %323 = math.exp %322 : vector<8x128xf32>
    %cst_104 = arith.constant 1.000000e+00 : f32
    %324 = vector.broadcast %cst_104 : f32 to vector<8x128xf32>
    %325 = arith.addf %324, %323 : vector<8x128xf32>
    %326 = tpu.reciprocal %325 {approx = true} : vector<8x128xf32> -> vector<8x128xf32>
    %327 = vector.extract_strided_slice %312 {offsets = [0, 256], sizes = [8, 128], strides = [1, 1]} : vector<8x512xf32> to vector<8x128xf32>
    %328 = math.tanh %327 : vector<8x128xf32>
    %329 = vector.extract_strided_slice %312 {offsets = [0, 384], sizes = [8, 128], strides = [1, 1]} : vector<8x512xf32> to vector<8x128xf32>
    %cst_105 = arith.constant 0.000000e+00 : f32
    %330 = vector.broadcast %cst_105 : f32 to vector<8x128xf32>
    %331 = arith.subf %330, %329 : vector<8x128xf32>
    %332 = math.exp %331 : vector<8x128xf32>
    %cst_106 = arith.constant 1.000000e+00 : f32
    %333 = vector.broadcast %cst_106 : f32 to vector<8x128xf32>
    %334 = arith.addf %333, %332 : vector<8x128xf32>
    %335 = tpu.reciprocal %334 {approx = true} : vector<8x128xf32> -> vector<8x128xf32>
    %336 = arith.mulf %326, %270 : vector<8x128xf32>
    %337 = arith.mulf %319, %328 : vector<8x128xf32>
    %338 = arith.addf %336, %337 : vector<8x128xf32>
    %339 = math.tanh %338 : vector<8x128xf32>
    %340 = arith.mulf %335, %339 : vector<8x128xf32>
    %341 = arith.truncf %340 : vector<8x128xf32> to vector<8x128xbf16>
    %c0_107 = arith.constant 0 : index
    %c0_108 = arith.constant 0 : index
    %342 = vector.load %arg15[%c0_107, %c0_108] : memref<8x256xbf16, #tpu.memory_space<vmem>>, vector<8x128xbf16>
    tpu.vector_store %arg15[%c0_107, %c0_108], %341 {strides = array<i32>} : memref<8x256xbf16, #tpu.memory_space<vmem>>, vector<8x128xbf16>,
    %c0_109 = arith.constant 0 : index
    %c0_110 = arith.constant 0 : index
    %343 = vector.load %arg15[%c0_109, %c0_110] : memref<8x256xbf16, #tpu.memory_space<vmem>>, vector<8x256xbf16>
    %cst_111 = arith.constant dense<0.000000e+00> : vector<8x1024xf32>
    %344 = tpu.matmul %343, %31, %cst_111 {dimension_numbers = #tpu.dot_dimension_numbers<[1], [0], [0], [1], [0, 0, 1, 1], [], []>} : vector<8x256xbf16>, vector<256x1024xbf16>, vector<8x1024xf32> -> vector<8x1024xf32>
    %345 = vector.extract_strided_slice %344 {offsets = [0, 512], sizes = [8, 512], strides = [1, 1]} : vector<8x1024xf32> to vector<8x512xf32>
    %346 = arith.addf %345, %34 : vector<8x512xf32>
    %347 = vector.extract_strided_slice %346 {offsets = [0, 0], sizes = [8, 128], strides = [1, 1]} : vector<8x512xf32> to vector<8x128xf32>
    %cst_112 = arith.constant 0.000000e+00 : f32
    %348 = vector.broadcast %cst_112 : f32 to vector<8x128xf32>
    %349 = arith.subf %348, %347 : vector<8x128xf32>
    %350 = math.exp %349 : vector<8x128xf32>
    %cst_113 = arith.constant 1.000000e+00 : f32
    %351 = vector.broadcast %cst_113 : f32 to vector<8x128xf32>
    %352 = arith.addf %351, %350 : vector<8x128xf32>
    %353 = tpu.reciprocal %352 {approx = true} : vector<8x128xf32> -> vector<8x128xf32>
    %354 = vector.extract_strided_slice %346 {offsets = [0, 128], sizes = [8, 128], strides = [1, 1]} : vector<8x512xf32> to vector<8x128xf32>
    %cst_114 = arith.constant 0.000000e+00 : f32
    %355 = vector.broadcast %cst_114 : f32 to vector<8x128xf32>
    %356 = arith.subf %355, %354 : vector<8x128xf32>
    %357 = math.exp %356 : vector<8x128xf32>
    %cst_115 = arith.constant 1.000000e+00 : f32
    %358 = vector.broadcast %cst_115 : f32 to vector<8x128xf32>
    %359 = arith.addf %358, %357 : vector<8x128xf32>
    %360 = tpu.reciprocal %359 {approx = true} : vector<8x128xf32> -> vector<8x128xf32>
    %361 = vector.extract_strided_slice %346 {offsets = [0, 256], sizes = [8, 128], strides = [1, 1]} : vector<8x512xf32> to vector<8x128xf32>
    %362 = math.tanh %361 : vector<8x128xf32>
    %363 = vector.extract_strided_slice %346 {offsets = [0, 384], sizes = [8, 128], strides = [1, 1]} : vector<8x512xf32> to vector<8x128xf32>
    %cst_116 = arith.constant 0.000000e+00 : f32
    %364 = vector.broadcast %cst_116 : f32 to vector<8x128xf32>
    %365 = arith.subf %364, %363 : vector<8x128xf32>
    %366 = math.exp %365 : vector<8x128xf32>
    %cst_117 = arith.constant 1.000000e+00 : f32
    %367 = vector.broadcast %cst_117 : f32 to vector<8x128xf32>
    %368 = arith.addf %367, %366 : vector<8x128xf32>
    %369 = tpu.reciprocal %368 {approx = true} : vector<8x128xf32> -> vector<8x128xf32>
    %370 = arith.mulf %360, %304 : vector<8x128xf32>
    %371 = arith.mulf %353, %362 : vector<8x128xf32>
    %372 = arith.addf %370, %371 : vector<8x128xf32>
    %373 = math.tanh %372 : vector<8x128xf32>
    %374 = arith.mulf %369, %373 : vector<8x128xf32>
    %375 = arith.truncf %374 : vector<8x128xf32> to vector<8x128xbf16>
    %c0_118 = arith.constant 0 : index
    %c128_119 = arith.constant 128 : index
    %376 = vector.load %arg15[%c0_118, %c128_119] : memref<8x256xbf16, #tpu.memory_space<vmem>>, vector<8x128xbf16>
    tpu.vector_store %arg15[%c0_118, %c128_119], %375 {strides = array<i32>} : memref<8x256xbf16, #tpu.memory_space<vmem>>, vector<8x128xbf16>,
    %377 = vector.extract_strided_slice %344 {offsets = [0, 0], sizes = [8, 512], strides = [1, 1]} : vector<8x1024xf32> to vector<8x512xf32>
    %378 = vector.extract_strided_slice %30 {offsets = [5, 0, 0], sizes = [1, 8, 512], strides = [1, 1, 1]} : vector<7x8x512xf32> to vector<1x8x512xf32>
    %379 = vector.shape_cast %378 : vector<1x8x512xf32> to vector<8x512xf32>
    %380 = arith.addf %377, %379 : vector<8x512xf32>
    %381 = vector.extract_strided_slice %380 {offsets = [0, 0], sizes = [8, 128], strides = [1, 1]} : vector<8x512xf32> to vector<8x128xf32>
    %cst_120 = arith.constant 0.000000e+00 : f32
    %382 = vector.broadcast %cst_120 : f32 to vector<8x128xf32>
    %383 = arith.subf %382, %381 : vector<8x128xf32>
    %384 = math.exp %383 : vector<8x128xf32>
    %cst_121 = arith.constant 1.000000e+00 : f32
    %385 = vector.broadcast %cst_121 : f32 to vector<8x128xf32>
    %386 = arith.addf %385, %384 : vector<8x128xf32>
    %387 = tpu.reciprocal %386 {approx = true} : vector<8x128xf32> -> vector<8x128xf32>
    %388 = vector.extract_strided_slice %380 {offsets = [0, 128], sizes = [8, 128], strides = [1, 1]} : vector<8x512xf32> to vector<8x128xf32>
    %cst_122 = arith.constant 0.000000e+00 : f32
    %389 = vector.broadcast %cst_122 : f32 to vector<8x128xf32>
    %390 = arith.subf %389, %388 : vector<8x128xf32>
    %391 = math.exp %390 : vector<8x128xf32>
    %cst_123 = arith.constant 1.000000e+00 : f32
    %392 = vector.broadcast %cst_123 : f32 to vector<8x128xf32>
    %393 = arith.addf %392, %391 : vector<8x128xf32>
    %394 = tpu.reciprocal %393 {approx = true} : vector<8x128xf32> -> vector<8x128xf32>
    %395 = vector.extract_strided_slice %380 {offsets = [0, 256], sizes = [8, 128], strides = [1, 1]} : vector<8x512xf32> to vector<8x128xf32>
    %396 = math.tanh %395 : vector<8x128xf32>
    %397 = vector.extract_strided_slice %380 {offsets = [0, 384], sizes = [8, 128], strides = [1, 1]} : vector<8x512xf32> to vector<8x128xf32>
    %cst_124 = arith.constant 0.000000e+00 : f32
    %398 = vector.broadcast %cst_124 : f32 to vector<8x128xf32>
    %399 = arith.subf %398, %397 : vector<8x128xf32>
    %400 = math.exp %399 : vector<8x128xf32>
    %cst_125 = arith.constant 1.000000e+00 : f32
    %401 = vector.broadcast %cst_125 : f32 to vector<8x128xf32>
    %402 = arith.addf %401, %400 : vector<8x128xf32>
    %403 = tpu.reciprocal %402 {approx = true} : vector<8x128xf32> -> vector<8x128xf32>
    %404 = arith.mulf %394, %338 : vector<8x128xf32>
    %405 = arith.mulf %387, %396 : vector<8x128xf32>
    %406 = arith.addf %404, %405 : vector<8x128xf32>
    %407 = math.tanh %406 : vector<8x128xf32>
    %408 = arith.mulf %403, %407 : vector<8x128xf32>
    %409 = arith.truncf %408 : vector<8x128xf32> to vector<8x128xbf16>
    %c0_126 = arith.constant 0 : index
    %c0_127 = arith.constant 0 : index
    %410 = vector.load %arg15[%c0_126, %c0_127] : memref<8x256xbf16, #tpu.memory_space<vmem>>, vector<8x128xbf16>
    tpu.vector_store %arg15[%c0_126, %c0_127], %409 {strides = array<i32>} : memref<8x256xbf16, #tpu.memory_space<vmem>>, vector<8x128xbf16>,
    %c0_128 = arith.constant 0 : index
    %c0_129 = arith.constant 0 : index
    %411 = vector.load %arg15[%c0_128, %c0_129] : memref<8x256xbf16, #tpu.memory_space<vmem>>, vector<8x256xbf16>
    %cst_130 = arith.constant dense<0.000000e+00> : vector<8x1024xf32>
    %412 = tpu.matmul %411, %31, %cst_130 {dimension_numbers = #tpu.dot_dimension_numbers<[1], [0], [0], [1], [0, 0, 1, 1], [], []>} : vector<8x256xbf16>, vector<256x1024xbf16>, vector<8x1024xf32> -> vector<8x1024xf32>
    %413 = vector.extract_strided_slice %412 {offsets = [0, 512], sizes = [8, 512], strides = [1, 1]} : vector<8x1024xf32> to vector<8x512xf32>
    %414 = arith.addf %413, %34 : vector<8x512xf32>
    %415 = vector.extract_strided_slice %414 {offsets = [0, 0], sizes = [8, 128], strides = [1, 1]} : vector<8x512xf32> to vector<8x128xf32>
    %cst_131 = arith.constant 0.000000e+00 : f32
    %416 = vector.broadcast %cst_131 : f32 to vector<8x128xf32>
    %417 = arith.subf %416, %415 : vector<8x128xf32>
    %418 = math.exp %417 : vector<8x128xf32>
    %cst_132 = arith.constant 1.000000e+00 : f32
    %419 = vector.broadcast %cst_132 : f32 to vector<8x128xf32>
    %420 = arith.addf %419, %418 : vector<8x128xf32>
    %421 = tpu.reciprocal %420 {approx = true} : vector<8x128xf32> -> vector<8x128xf32>
    %422 = vector.extract_strided_slice %414 {offsets = [0, 128], sizes = [8, 128], strides = [1, 1]} : vector<8x512xf32> to vector<8x128xf32>
    %cst_133 = arith.constant 0.000000e+00 : f32
    %423 = vector.broadcast %cst_133 : f32 to vector<8x128xf32>
    %424 = arith.subf %423, %422 : vector<8x128xf32>
    %425 = math.exp %424 : vector<8x128xf32>
    %cst_134 = arith.constant 1.000000e+00 : f32
    %426 = vector.broadcast %cst_134 : f32 to vector<8x128xf32>
    %427 = arith.addf %426, %425 : vector<8x128xf32>
    %428 = tpu.reciprocal %427 {approx = true} : vector<8x128xf32> -> vector<8x128xf32>
    %429 = vector.extract_strided_slice %414 {offsets = [0, 256], sizes = [8, 128], strides = [1, 1]} : vector<8x512xf32> to vector<8x128xf32>
    %430 = math.tanh %429 : vector<8x128xf32>
    %431 = vector.extract_strided_slice %414 {offsets = [0, 384], sizes = [8, 128], strides = [1, 1]} : vector<8x512xf32> to vector<8x128xf32>
    %cst_135 = arith.constant 0.000000e+00 : f32
    %432 = vector.broadcast %cst_135 : f32 to vector<8x128xf32>
    %433 = arith.subf %432, %431 : vector<8x128xf32>
    %434 = math.exp %433 : vector<8x128xf32>
    %cst_136 = arith.constant 1.000000e+00 : f32
    %435 = vector.broadcast %cst_136 : f32 to vector<8x128xf32>
    %436 = arith.addf %435, %434 : vector<8x128xf32>
    %437 = tpu.reciprocal %436 {approx = true} : vector<8x128xf32> -> vector<8x128xf32>
    %438 = arith.mulf %428, %372 : vector<8x128xf32>
    %439 = arith.mulf %421, %430 : vector<8x128xf32>
    %440 = arith.addf %438, %439 : vector<8x128xf32>
    %441 = math.tanh %440 : vector<8x128xf32>
    %442 = arith.mulf %437, %441 : vector<8x128xf32>
    %443 = arith.truncf %442 : vector<8x128xf32> to vector<8x128xbf16>
    %c0_137 = arith.constant 0 : index
    %c128_138 = arith.constant 128 : index
    %444 = vector.load %arg15[%c0_137, %c128_138] : memref<8x256xbf16, #tpu.memory_space<vmem>>, vector<8x128xbf16>
    tpu.vector_store %arg15[%c0_137, %c128_138], %443 {strides = array<i32>} : memref<8x256xbf16, #tpu.memory_space<vmem>>, vector<8x128xbf16>,
    %445 = vector.extract_strided_slice %412 {offsets = [0, 0], sizes = [8, 512], strides = [1, 1]} : vector<8x1024xf32> to vector<8x512xf32>
    %446 = vector.extract_strided_slice %30 {offsets = [6, 0, 0], sizes = [1, 8, 512], strides = [1, 1, 1]} : vector<7x8x512xf32> to vector<1x8x512xf32>
    %447 = vector.shape_cast %446 : vector<1x8x512xf32> to vector<8x512xf32>
    %448 = arith.addf %445, %447 : vector<8x512xf32>
    %449 = vector.extract_strided_slice %448 {offsets = [0, 0], sizes = [8, 128], strides = [1, 1]} : vector<8x512xf32> to vector<8x128xf32>
    %cst_139 = arith.constant 0.000000e+00 : f32
    %450 = vector.broadcast %cst_139 : f32 to vector<8x128xf32>
    %451 = arith.subf %450, %449 : vector<8x128xf32>
    %452 = math.exp %451 : vector<8x128xf32>
    %cst_140 = arith.constant 1.000000e+00 : f32
    %453 = vector.broadcast %cst_140 : f32 to vector<8x128xf32>
    %454 = arith.addf %453, %452 : vector<8x128xf32>
    %455 = tpu.reciprocal %454 {approx = true} : vector<8x128xf32> -> vector<8x128xf32>
    %456 = vector.extract_strided_slice %448 {offsets = [0, 128], sizes = [8, 128], strides = [1, 1]} : vector<8x512xf32> to vector<8x128xf32>
    %cst_141 = arith.constant 0.000000e+00 : f32
    %457 = vector.broadcast %cst_141 : f32 to vector<8x128xf32>
    %458 = arith.subf %457, %456 : vector<8x128xf32>
    %459 = math.exp %458 : vector<8x128xf32>
    %cst_142 = arith.constant 1.000000e+00 : f32
    %460 = vector.broadcast %cst_142 : f32 to vector<8x128xf32>
    %461 = arith.addf %460, %459 : vector<8x128xf32>
    %462 = tpu.reciprocal %461 {approx = true} : vector<8x128xf32> -> vector<8x128xf32>
    %463 = vector.extract_strided_slice %448 {offsets = [0, 256], sizes = [8, 128], strides = [1, 1]} : vector<8x512xf32> to vector<8x128xf32>
    %464 = math.tanh %463 : vector<8x128xf32>
    %465 = vector.extract_strided_slice %448 {offsets = [0, 384], sizes = [8, 128], strides = [1, 1]} : vector<8x512xf32> to vector<8x128xf32>
    %cst_143 = arith.constant 0.000000e+00 : f32
    %466 = vector.broadcast %cst_143 : f32 to vector<8x128xf32>
    %467 = arith.subf %466, %465 : vector<8x128xf32>
    %468 = math.exp %467 : vector<8x128xf32>
    %cst_144 = arith.constant 1.000000e+00 : f32
    %469 = vector.broadcast %cst_144 : f32 to vector<8x128xf32>
    %470 = arith.addf %469, %468 : vector<8x128xf32>
    %471 = tpu.reciprocal %470 {approx = true} : vector<8x128xf32> -> vector<8x128xf32>
    %472 = arith.mulf %462, %406 : vector<8x128xf32>
    %473 = arith.mulf %455, %464 : vector<8x128xf32>
    %474 = arith.addf %472, %473 : vector<8x128xf32>
    %475 = math.tanh %474 : vector<8x128xf32>
    %476 = arith.mulf %471, %475 : vector<8x128xf32>
    %477 = arith.truncf %476 : vector<8x128xf32> to vector<8x128xbf16>
    %c0_145 = arith.constant 0 : index
    %c0_146 = arith.constant 0 : index
    %478 = vector.load %arg15[%c0_145, %c0_146] : memref<8x256xbf16, #tpu.memory_space<vmem>>, vector<8x128xbf16>
    tpu.vector_store %arg15[%c0_145, %c0_146], %477 {strides = array<i32>} : memref<8x256xbf16, #tpu.memory_space<vmem>>, vector<8x128xbf16>,
    %c0_147 = arith.constant 0 : index
    %c0_148 = arith.constant 0 : index
    %479 = vector.load %arg15[%c0_147, %c0_148] : memref<8x256xbf16, #tpu.memory_space<vmem>>, vector<8x256xbf16>
    %cst_149 = arith.constant dense<0.000000e+00> : vector<8x1024xf32>
    %480 = tpu.matmul %479, %31, %cst_149 {dimension_numbers = #tpu.dot_dimension_numbers<[1], [0], [0], [1], [0, 0, 1, 1], [], []>} : vector<8x256xbf16>, vector<256x1024xbf16>, vector<8x1024xf32> -> vector<8x1024xf32>
    %481 = vector.extract_strided_slice %480 {offsets = [0, 512], sizes = [8, 512], strides = [1, 1]} : vector<8x1024xf32> to vector<8x512xf32>
    %482 = arith.addf %481, %34 : vector<8x512xf32>
    %483 = vector.extract_strided_slice %482 {offsets = [0, 0], sizes = [8, 128], strides = [1, 1]} : vector<8x512xf32> to vector<8x128xf32>
    %cst_150 = arith.constant 0.000000e+00 : f32
    %484 = vector.broadcast %cst_150 : f32 to vector<8x128xf32>
    %485 = arith.subf %484, %483 : vector<8x128xf32>
    %486 = math.exp %485 : vector<8x128xf32>
    %cst_151 = arith.constant 1.000000e+00 : f32
    %487 = vector.broadcast %cst_151 : f32 to vector<8x128xf32>
    %488 = arith.addf %487, %486 : vector<8x128xf32>
    %489 = tpu.reciprocal %488 {approx = true} : vector<8x128xf32> -> vector<8x128xf32>
    %490 = vector.extract_strided_slice %482 {offsets = [0, 128], sizes = [8, 128], strides = [1, 1]} : vector<8x512xf32> to vector<8x128xf32>
    %cst_152 = arith.constant 0.000000e+00 : f32
    %491 = vector.broadcast %cst_152 : f32 to vector<8x128xf32>
    %492 = arith.subf %491, %490 : vector<8x128xf32>
    %493 = math.exp %492 : vector<8x128xf32>
    %cst_153 = arith.constant 1.000000e+00 : f32
    %494 = vector.broadcast %cst_153 : f32 to vector<8x128xf32>
    %495 = arith.addf %494, %493 : vector<8x128xf32>
    %496 = tpu.reciprocal %495 {approx = true} : vector<8x128xf32> -> vector<8x128xf32>
    %497 = vector.extract_strided_slice %482 {offsets = [0, 256], sizes = [8, 128], strides = [1, 1]} : vector<8x512xf32> to vector<8x128xf32>
    %498 = math.tanh %497 : vector<8x128xf32>
    %499 = vector.extract_strided_slice %482 {offsets = [0, 384], sizes = [8, 128], strides = [1, 1]} : vector<8x512xf32> to vector<8x128xf32>
    %cst_154 = arith.constant 0.000000e+00 : f32
    %500 = vector.broadcast %cst_154 : f32 to vector<8x128xf32>
    %501 = arith.subf %500, %499 : vector<8x128xf32>
    %502 = math.exp %501 : vector<8x128xf32>
    %cst_155 = arith.constant 1.000000e+00 : f32
    %503 = vector.broadcast %cst_155 : f32 to vector<8x128xf32>
    %504 = arith.addf %503, %502 : vector<8x128xf32>
    %505 = tpu.reciprocal %504 {approx = true} : vector<8x128xf32> -> vector<8x128xf32>
    %506 = arith.mulf %496, %440 : vector<8x128xf32>
    %507 = arith.mulf %489, %498 : vector<8x128xf32>
    %508 = arith.addf %506, %507 : vector<8x128xf32>
    %509 = math.tanh %508 : vector<8x128xf32>
    %510 = arith.mulf %505, %509 : vector<8x128xf32>
    %511 = arith.truncf %510 : vector<8x128xf32> to vector<8x128xbf16>
    %c0_156 = arith.constant 0 : index
    %c128_157 = arith.constant 128 : index
    %512 = vector.load %arg15[%c0_156, %c128_157] : memref<8x256xbf16, #tpu.memory_space<vmem>>, vector<8x128xbf16>
    tpu.vector_store %arg15[%c0_156, %c128_157], %511 {strides = array<i32>} : memref<8x256xbf16, #tpu.memory_space<vmem>>, vector<8x128xbf16>,
    %c0_158 = arith.constant 0 : index
    %c0_159 = arith.constant 0 : index
    %513 = vector.load %arg10[%c0_158, %c0_159] : memref<1x128xf32, #tpu.memory_space<vmem>>, vector<1x128xf32>
    %514 = vector.broadcast %513 : vector<1x128xf32> to vector<8x128xf32>
    %515 = arith.mulf %510, %514 : vector<8x128xf32>
    %c0_160 = arith.constant 0 : index
    %c0_161 = arith.constant 0 : index
    %516 = vector.load %arg11[%c0_160, %c0_161] : memref<1x128xf32, #tpu.memory_space<vmem>>, vector<1x128xf32>
    %517 = vector.broadcast %516 : vector<1x128xf32> to vector<8x128xf32>
    %518 = arith.addf %515, %517 : vector<8x128xf32>
    %c0_162 = arith.constant 0 : index
    %c0_163 = arith.constant 0 : index
    %519 = vector.load %arg12[%c0_162, %c0_163] : memref<1x128xf32, #tpu.memory_space<vmem>>, vector<1x128xf32>
    %520 = vector.broadcast %519 : vector<1x128xf32> to vector<8x128xf32>
    %521 = arith.mulf %518, %520 : vector<8x128xf32>
    %cst_164 = arith.constant dense<0.000000e+00> : vector<8xf32>
    %522 = vector.multi_reduction <add>, %521, %cst_164 [1] : vector<8x128xf32> to vector<8xf32>
    %523 = vector.shape_cast %522 : vector<8xf32> to vector<8x1xf32>
    %c0_165 = arith.constant 0 : index
    %c0_166 = arith.constant 0 : index
    %524 = vector.load %arg13[%c0_165, %c0_166] : memref<1x1xf32, #tpu.memory_space<vmem>>, vector<1x1xf32>
    %525 = vector.broadcast %524 : vector<1x1xf32> to vector<8x1xf32>
    %526 = arith.addf %523, %525 : vector<8x1xf32>
    %527 = arith.negf %526 : vector<8x1xf32>
    %528 = math.exp %527 : vector<8x1xf32>
    %cst_167 = arith.constant 1.000000e+00 : f32
    %529 = vector.broadcast %cst_167 : f32 to vector<8x1xf32>
    %530 = arith.addf %529, %528 : vector<8x1xf32>
    %531 = arith.divf %529, %530 : vector<8x1xf32>
    %c0_168 = arith.constant 0 : index
    %c0_169 = arith.constant 0 : index
    %532 = vector.load %arg14[%c0_168, %c0_169] : memref<8x1xf32, #tpu.memory_space<vmem>>, vector<8x1xf32>
    tpu.vector_store %arg14[%c0_168, %c0_169], %531 {strides = array<i32>} : memref<8x1xf32, #tpu.memory_space<vmem>>, vector<8x1xf32>,
    return
  }
  func.func @transform_0(%arg0: i32) -> (i32, i32, i32) {
    %c0_i32 = arith.constant 0 : i32
    %c0_i32_0 = arith.constant 0 : i32
    %c0_i32_1 = arith.constant 0 : i32
    return %c0_i32, %arg0, %c0_i32_0 : i32, i32, i32
  }
  func.func @transform_1(%arg0: i32) -> (i32, i32) {
    %c0_i32 = arith.constant 0 : i32
    %c0_i32_0 = arith.constant 0 : i32
    %c0_i32_1 = arith.constant 0 : i32
    return %c0_i32, %c0_i32_0 : i32, i32
  }
  func.func @transform_2(%arg0: i32) -> (i32, i32) {
    %c0_i32 = arith.constant 0 : i32
    %c0_i32_0 = arith.constant 0 : i32
    %c0_i32_1 = arith.constant 0 : i32
    return %c0_i32, %c0_i32_0 : i32, i32
  }
  func.func @transform_3(%arg0: i32) -> (i32, i32) {
    %c0_i32 = arith.constant 0 : i32
    %c0_i32_0 = arith.constant 0 : i32
    %c0_i32_1 = arith.constant 0 : i32
    return %c0_i32, %c0_i32_0 : i32, i32
  }
  func.func @transform_4(%arg0: i32) -> (i32, i32) {
    %c0_i32 = arith.constant 0 : i32
    %c0_i32_0 = arith.constant 0 : i32
    %c0_i32_1 = arith.constant 0 : i32
    return %c0_i32, %c0_i32_0 : i32, i32
  }
  func.func @transform_5(%arg0: i32) -> (i32, i32) {
    %c0_i32 = arith.constant 0 : i32
    %c0_i32_0 = arith.constant 0 : i32
    %c0_i32_1 = arith.constant 0 : i32
    return %c0_i32, %c0_i32_0 : i32, i32
  }
  func.func @transform_6(%arg0: i32) -> (i32, i32) {
    %c0_i32 = arith.constant 0 : i32
    %c0_i32_0 = arith.constant 0 : i32
    %c0_i32_1 = arith.constant 0 : i32
    return %c0_i32, %c0_i32_0 : i32, i32
  }
  func.func @transform_7(%arg0: i32) -> (i32, i32) {
    %c0_i32 = arith.constant 0 : i32
    %c0_i32_0 = arith.constant 0 : i32
    %c0_i32_1 = arith.constant 0 : i32
    return %c0_i32, %c0_i32_0 : i32, i32
  }
  func.func @transform_8(%arg0: i32) -> (i32, i32) {
    %c0_i32 = arith.constant 0 : i32
    %c0_i32_0 = arith.constant 0 : i32
    %c0_i32_1 = arith.constant 0 : i32
    return %c0_i32, %c0_i32_0 : i32, i32
  }
  func.func @transform_9(%arg0: i32) -> (i32, i32) {
    %c0_i32 = arith.constant 0 : i32
    %c0_i32_0 = arith.constant 0 : i32
    %c0_i32_1 = arith.constant 0 : i32
    return %c0_i32, %c0_i32_0 : i32, i32
  }
  func.func @transform_10(%arg0: i32) -> (i32, i32) {
    %c0_i32 = arith.constant 0 : i32
    %c0_i32_0 = arith.constant 0 : i32
    %c0_i32_1 = arith.constant 0 : i32
    return %c0_i32, %c0_i32_0 : i32, i32
  }
  func.func @transform_11(%arg0: i32) -> (i32, i32) {
    %c0_i32 = arith.constant 0 : i32
    %c0_i32_0 = arith.constant 0 : i32
    %c0_i32_1 = arith.constant 0 : i32
    return %c0_i32, %c0_i32_0 : i32, i32
  }
  func.func @transform_12(%arg0: i32) -> (i32, i32) {
    %c0_i32 = arith.constant 0 : i32
    %c0_i32_0 = arith.constant 0 : i32
    %c0_i32_1 = arith.constant 0 : i32
    return %c0_i32, %c0_i32_0 : i32, i32
  }
  func.func @transform_13(%arg0: i32) -> (i32, i32) {
    %c0_i32 = arith.constant 0 : i32
    %c0_i32_0 = arith.constant 0 : i32
    return %arg0, %c0_i32 : i32, i32
  }
}

</mosaic_0001>

<bundles_post_ra>
// kernel: cnn_lstm_forward.1
= control target key start
LH: loop header
LB: loop body
LE: loop exit
PB: predicated region body
PF: predicated region fallthrough
CT: control target
= control target key end

     0   :  { %s6017_s0 = inlined_call_operand.vmem [shape: bf16[14,16,12], index: 0, kind: input, shape index: {}]   ;;  %s6018_s1 = inlined_call_operand.vmem [shape: bf16[12,64], index: 1, kind: input, shape index: {}]   ;;  %s6019_s2 = inlined_call_operand.vmem [shape: f32[1,64], index: 2, kind: input, shape index: {}]   ;;  %s6020_s3 = inlined_call_operand.vmem [shape: f32[1,64], index: 3, kind: input, shape index: {}]   ;;  %s6021_s4 = inlined_call_operand.vmem [shape: f32[1,64], index: 4, kind: input, shape index: {}]   ;;  %s6022_s5 = inlined_call_operand.vmem [shape: bf16[64,512], index: 5, kind: input, shape index: {}]   ;;  %s6023_s6 = inlined_call_operand.vmem [shape: f32[1,512], index: 6, kind: input, shape index: {}]   ;;  %s6024_s7 = inlined_call_operand.vmem [shape: bf16[256,1024], index: 7, kind: input, shape index: {}]   ;;  %s6025_s8 = inlined_call_operand.vmem [shape: f32[1,512], index: 8, kind: input, shape index: {}]   ;;  %s6026_s9 = inlined_call_operand.vmem [shape: f32[1,128], index: 9, kind: input, shape index: {}]   ;;  %s6027_s10 = inlined_call_operand.vmem [shape: f32[1,128], index: 10, kind: input, shape index: {}]   ;;  %s6028_s11 = inlined_call_operand.vmem [shape: f32[1,128], index: 11, kind: input, shape index: {}]   ;;  %s6029_s12 = inlined_call_operand.<no memory space> [shape: f32[1,1], index: 12, kind: input, shape index: {}]   ;;  %s6030_s13 = inlined_call_operand.vmem [shape: f32[16,1], index: 13, kind: output, shape index: {}]  }
   0x1   :  { %v18_v0 = vstv %s6029_s12 }
   0x2   :  { %19 = vst [vmem:[#allocation3] sm:$0x1] %v18_v0 }
   0x3   :  { %s4099_s27 = smov 0   ;;  %s4101_s28 = smov 0  }
   0x4   :  { %s4103_s29 = smov 0  }
   0x5 LB: > { %s3448_s12 = sadd.s32 4294967295, %s4021_s29   ;;  %s4116_s30 = sadd.s32 1, %s4021_s29   ;;  %s4021_s29 = sphi %s4103_s29, %s6964_s29   ;;  %s4017_s28 = sphi %s4101_s28, %s6963_s28   ;;  %s4013_s27 = sphi %s4099_s27, %s6962_s27  }
   0x6   : > { %s29_s14 = ssub.s32 %s4021_s29, %s4116_s30  ;;  %s32_s15 = sadd.s32 1, %s4017_s28 }
   0x7   : > { %p30_p0 = scmp.eq.s32.totalorder %s29_s14, 0  ;;  %p39_p1 = scmp.ne.s32.totalorder %s4017_s28, %s4013_s27 }
   0x8   : > { %p40_p2 = scmp.eq.s32.totalorder %s4021_s29, 0  ;;  %p3451_p4 = scmp.ge.s32.totalorder %s4021_s29, 2 }
   0x9   : > { %s4125_s16 = scalar_select %p30_p0, %s4017_s28, %s32_s15  }
   0xa   : > { %p41_p3 = por %p40_p2, %p39_p1  ;;  %379 = sbr.rel (%p3451_p4) target bundleno = 30 (0x1e), region = 64 }
  0x11   : > { %382 = sbr.rel (!%p41_p3) target bundleno = 30 (0x1e), region = 68  ;;  %s384_s17 = sand.u32 (%p41_p3), 1, %s4017_s28  }
  0x12   : > { %s3452_s18 = sshll.u32 (%p41_p3), %s4021_s29, 2  ;;  %s3696_s19 = smul.u32 (%p41_p3), 56, %s384_s17 }
  0x13   : > { %s388_s22 = scalar_lea.vmem (%p41_p3), %s6017_s0, %s3452_s18 }
  0x14   : > { %v404_v1 = vld [vmem:[%s388_s22] sm:$0xf] (%p41_p3)  ;;  %v406_v2 = vld [vmem:[%s388_s22 + $0x8] sm:$0xf] (%p41_p3)  ;;  %v408_v3 = vld [vmem:[%s388_s22 + $0x10] sm:$0xf] (%p41_p3) }
  0x15   : > { %v410_v4 = vld [vmem:[%s388_s22 + $0x18] sm:$0xf] (%p41_p3)  ;;  %v412_v5 = vld [vmem:[%s388_s22 + $0x20] sm:$0xf] (%p41_p3)  ;;  %s386_s23 = scalar_lea.vmem (%p41_p3), [#allocation4], %s3696_s19 }
  0x16   : > { %405 = vst [vmem:[%s386_s23] sm:$0xf] (%p41_p3), %v404_v1  ;;  %407 = vst [vmem:[%s386_s23 + $0x4] sm:$0xf] (%p41_p3), %v406_v2  ;;  %v414_v6 = vld [vmem:[%s388_s22 + $0x28] sm:$0xf] (%p41_p3) }
  0x17   : > { %409 = vst [vmem:[%s386_s23 + $0x8] sm:$0xf] (%p41_p3), %v408_v3  ;;  %411 = vst [vmem:[%s386_s23 + $0xc] sm:$0xf] (%p41_p3), %v410_v4  ;;  %v416_v7 = vld [vmem:[%s388_s22 + $0x30] sm:$0xf] (%p41_p3) }
  0x18   : > { %413 = vst [vmem:[%s386_s23 + $0x10] sm:$0xf] %v412_v5  ;;  %v418_v8 = vld [vmem:[%s388_s22 + $0x38] sm:$0xf]  ;;  %415 = vst [vmem:[%s386_s23 + $0x14] sm:$0xf] %v414_v6 }
  0x19   : > { %417 = vst [vmem:[%s386_s23 + $0x18] sm:$0xf] %v416_v7  ;;  %419 = vst [vmem:[%s386_s23 + $0x1c] sm:$0xf] %v418_v8  ;;  %v420_v9 = vld [vmem:[%s388_s22 + $0x40] sm:$0xf] }
  0x1a   : > { %v422_v10 = vld [vmem:[%s388_s22 + $0x48] sm:$0xf]  ;;  %v424_v11 = vld [vmem:[%s388_s22 + $0x50] sm:$0xf]  ;;  %421 = vst [vmem:[%s386_s23 + $0x20] sm:$0xf] %v420_v9 }
  0x1b   : > { %423 = vst [vmem:[%s386_s23 + $0x24] sm:$0xf] %v422_v10  ;;  %425 = vst [vmem:[%s386_s23 + $0x28] sm:$0xf] %v424_v11  ;;  %v426_v12 = vld [vmem:[%s388_s22 + $0x58] sm:$0xf] }
  0x1c   : > { %v428_v13 = vld [vmem:[%s388_s22 + $0x60] sm:$0xf]  ;;  %v430_v14 = vld [vmem:[%s388_s22 + $0x68] sm:$0xf]  ;;  %427 = vst [vmem:[%s386_s23 + $0x2c] sm:$0xf] %v426_v12 }
  0x1d   : > { %429 = vst [vmem:[%s386_s23 + $0x30] sm:$0xf] %v428_v13  ;;  %431 = vst [vmem:[%s386_s23 + $0x34] sm:$0xf] %v430_v14 }
  0x1e PF: > { %p3453_p5 = scmp.ge.s32.totalorder %s4021_s29, 1  ;;  %p481_p6 = scmp.lt.s32.totalorder %s4021_s29, 3 }
  0x20   : > { %p482_p7 = pnand %p3453_p5, %p481_p6 }
  0x22   : > { %485 = sbr.rel (%p482_p7) target bundleno = 3033 (0xbd9), region = 109 }
  0x29   : > { %vm620_vm0 = vcmask 1045504   ;;  %v4023_v15 = vmov 0.0   ;;  %v3725_v16 = vld [vmem:[%s6018_s1] sm:$0x3f]   ;;  %s488_s26 = sand.u32 1, %s4013_s27   ;;  %vm4024_vm1 = vmmov 0  }
  0x2a   : > { %3654 = vmatprep.subr.bf16.mxu0 %v4023_v15  ;;  %3656 = vmatprep.mubr.msk.bf16.mxu0 %vm4024_vm1, %v4023_v15  ;;  %s3697_s14 = smul.u32 56, %s488_s26  ;;  %v622_v17 = vsel %vm620_vm0, %v3725_v16, 0  ;;  %vm598_vm2 = vcmask 97280   ;;  %v3733_v25 = vld [vmem:[%s6022_s5 + $0x4] ss:$16 sps:$4 sm:$0xff]   ;;  %v4025_v33 = vmov 0  }
  0x2b   : > { %3655 = vmatpush3.bf16.msra.mxu0 %v622_v17  ;;  %v3735_v26 = vld [vmem:[%s6022_s5] ss:$16 sps:$4 sm:$0xff]   ;;  %918 = vmatprep.subr.bf16.mxu1 %v3733_v25  ;;  %v3736_v27 = vld [vmem:[%s6022_s5 + $0x24] ss:$16 sps:$4 sm:$0xff]   ;;  %1233 = vst [vmem:[#allocation2 + $0x4] sm:$0xf] %v4025_v33 }
  0x2c   : > { %s490_s15 = scalar_lea.vmem [#allocation4], %s3697_s14  ;;  %919 = vmatpush1.bf16.msra.mxu1 %v3735_v26  ;;  %v3738_v28 = vld [vmem:[%s6022_s5 + $0x20] ss:$16 sps:$4 sm:$0xff]   ;;  %v3739_v29 = vld [vmem:[%s6022_s5 + $0x44] ss:$16 sps:$4 sm:$0xff]   ;;  %950 = vmatprep.mubr.bf16.mxu1 %v4025_v33  ;;  %vm905_vm3 = vcmask 523264  }
  0x2d   : > { %v3726_v18 = vld [vmem:[%s490_s15] sm:$0xff]   ;;  %v3727_v19 = vld [vmem:[%s490_s15 + $0x8] sm:$0xff]   ;;  %v3728_v20 = vld [vmem:[%s490_s15 + $0x10] sm:$0xff]   ;;  %920 = vmatprep.subr.bf16.mxu1 %v3736_v27  ;;  %p530_p8 = scmp.lt.s32.totalorder %s3448_s12, 1  ;;  %vm3387_vm4 = vcmask 7168  }
  0x2e   : > { %3657 = vmatmul.mubr.msk.bf16.vlgmr.msra.gmra.mrb[0].mxu0 %vm598_vm2, %v3726_v18  ;;  %v3729_v21 = vld [vmem:[%s490_s15 + $0x18] sm:$0xff]   ;;  %v3730_v22 = vld [vmem:[%s490_s15 + $0x20] sm:$0xff]   ;;  %v3731_v23 = vld [vmem:[%s490_s15 + $0x28] sm:$0xff]  }
  0x2f   : > { %3660 = vmatprep.mubr.msk.bf16.mxu0 %vm4024_vm1, %v4023_v15  ;;  %v3732_v24 = vld [vmem:[%s490_s15 + $0x30] sm:$0xff]   ;;  %s6966_s12 = smov (!%p530_p8, %s3448_s12), 1 }
  0x30   : > { %921 = vmatpush1.bf16.msra.mxu1 %v3738_v28  ;;  %v3741_v30 = vld [vmem:[%s6022_s5 + $0x40] ss:$16 sps:$4 sm:$0xff]   ;;  %v3742_v31 = vld [vmem:[%s6022_s5 + $0x64] ss:$16 sps:$4 sm:$0xff]   ;;  %v3747_v34 = vld [vmem:[%s6022_s5 + $0xc] ss:$16 sps:$4 sm:$0xff]  }
  0x31   : > { %922 = vmatprep.subr.bf16.mxu1 %v3739_v29  ;;  %v3744_v32 = vld [vmem:[%s6022_s5 + $0x60] ss:$16 sps:$4 sm:$0xff]   ;;  %v3745_v11 = vld [vmem:[%s6022_s5 + $0x8] ss:$16 sps:$4 sm:$0xff]   ;;  %v3750_v14 = vld [vmem:[%s6022_s5 + $0x2c] ss:$16 sps:$4 sm:$0xff]  }
  0x32   : > { %v4185_v35 = vld [vmem:[%s6019_s2] ss:$0 sm:$0xff]  ;;  %v3753_v26 = vld [vmem:[%s6022_s5 + $0x4c] ss:$16 sps:$4 sm:$0xff]   ;;  %v3751_v29 = vld [vmem:[%s6022_s5 + $0x48] ss:$16 sps:$4 sm:$0xff]  }
  0x33   : > { %v4191_v39 = vld [vmem:[%s6020_s3] ss:$0 sm:$0xff]  ;;  %s3454_s21 = sshll.u32 %s6966_s12, 3 }
  0x34   : > { %923 = vmatpush1.bf16.msra.mxu1 %v3741_v30  ;;  %v4198_v46 = vld [vmem:[%s6021_s4] ss:$0 sm:$0xff]  ;;  %s533_s24 = scalar_lea.vmem %s6030_s13, %s3454_s21 }
  0x35   : > { %924 = vmatprep.subr.bf16.mxu1 %v3742_v31  ;;  %v3756_v31 = vld [vmem:[%s6022_s5 + $0x6c] ss:$16 sps:$4 sm:$0xff]  }
  0x36   : > { %3661 = vmatmul.mubr.msk.bf16.gmra.mrb[4].mxu0 %vm598_vm2, %v3727_v19 }
  0x37   : > { %3664 = vmatprep.mubr.msk.bf16.mxu0 %vm4024_vm1, %v4023_v15 }
  0x38   : > { %925 = vmatpush1.bf16.msra.mxu1 %v3744_v32 }
  0x39   : > { %989 = vmatprep.subr.bf16.mxu1 %v3747_v34 }
  0x3e   : > { %3665 = vmatmul.mubr.msk.bf16.gmra.mrb[8].mxu0 %vm598_vm2, %v3728_v20 }
  0x3f   : > { %3668 = vmatprep.mubr.msk.bf16.mxu0 %vm4024_vm1, %v4023_v15 }
  0x46   : > { %3669 = vmatmul.mubr.msk.bf16.gmra.mrb[12].mxu0 %vm598_vm2, %v3729_v21  ;;  %v3748_v21 = vld [vmem:[%s6022_s5 + $0x28] ss:$16 sps:$4 sm:$0xff]  }
  0x47   : > { %3672 = vmatprep.mubr.msk.bf16.mxu0 %vm4024_vm1, %v4023_v15 }
  0x4e   : > { %3673 = vmatmul.mubr.msk.bf16.gmra.mrb[16].mxu0 %vm598_vm2, %v3730_v22 }
  0x4f   : > { %3676 = vmatprep.mubr.msk.bf16.mxu0 %vm4024_vm1, %v4023_v15 }
  0x56   : > { %3677 = vmatmul.mubr.msk.bf16.gmra.mrb[20].mxu0 %vm598_vm2, %v3731_v23 }
  0x57   : > { %3680 = vmatprep.mubr.msk.bf16.mxu0 %vm4024_vm1, %v4023_v15 }
  0x5e   : > { %3681 = vmatmul.mubr.msk.bf16.gmra.mrb[24].mxu0 %vm598_vm2, %v3732_v24 }
 0x101   : > { %v658_v36 = vpop.f32.mrb[0].mxu0 }
 0x102   : > { %v659_v37 = vadd.f32 %v4185_v35, %v658_v36  ;;  %v3658_v38 = vpop.f32.mrb[1].mxu0 }
 0x103   : > { %v661_v40 = vpop.f32.mrb[2].mxu0 }
 0x104   : > { %v713_v41 = vmax.f32 %v659_v37, 0.0  ;;  %v662_v42 = vadd.f32 %v4185_v35, %v661_v40  ;;  %v3659_v43 = vpop.f32.mrb[3].mxu0 }
 0x106   : > { %v734_v44 = vmul.f32 %v4191_v39, %v713_v41  ;;  %v714_v45 = vmax.f32 %v662_v42, 0.0  ;;  %v3754_v41 = vld [vmem:[%s6022_s5 + $0x68] ss:$16 sps:$4 sm:$0xff]  }
 0x108   : > { %v735_v47 = vmul.f32 %v4191_v39, %v714_v45  ;;  %v755_v49 = vadd.f32 %v4198_v46, %v734_v44 }
 0x109   : > { %v666_v48 = vpop.f32.mrb[4].mxu0 }
 0x10a   : > { %v756_v50 = vadd.f32 %v4198_v46, %v735_v47  ;;  %v667_v51 = vadd.f32 %v4185_v35, %v666_v48  ;;  %v3662_v52 = vpop.f32.mrb[5].mxu0 }
 0x10b   : > { %v669_v53 = vpop.f32.mrb[6].mxu0 }
 0x10c   : > { %v769_v54 = vadd.f32 %v756_v50, %v755_v49  ;;  %v715_v55 = vmax.f32 %v667_v51, 0.0  ;;  %v670_v56 = vadd.f32 %v4185_v35, %v669_v53  ;;  %v3663_v57 = vpop.f32.mrb[7].mxu0 }
 0x10e   : > { %v736_v58 = vmul.f32 %v4191_v39, %v715_v55  ;;  %v716_v59 = vmax.f32 %v670_v56, 0.0  ;;  %v776_v7 = vmul.f32 0.5, %v769_v54 }
 0x110   : > { %v737_v60 = vmul.f32 %v4191_v39, %v716_v59  ;;  %v757_v62 = vadd.f32 %v4198_v46, %v736_v58 }
 0x111   : > { %v674_v61 = vpop.f32.mrb[8].mxu0 }
 0x112   : > { %v758_v63 = vadd.f32 %v4198_v46, %v737_v60  ;;  %v675_v0 = vadd.f32 %v4185_v35, %v674_v61  ;;  %v3666_v1 = vpop.f32.mrb[9].mxu0 }
 0x113   : > { %v677_v2 = vpop.f32.mrb[10].mxu0 }
 0x114   : > { %v770_v3 = vadd.f32 %v758_v63, %v757_v62  ;;  %v717_v4 = vmax.f32 %v675_v0, 0.0  ;;  %v678_v5 = vadd.f32 %v4185_v35, %v677_v2  ;;  %v3667_v6 = vpop.f32.mrb[11].mxu0 }
 0x116   : > { %v777_v8 = vmul.f32 0.5, %v770_v3  ;;  %v738_v9 = vmul.f32 %v4191_v39, %v717_v4  ;;  %v718_v10 = vmax.f32 %v678_v5, 0.0 }
 0x118   : > { %v739_v12 = vmul.f32 %v4191_v39, %v718_v10  ;;  %v4216_v13 = vpack.c.bf16 %v777_v8, %v776_v7  ;;  %v759_v16 = vadd.f32 %v4198_v46, %v738_v9 }
 0x119   : > { %v682_v15 = vpop.f32.mrb[12].mxu0 }
 0x11a   : > { %v760_v17 = vadd.f32 %v4198_v46, %v739_v12  ;;  %v683_v18 = vadd.f32 %v4185_v35, %v682_v15  ;;  %v3670_v19 = vpop.f32.mrb[13].mxu0  ;;  %3489 = vmatmul.mubr.msk.bf16.vlgmr.msra.gmra.mrb[0].mxu1 %vm905_vm3, %v4216_v13 }
 0x11b   : > { %v685_v20 = vpop.f32.mrb[14].mxu0  ;;  %960 = vmatprep.mubr.bf16.mxu1 %v4025_v33  ;;  %990 = vmatpush1.bf16.msra.mxu1 %v3745_v11 }
 0x11c   : > { %v771_v22 = vadd.f32 %v760_v17, %v759_v16  ;;  %v719_v23 = vmax.f32 %v683_v18, 0.0  ;;  %v686_v24 = vadd.f32 %v4185_v35, %v685_v20  ;;  %v3671_v25 = vpop.f32.mrb[15].mxu0  ;;  %991 = vmatprep.subr.bf16.mxu1 %v3750_v14 }
 0x11e   : > { %v740_v27 = vmul.f32 %v4191_v39, %v719_v23  ;;  %v720_v28 = vmax.f32 %v686_v24, 0.0  ;;  %v778_v47 = vmul.f32 0.5, %v771_v22 }
 0x11f   : > { %992 = vmatpush1.bf16.msra.mxu1 %v3748_v21 }
 0x120   : > { %v741_v30 = vmul.f32 %v4191_v39, %v720_v28  ;;  %993 = vmatprep.subr.bf16.mxu1 %v3753_v26  ;;  %v761_v34 = vadd.f32 %v4198_v46, %v740_v27  ;;  %v1068_v27 = vld [vmem:[%s6024_s7 + $0x40] sm:$0xff] }
 0x121   : > { %v690_v32 = vpop.f32.mrb[16].mxu0  ;;  %v1072_v28 = vld [vmem:[%s6024_s7 + $0x60] sm:$0xff] }
 0x122   : > { %v762_v36 = vadd.f32 %v4198_v46, %v741_v30  ;;  %v691_v37 = vadd.f32 %v4185_v35, %v690_v32  ;;  %v3674_v38 = vpop.f32.mrb[17].mxu0  ;;  %v4312_v30 = vcombine.high %v1068_v27, %v1072_v28 }
 0x123   : > { %v693_v40 = vpop.f32.mrb[18].mxu0  ;;  %994 = vmatpush1.bf16.msra.mxu1 %v3751_v29  ;;  %v1069_v29 = vld [vmem:[%s6024_s7 + $0x48] sm:$0xff]  ;;  %v1080_v38 = vld [vmem:[%s6024_s7 + $0xa0] sm:$0xff] }
 0x124   : > { %v772_v42 = vadd.f32 %v762_v36, %v761_v34  ;;  %v721_v43 = vmax.f32 %v691_v37, 0.0  ;;  %v694_v44 = vadd.f32 %v4185_v35, %v693_v40  ;;  %v3675_v45 = vpop.f32.mrb[19].mxu0  ;;  %995 = vmatprep.subr.bf16.mxu1 %v3756_v31  ;;  %6342 = vst [vmem:[#allocation9_spill] sm:$0xff] %v4312_v30  ;;  %v1073_v31 = vld [vmem:[%s6024_s7 + $0x68] sm:$0xff]  ;;  %v4319_v34 = vcombine.low %v1068_v27, %v1072_v28  ;;  %v1076_v37 = vld [vmem:[%s6024_s7 + $0x80] sm:$0xff] }
 0x125   : > { %v4317_v32 = vcombine.high %v1069_v29, %v1073_v31  ;;  %v4321_v36 = vcombine.low %v1069_v29, %v1073_v31  ;;  %v1077_v40 = vld [vmem:[%s6024_s7 + $0x88] sm:$0xff]  ;;  %v1088_v45 = vld [vmem:[%s6024_s7 + $0xe0] sm:$0xff] }
 0x126   : > { %v779_v48 = vmul.f32 0.5, %v772_v42  ;;  %v742_v49 = vmul.f32 %v4191_v39, %v721_v43  ;;  %v722_v50 = vmax.f32 %v694_v44, 0.0  ;;  %6344 = vst [vmem:[#allocation11_spill] sm:$0xff] %v4319_v34  ;;  %v1081_v42 = vld [vmem:[%s6024_s7 + $0xa8] sm:$0xff]  ;;  %v4341_v43 = vcombine.low %v1076_v37, %v1080_v38  ;;  %v1084_v44 = vld [vmem:[%s6024_s7 + $0xc0] sm:$0xff] }
 0x127   : > { %996 = vmatpush1.bf16.msra.mxu1 %v3754_v41  ;;  %6343 = vst [vmem:[#allocation10_spill] sm:$0xff] %v4317_v32  ;;  %6345 = vst [vmem:[#allocation12_spill] sm:$0xff] %v4321_v36  ;;  %v4336_v41 = vcombine.high %v1076_v37, %v1080_v38  ;;  %v1129_v27 = vld [vmem:[%s6024_s7 + $0x228] sm:$0xff]  ;;  %v1132_v37 = vld [vmem:[%s6024_s7 + $0x240] sm:$0xff] }
 0x128   : > { %v743_v51 = vmul.f32 %v4191_v39, %v722_v50  ;;  %v784_v52 = vpack.c.bf16 %v779_v48, %v778_v47  ;;  %v763_v54 = vadd.f32 %v4198_v46, %v742_v49  ;;  %6347 = vst [vmem:[#allocation14_spill] sm:$0xff] %v4341_v43  ;;  %v4349_v47 = vcombine.high %v1077_v40, %v1081_v42  ;;  %v1085_v50 = vld [vmem:[%s6024_s7 + $0xc8] sm:$0xff]  ;;  %v1136_v38 = vld [vmem:[%s6024_s7 + $0x260] sm:$0xff] }
 0x129   : > { %v698_v53 = vpop.f32.mrb[20].mxu0  ;;  %6346 = vst [vmem:[#allocation13_spill] sm:$0xff] %v4336_v41  ;;  %v4351_v48 = vcombine.low %v1077_v40, %v1081_v42  ;;  %v4353_v49 = vcombine.high %v1084_v44, %v1088_v45  ;;  %v1133_v40 = vld [vmem:[%s6024_s7 + $0x248] sm:$0xff]  ;;  %v4504_v42 = vcombine.high %v1132_v37, %v1136_v38 }
 0x12a   : > { %v764_v55 = vadd.f32 %v4198_v46, %v743_v51  ;;  %v699_v56 = vadd.f32 %v4185_v35, %v698_v53  ;;  %v3678_v57 = vpop.f32.mrb[21].mxu0  ;;  %3490 = vmatmul.mubr.msk.bf16.gmra.mrb[4].mxu1 %vm905_vm3, %v784_v52  ;;  %6348 = vst [vmem:[#allocation15_spill] sm:$0xff] %v4349_v47  ;;  %v1089_v51 = vld [vmem:[%s6024_s7 + $0xe8] sm:$0xff] }
 0x12b   : > { %v701_v58 = vpop.f32.mrb[22].mxu0  ;;  %970 = vmatprep.mubr.bf16.mxu1 %v4025_v33  ;;  %6349 = vst [vmem:[#allocation16_spill] sm:$0xff] %v4351_v48  ;;  %6350 = vst [vmem:[#allocation17_spill] sm:$0xff] %v4353_v49  ;;  %v4365_v53 = vcombine.high %v1085_v50, %v1089_v51  ;;  %v4378_v57 = vcombine.low %v1084_v44, %v1088_v45  ;;  %v1137_v44 = vld [vmem:[%s6024_s7 + $0x268] sm:$0xff] }
 0x12c   : > { %v773_v59 = vadd.f32 %v764_v55, %v763_v54  ;;  %v723_v60 = vmax.f32 %v699_v56, 0.0  ;;  %v702_v61 = vadd.f32 %v4185_v35, %v701_v58  ;;  %v3679_v62 = vpop.f32.mrb[23].mxu0  ;;  %v1096_v54 = vld [vmem:[%s6024_s7 + $0x120] sm:$0xff]  ;;  %v1093_v55 = vld [vmem:[%s6024_s7 + $0x108] sm:$0xff]  ;;  %v4382_v58 = vcombine.low %v1085_v50, %v1089_v51  ;;  %6374 = vst [vmem:[#allocation41_spill] sm:$0xff] %v4504_v42 }
 0x12d   : > { %6351 = vst [vmem:[#allocation18_spill] sm:$0xff] %v4365_v53  ;;  %v1097_v56 = vld [vmem:[%s6024_s7 + $0x128] sm:$0xff]  ;;  %6352 = vst [vmem:[#allocation19_spill] sm:$0xff] %v4378_v57  ;;  %v4509_v45 = vcombine.high %v1133_v40, %v1137_v44  ;;  %v4511_v50 = vcombine.low %v1132_v37, %v1136_v38  ;;  %v4513_v51 = vcombine.low %v1133_v40, %v1137_v44 }
 0x12e   : > { %v744_v63 = vmul.f32 %v4191_v39, %v723_v60  ;;  %v724_v0 = vmax.f32 %v702_v61, 0.0  ;;  %v780_v12 = vmul.f32 0.5, %v773_v59  ;;  %6353 = vst [vmem:[#allocation20_spill] sm:$0xff] %v4382_v58  ;;  %v4387_v60 = vcombine.high %v1093_v55, %v1097_v56  ;;  %v1161_v37 = vld [vmem:[%s6024_s7 + $0x328] sm:$0xff] }
 0x12f   : > { %v4394_v62 = vcombine.low %v1093_v55, %v1097_v56  ;;  %6375 = vst [vmem:[#allocation42_spill] sm:$0xff] %v4509_v45  ;;  %6376 = vst [vmem:[#allocation43_spill] sm:$0xff] %v4511_v50  ;;  %v1141_v55 = vld [vmem:[%s6024_s7 + $0x288] sm:$0xff] }
 0x130   : > { %v745_v1 = vmul.f32 %v4191_v39, %v724_v0  ;;  %v765_v3 = vadd.f32 %v4198_v46, %v744_v63  ;;  %6355 = vst [vmem:[#allocation22_spill] sm:$0xff] %v4387_v60  ;;  %v1100_v63 = vld [vmem:[%s6024_s7 + $0x140] sm:$0xff]  ;;  %6377 = vst [vmem:[#allocation44_spill] sm:$0xff] %v4513_v51 }
 0x131   : > { %v706_v2 = vpop.f32.mrb[24].mxu0  ;;  %6357 = vst [vmem:[#allocation24_spill] sm:$0xff] %v4394_v62  ;;  %v1104_v0 = vld [vmem:[%s6024_s7 + $0x160] sm:$0xff] }
 0x132   : > { %v766_v4 = vadd.f32 %v4198_v46, %v745_v1  ;;  %v707_v5 = vadd.f32 %v4185_v35, %v706_v2  ;;  %v3682_v6 = vpop.f32.mrb[25].mxu0  ;;  %v1101_v1 = vld [vmem:[%s6024_s7 + $0x148] sm:$0xff]  ;;  %v4408_v2 = vcombine.high %v1100_v63, %v1104_v0 }
 0x133   : > { %v709_v7 = vpop.f32.mrb[26].mxu0 }
 0x134   : > { %v774_v8 = vadd.f32 %v766_v4, %v765_v3  ;;  %v725_v9 = vmax.f32 %v707_v5, 0.0  ;;  %v710_v10 = vadd.f32 %v4185_v35, %v709_v7  ;;  %v3683_v11 = vpop.f32.mrb[27].mxu0  ;;  %6358 = vst [vmem:[#allocation25_spill] sm:$0xff] %v4408_v2  ;;  %v1105_v3 = vld [vmem:[%s6024_s7 + $0x168] sm:$0xff]  ;;  %v4415_v5 = vcombine.low %v1100_v63, %v1104_v0  ;;  %v1108_v7 = vld [vmem:[%s6024_s7 + $0x180] sm:$0xff] }
 0x135   : > { %v4413_v4 = vcombine.high %v1101_v1, %v1105_v3  ;;  %v4417_v6 = vcombine.low %v1101_v1, %v1105_v3  ;;  %v1113_v11 = vld [vmem:[%s6024_s7 + $0x1a8] sm:$0xff] }
 0x136   : > { %v781_v14 = vmul.f32 0.5, %v774_v8  ;;  %v746_v15 = vmul.f32 %v4191_v39, %v725_v9  ;;  %v726_v16 = vmax.f32 %v710_v10, 0.0  ;;  %6360 = vst [vmem:[#allocation27_spill] sm:$0xff] %v4415_v5  ;;  %v1112_v8 = vld [vmem:[%s6024_s7 + $0x1a0] sm:$0xff]  ;;  %v1109_v9 = vld [vmem:[%s6024_s7 + $0x188] sm:$0xff] }
 0x137   : > { %6359 = vst [vmem:[#allocation26_spill] sm:$0xff] %v4413_v4  ;;  %6361 = vst [vmem:[#allocation28_spill] sm:$0xff] %v4417_v6  ;;  %v4432_v10 = vcombine.high %v1108_v7, %v1112_v8  ;;  %v1145_v63 = vld [vmem:[%s6024_s7 + $0x2a8] sm:$0xff] }
 0x138   : > { %v747_v17 = vmul.f32 %v4191_v39, %v726_v16  ;;  %v785_v18 = vpack.c.bf16 %v781_v14, %v780_v12  ;;  %v767_v19 = vadd.f32 %v4198_v46, %v746_v15  ;;  %v1060_v39 = vld [vmem:[%s6024_s7] sm:$0xff]  ;;  %v4437_v12 = vcombine.high %v1109_v9, %v1113_v11 }
 0x139   : > { %6362 = vst [vmem:[#allocation29_spill] sm:$0xff] %v4432_v10  ;;  %v4439_v14 = vcombine.low %v1108_v7, %v1112_v8  ;;  %v4441_v15 = vcombine.low %v1109_v9, %v1113_v11  ;;  %v1116_v16 = vld [vmem:[%s6024_s7 + $0x1c0] sm:$0xff]  ;;  %v4533_v0 = vcombine.high %v1141_v55, %v1145_v63  ;;  %v4537_v3 = vcombine.low %v1141_v55, %v1145_v63  ;;  %v1149_v9 = vld [vmem:[%s6024_s7 + $0x2c8] sm:$0xff] }
 0x13a   : > { %v768_v20 = vadd.f32 %v4198_v46, %v747_v17  ;;  %3491 = vmatmul.mubr.msk.bf16.gmra.mrb[8].mxu1 %vm905_vm3, %v785_v18  ;;  %v1064_v46 = vld [vmem:[%s6024_s7 + $0x20] sm:$0xff]  ;;  %6363 = vst [vmem:[#allocation30_spill] sm:$0xff] %v4437_v12  ;;  %v1165_v55 = vld [vmem:[%s6024_s7 + $0x348] sm:$0xff] }
 0x13b   : > { %980 = vmatprep.mubr.bf16.mxu1 %v4025_v33  ;;  %v4288_v23 = vcombine.high %v1060_v39, %v1064_v46  ;;  %v4295_v25 = vcombine.low %v1060_v39, %v1064_v46  ;;  %6364 = vst [vmem:[#allocation31_spill] sm:$0xff] %v4439_v14  ;;  %6365 = vst [vmem:[#allocation32_spill] sm:$0xff] %v4441_v15  ;;  %v1120_v17 = vld [vmem:[%s6024_s7 + $0x1e0] sm:$0xff] }
 0x13c   : > { %v775_v21 = vadd.f32 %v768_v20, %v767_v19  ;;  %v4456_v19 = vcombine.high %v1116_v16, %v1120_v17  ;;  %v1121_v20 = vld [vmem:[%s6024_s7 + $0x1e8] sm:$0xff]  ;;  %v1124_v39 = vld [vmem:[%s6024_s7 + $0x200] sm:$0xff]  ;;  %6379 = vst [vmem:[#allocation46_spill] sm:$0xff] %v4533_v0  ;;  %6381 = vst [vmem:[#allocation48_spill] sm:$0xff] %v4537_v3 }
 0x13d   : > { %6338 = vst [vmem:[#allocation5_spill] sm:$0xff] %v4288_v23  ;;  %6340 = vst [vmem:[#allocation7_spill] sm:$0xff] %v4295_v25  ;;  %1882 = vmatprep.subr.bf16.mxu0 %v4288_v23  ;;  %v1128_v46 = vld [vmem:[%s6024_s7 + $0x220] sm:$0xff] }
 0x13e   : > { %v782_v22 = vmul.f32 0.5, %v775_v21  ;;  %1883 = vmatpush1.bf16.msra.mxu0 %v4295_v25  ;;  %6366 = vst [vmem:[#allocation33_spill] sm:$0xff] %v4456_v19  ;;  %v4487_v29 = vcombine.low %v1124_v39, %v1128_v46  ;;  %v1148_v7 = vld [vmem:[%s6024_s7 + $0x2c0] sm:$0xff] }
 0x13f   : > { %1884 = vmatprep.subr.bf16.mxu0 %v4312_v30  ;;  %v1152_v8 = vld [vmem:[%s6024_s7 + $0x2e0] sm:$0xff] }
 0x140   : > { %v786_v35 = vpack.c.bf16 %v782_v22, %v782_v22  ;;  %v4463_v22 = vcombine.low %v1116_v16, %v1120_v17  ;;  %6372 = vst [vmem:[#allocation39_spill] sm:$0xff] %v4487_v29  ;;  %v4552_v11 = vcombine.high %v1148_v7, %v1152_v8  ;;  %v1153_v16 = vld [vmem:[%s6024_s7 + $0x2e8] sm:$0xff] }
 0x141   : > { %v4557_v17 = vcombine.high %v1149_v9, %v1153_v16 }
 0x142   : > { %3492 = vmatmul.mubr.msk.bf16.gmra.mrb[12].mxu1 %vm905_vm3, %v786_v35  ;;  %1885 = vmatpush1.bf16.msra.mxu0 %v4319_v34  ;;  %6368 = vst [vmem:[#allocation35_spill] sm:$0xff] %v4463_v22  ;;  %6382 = vst [vmem:[#allocation49_spill] sm:$0xff] %v4552_v11 }
 0x143   : > { %1021 = vmatprep.mubr.bf16.mxu1 %v4025_v33  ;;  %1886 = vmatprep.subr.bf16.mxu0 %v4336_v41  ;;  %6383 = vst [vmem:[#allocation50_spill] sm:$0xff] %v4557_v17 }
 0x146   : > { %1887 = vmatpush1.bf16.msra.mxu0 %v4341_v43 }
 0x147   : > { %1888 = vmatprep.subr.bf16.mxu0 %v4353_v49 }
 0x14a   : > { %3493 = vmatmul.mubr.msk.bf16.vlgmr.msra.gmra.mrb[16].mxu1 %vm905_vm3, %v4216_v13  ;;  %v1061_v13 = vld [vmem:[%s6024_s7 + $0x8] sm:$0xff]  ;;  %1889 = vmatpush1.bf16.msra.mxu0 %v4378_v57 }
 0x14b   : > { %1031 = vmatprep.mubr.bf16.mxu1 %v4025_v33 }
 0x152   : > { %3494 = vmatmul.mubr.msk.bf16.gmra.mrb[20].mxu1 %vm905_vm3, %v784_v52  ;;  %v1092_v52 = vld [vmem:[%s6024_s7 + $0x100] sm:$0xff] }
 0x153   : > { %1041 = vmatprep.mubr.bf16.mxu1 %v4025_v33  ;;  %v4384_v59 = vcombine.high %v1092_v52, %v1096_v54  ;;  %v4390_v61 = vcombine.low %v1092_v52, %v1096_v54  ;;  %v1140_v52 = vld [vmem:[%s6024_s7 + $0x280] sm:$0xff] }
 0x154   : > { %v1144_v54 = vld [vmem:[%s6024_s7 + $0x2a0] sm:$0xff] }
 0x155   : > { %6354 = vst [vmem:[#allocation21_spill] sm:$0xff] %v4384_v59  ;;  %6356 = vst [vmem:[#allocation23_spill] sm:$0xff] %v4390_v61  ;;  %1890 = vmatprep.subr.bf16.mxu0 %v4384_v59  ;;  %v4528_v56 = vcombine.high %v1140_v52, %v1144_v54  ;;  %v4535_v1 = vcombine.low %v1140_v52, %v1144_v54  ;;  %v1164_v52 = vld [vmem:[%s6024_s7 + $0x340] sm:$0xff] }
 0x156   : > { %1891 = vmatpush1.bf16.msra.mxu0 %v4390_v61  ;;  %v1168_v54 = vld [vmem:[%s6024_s7 + $0x360] sm:$0xff] }
 0x157   : > { %1892 = vmatprep.subr.bf16.mxu0 %v4408_v2  ;;  %6378 = vst [vmem:[#allocation45_spill] sm:$0xff] %v4528_v56  ;;  %6380 = vst [vmem:[#allocation47_spill] sm:$0xff] %v4535_v1  ;;  %v4600_v63 = vcombine.high %v1164_v52, %v1168_v54 }
 0x159   : > { %6390 = vst [vmem:[#allocation57_spill] sm:$0xff] %v4600_v63 }
 0x15a   : > { %3495 = vmatmul.mubr.msk.bf16.gmra.mrb[24].mxu1 %vm905_vm3, %v785_v18  ;;  %1893 = vmatpush1.bf16.msra.mxu0 %v4415_v5  ;;  %v1117_v18 = vld [vmem:[%s6024_s7 + $0x1c8] sm:$0xff] }
 0x15b   : > { %1051 = vmatprep.mubr.bf16.mxu1 %v4025_v33  ;;  %v1065_v33 = vld [vmem:[%s6024_s7 + $0x28] sm:$0xff]  ;;  %1894 = vmatprep.subr.bf16.mxu0 %v4432_v10  ;;  %v4461_v21 = vcombine.high %v1117_v18, %v1121_v20 }
 0x15c   : > { %v4293_v24 = vcombine.high %v1061_v13, %v1065_v33  ;;  %v4297_v26 = vcombine.low %v1061_v13, %v1065_v33  ;;  %v1125_v13 = vld [vmem:[%s6024_s7 + $0x208] sm:$0xff]  ;;  %v4480_v33 = vcombine.high %v1124_v39, %v1128_v46  ;;  %v1156_v39 = vld [vmem:[%s6024_s7 + $0x300] sm:$0xff] }
 0x15d   : > { %6367 = vst [vmem:[#allocation34_spill] sm:$0xff] %v4461_v21  ;;  %v4485_v28 = vcombine.high %v1125_v13, %v1129_v27  ;;  %v4489_v31 = vcombine.low %v1125_v13, %v1129_v27  ;;  %v1160_v46 = vld [vmem:[%s6024_s7 + $0x320] sm:$0xff]  ;;  %v1157_v13 = vld [vmem:[%s6024_s7 + $0x308] sm:$0xff] }
 0x15e   : > { %6339 = vst [vmem:[#allocation6_spill] sm:$0xff] %v4293_v24  ;;  %6341 = vst [vmem:[#allocation8_spill] sm:$0xff] %v4297_v26  ;;  %1923 = vmatprep.subr.bf16.mxu1 %v4293_v24  ;;  %1895 = vmatpush1.bf16.msra.mxu0 %v4439_v14  ;;  %v4576_v27 = vcombine.high %v1156_v39, %v1160_v46  ;;  %v4581_v38 = vcombine.high %v1157_v13, %v1161_v37 }
 0x15f   : > { %1924 = vmatpush1.bf16.msra.mxu1 %v4297_v26  ;;  %1896 = vmatprep.subr.bf16.mxu0 %v4456_v19  ;;  %6370 = vst [vmem:[#allocation37_spill] sm:$0xff] %v4480_v33  ;;  %6371 = vst [vmem:[#allocation38_spill] sm:$0xff] %v4485_v28  ;;  %v4583_v40 = vcombine.low %v1156_v39, %v1160_v46  ;;  %v4585_v44 = vcombine.low %v1157_v13, %v1161_v37  ;;  %v1172_v39 = vld [vmem:[%s6024_s7 + $0x380] sm:$0xff]  ;;  %v1173_v13 = vld [vmem:[%s6024_s7 + $0x388] sm:$0xff] }
 0x160   : > { %1925 = vmatprep.subr.bf16.mxu1 %v4317_v32  ;;  %6373 = vst [vmem:[#allocation40_spill] sm:$0xff] %v4489_v31  ;;  %6386 = vst [vmem:[#allocation53_spill] sm:$0xff] %v4576_v27  ;;  %v1176_v46 = vld [vmem:[%s6024_s7 + $0x3a0] sm:$0xff] }
 0x161   : > { %6387 = vst [vmem:[#allocation54_spill] sm:$0xff] %v4581_v38  ;;  %6388 = vst [vmem:[#allocation55_spill] sm:$0xff] %v4583_v40  ;;  %v4624_v37 = vcombine.high %v1172_v39, %v1176_v46 }
 0x162   : > { %3496 = vmatmul.mubr.msk.bf16.gmra.mrb[28].mxu1 %vm905_vm3, %v786_v35  ;;  %v4465_v35 = vcombine.low %v1117_v18, %v1121_v20  ;;  %1897 = vmatpush1.bf16.msra.mxu0 %v4463_v22  ;;  %v4559_v18 = vcombine.low %v1148_v7, %v1152_v8  ;;  %v4561_v20 = vcombine.low %v1149_v9, %v1153_v16  ;;  %v1169_v7 = vld [vmem:[%s6024_s7 + $0x368] sm:$0xff] }
 0x163   : > { %1926 = vmatpush1.bf16.msra.mxu1 %v4321_v36  ;;  %1898 = vmatprep.subr.bf16.mxu0 %v4480_v33  ;;  %6389 = vst [vmem:[#allocation56_spill] sm:$0xff] %v4585_v44  ;;  %v4605_v8 = vcombine.high %v1165_v55, %v1169_v7  ;;  %v4607_v9 = vcombine.low %v1164_v52, %v1168_v54  ;;  %6394 = vst [vmem:[#allocation61_spill] sm:$0xff] %v4624_v37  ;;  %v1177_v52 = vld [vmem:[%s6024_s7 + $0x3a8] sm:$0xff] }
 0x164   : > { %1927 = vmatprep.subr.bf16.mxu1 %v4349_v47  ;;  %6369 = vst [vmem:[#allocation36_spill] sm:$0xff] %v4465_v35  ;;  %6384 = vst [vmem:[#allocation51_spill] sm:$0xff] %v4559_v18  ;;  %v4609_v16 = vcombine.low %v1165_v55, %v1169_v7  ;;  %v4629_v54 = vcombine.high %v1173_v13, %v1177_v52  ;;  %v4631_v55 = vcombine.low %v1172_v39, %v1176_v46  ;;  %v1181_v39 = vld [vmem:[%s6024_s7 + $0x3c8] sm:$0xff] }
 0x165   : > { %6385 = vst [vmem:[#allocation52_spill] sm:$0xff] %v4561_v20  ;;  %6391 = vst [vmem:[#allocation58_spill] sm:$0xff] %v4605_v8  ;;  %v4633_v7 = vcombine.low %v1173_v13, %v1177_v52  ;;  %v1185_v13 = vld [vmem:[%s6024_s7 + $0x3e8] sm:$0xff] }
 0x166   : > { %1899 = vmatpush1.bf16.msra.mxu0 %v4487_v29  ;;  %6392 = vst [vmem:[#allocation59_spill] sm:$0xff] %v4607_v9  ;;  %6393 = vst [vmem:[#allocation60_spill] sm:$0xff] %v4609_v16  ;;  %v4653_v52 = vcombine.high %v1181_v39, %v1185_v13 }
 0x167   : > { %1928 = vmatpush1.bf16.msra.mxu1 %v4351_v48  ;;  %1900 = vmatprep.subr.bf16.mxu0 %v4504_v42  ;;  %6395 = vst [vmem:[#allocation62_spill] sm:$0xff] %v4629_v54  ;;  %6396 = vst [vmem:[#allocation63_spill] sm:$0xff] %v4631_v55 }
 0x168   : > { %1929 = vmatprep.subr.bf16.mxu1 %v4365_v53  ;;  %6397 = vst [vmem:[#allocation64_spill] sm:$0xff] %v4633_v7  ;;  %6399 = vst [vmem:[#allocation66_spill] sm:$0xff] %v4653_v52 }
 0x16a   : > { %1901 = vmatpush1.bf16.msra.mxu0 %v4511_v50 }
 0x16b   : > { %1930 = vmatpush1.bf16.msra.mxu1 %v4382_v58  ;;  %1902 = vmatprep.subr.bf16.mxu0 %v4528_v56 }
 0x16c   : > { %1931 = vmatprep.subr.bf16.mxu1 %v4387_v60 }
 0x16e   : > { %1903 = vmatpush1.bf16.msra.mxu0 %v4535_v1 }
 0x16f   : > { %1932 = vmatpush1.bf16.msra.mxu1 %v4394_v62  ;;  %1904 = vmatprep.subr.bf16.mxu0 %v4552_v11 }
 0x170   : > { %1933 = vmatprep.subr.bf16.mxu1 %v4413_v4 }
 0x172   : > { %1905 = vmatpush1.bf16.msra.mxu0 %v4559_v18 }
 0x173   : > { %1934 = vmatpush1.bf16.msra.mxu1 %v4417_v6  ;;  %1906 = vmatprep.subr.bf16.mxu0 %v4576_v27 }
 0x174   : > { %1935 = vmatprep.subr.bf16.mxu1 %v4437_v12 }
 0x176   : > { %1907 = vmatpush1.bf16.msra.mxu0 %v4583_v40 }
 0x177   : > { %1936 = vmatpush1.bf16.msra.mxu1 %v4441_v15  ;;  %1908 = vmatprep.subr.bf16.mxu0 %v4600_v63 }
 0x178   : > { %1937 = vmatprep.subr.bf16.mxu1 %v4461_v21 }
 0x17a   : > { %1909 = vmatpush1.bf16.msra.mxu0 %v4607_v9  ;;  %v1184_v9 = vld [vmem:[%s6024_s7 + $0x3e0] sm:$0xff] }
 0x17b   : > { %1938 = vmatpush1.bf16.msra.mxu1 %v4465_v35  ;;  %1910 = vmatprep.subr.bf16.mxu0 %v4624_v37  ;;  %v1066_v37 = vld [vmem:[%s6024_s7 + $0x30] sm:$0xff] }
 0x17c   : > { %1939 = vmatprep.subr.bf16.mxu1 %v4485_v28 }
 0x17e   : > { %1911 = vmatpush1.bf16.msra.mxu0 %v4631_v55 }
 0x17f   : > { %1940 = vmatpush1.bf16.msra.mxu1 %v4489_v31 }
 0x180   : > { %1941 = vmatprep.subr.bf16.mxu1 %v4509_v45 }
 0x183   : > { %1942 = vmatpush1.bf16.msra.mxu1 %v4513_v51 }
 0x184   : > { %1943 = vmatprep.subr.bf16.mxu1 %v4533_v0 }
 0x187   : > { %1944 = vmatpush1.bf16.msra.mxu1 %v4537_v3 }
 0x188   : > { %1945 = vmatprep.subr.bf16.mxu1 %v4557_v17 }
 0x18b   : > { %1946 = vmatpush1.bf16.msra.mxu1 %v4561_v20 }
 0x18c   : > { %1947 = vmatprep.subr.bf16.mxu1 %v4581_v38 }
 0x18f   : > { %1948 = vmatpush1.bf16.msra.mxu1 %v4585_v44  ;;  %v805_v44 = vlaneseq }
 0x190   : > { %1949 = vmatprep.subr.bf16.mxu1 %v4605_v8 }
 0x191   : > { %v4689_v40 = vshrl.u32 %v805_v44, 7 }
 0x193   : > { %1950 = vmatpush1.bf16.msra.mxu1 %v4609_v16  ;;  %v1180_v16 = vld [vmem:[%s6024_s7 + $0x3c0] sm:$0xff]  ;;  %6407 = vst [vmem:[#allocation74_spill] sm:$0xff] %v4689_v40  ;;  %v6071_v38 = vsub.s32 1, %v4689_v40 }
 0x194   : > { %1951 = vmatprep.subr.bf16.mxu1 %v4629_v54  ;;  %v4648_v46 = vcombine.high %v1180_v16, %v1184_v9  ;;  %v4655_v55 = vcombine.low %v1180_v16, %v1184_v9  ;;  %v4657_v54 = vcombine.low %v1181_v39, %v1185_v13  ;;  %v1063_v9 = vld [vmem:[%s6024_s7 + $0x18] sm:$0xff] }
 0x195   : > { %v1067_v39 = vld [vmem:[%s6024_s7 + $0x38] sm:$0xff] }
 0x196   : > { %6398 = vst [vmem:[#allocation65_spill] sm:$0xff] %v4648_v46  ;;  %6400 = vst [vmem:[#allocation67_spill] sm:$0xff] %v4655_v55  ;;  %1912 = vmatprep.subr.bf16.mxu0 %v4648_v46  ;;  %v4677_v13 = vcombine.high %v1063_v9, %v1067_v39 }
 0x197   : > { %1952 = vmatpush1.bf16.msra.mxu1 %v4633_v7  ;;  %6401 = vst [vmem:[#allocation68_spill] sm:$0xff] %v4657_v54  ;;  %1913 = vmatpush1.bf16.msra.mxu0 %v4655_v55  ;;  %v1062_v7 = vld [vmem:[%s6024_s7 + $0x10] sm:$0xff] }
 0x198   : > { %1953 = vmatprep.subr.bf16.mxu1 %v4653_v52  ;;  %v4672_v16 = vcombine.high %v1062_v7, %v1066_v37  ;;  %6403 = vst [vmem:[#allocation70_spill] sm:$0xff] %v4677_v13  ;;  %v4679_v55 = vcombine.low %v1062_v7, %v1066_v37  ;;  %v4682_v52 = vcombine.low %v1063_v9, %v1067_v39  ;;  %v803_v37 = vld [vmem:[%s6023_s6] sm:$0xf]  ;;  %v6074_v7 = vsub.s32 0, %v4689_v40 }
 0x199   : > { %v4698_v9 = vrot.slane %v803_v37, %v6071_v38 }
 0x19a   : > { %6402 = vst [vmem:[#allocation69_spill] sm:$0xff] %v4672_v16  ;;  %1964 = vmatprep.subr.bf16.mxu0 %v4672_v16  ;;  %6404 = vst [vmem:[#allocation71_spill] sm:$0xff] %v4682_v52 }
 0x19b   : > { %1954 = vmatpush1.bf16.msra.mxu1 %v4657_v54  ;;  %6408 = vst [vmem:[#allocation75_spill] sm:$0xff] %v4698_v9 }
 0x19c   : > { %2005 = vmatprep.subr.bf16.mxu1 %v4677_v13 }
 0x1ed   : > { %v952_v46 = vpop.f32.mrb[0].mxu1 }
 0x1ee   : > { %v954_v8 = vpop.f32.mrb[1].mxu1 }
 0x1ef   : > { %v4685_v63 = vpop.f32.mrb[2].mxu1  ;;  %v955_v16 = vadd.f32 %v954_v8, %v4698_v9  ;;  %v6078_v8 = vsub.s32 3, %v4689_v40 }
 0x1f0   : > { %6405 = vst [vmem:[#allocation72_spill] sm:$0xff] %v4685_v63  ;;  %v4687_v54 = vpop.f32.mrb[3].mxu1 }
 0x1f1   : > { %6406 = vst [vmem:[#allocation73_spill] sm:$0xff] %v4687_v54  ;;  %v4704_v54 = vrot.slane %v803_v37, %v6074_v7  ;;  %v1215_v20 = vsub.f32 0.0, %v955_v16 }
 0x1f3   : > { %6410 = vst [vmem:[#allocation77_spill] sm:$0xff] %v4704_v54  ;;  %v953_v27 = vadd.f32 %v952_v46, %v4704_v54  ;;  %v1216_v38 = vmul.f32 1.442695, %v1215_v20 }
 0x1f5   : > { %v1210_v18 = vsub.f32 0.0, %v953_v27  ;;  %3771 = vpow2.f32 %v1216_v38 }
 0x1f7   : > { %v1211_v17 = vmul.f32 1.442695, %v1210_v18 }
 0x1f9   : > { %3773 = vpow2.f32 %v1211_v17  ;;  %v4730_v17 = vrot.slane %v803_v37, %v6078_v8 }
 0x1fb   : > { %6419 = vst [vmem:[#allocation86_spill] sm:$0xff] %v4730_v17 }
 0x1fd   : > { %v4700_v39 = vpop.f32.mrb[4].mxu1 }
 0x1fe   : > { %6409 = vst [vmem:[#allocation76_spill] sm:$0xff] %v4700_v39  ;;  %v4706_v44 = vpop.f32.mrb[5].mxu1 }
 0x1ff   : > { %6411 = vst [vmem:[#allocation78_spill] sm:$0xff] %v4706_v44  ;;  %v4708_v63 = vpop.f32.mrb[6].mxu1 }
 0x200   : > { %6412 = vst [vmem:[#allocation79_spill] sm:$0xff] %v4708_v63  ;;  %v4710_v13 = vpop.f32.mrb[7].mxu1  ;;  %v3772_v63 = vpop.eup %3771 }
 0x201   : > { %6413 = vst [vmem:[#allocation80_spill] sm:$0xff] %v4710_v13  ;;  %v6077_v13 = vsub.s32 2, %v4689_v40  ;;  %v1218_v16 = vadd.f32 1.0, %v3772_v63 }
 0x203   : > { %v3774_v46 = vpop.eup %3773  ;;  %v4726_v18 = vrot.slane %v803_v37, %v6077_v13  ;;  %3775 = vrcp.f32 %v1218_v16 }
 0x204   : > { %v1213_v20 = vadd.f32 1.0, %v3774_v46 }
 0x205   : > { %6418 = vst [vmem:[#allocation85_spill] sm:$0xff] %v4726_v18 }
 0x206   : > { %3777 = vrcp.f32 %v1213_v20 }
 0x20d   : > { %v4714_v39 = vpop.f32.mrb[8].mxu1  ;;  %v3776_v16 = vpop.eup %3775 }
 0x20e   : > { %6414 = vst [vmem:[#allocation81_spill] sm:$0xff] %v4714_v39  ;;  %v4716_v7 = vpop.f32.mrb[9].mxu1 }
 0x20f   : > { %6415 = vst [vmem:[#allocation82_spill] sm:$0xff] %v4716_v7  ;;  %v4718_v11 = vpop.f32.mrb[10].mxu1 }
 0x210   : > { %6416 = vst [vmem:[#allocation83_spill] sm:$0xff] %v4718_v11  ;;  %v4720_v44 = vpop.f32.mrb[11].mxu1  ;;  %v3778_v20 = vpop.eup %3777 }
 0x211   : > { %6417 = vst [vmem:[#allocation84_spill] sm:$0xff] %v4720_v44 }
 0x21d   : > { %v1023_v27 = vpop.f32.mrb[16].mxu1 }
 0x21e   : > { %v1024_v38 = vadd.f32 %v1023_v27, %v4726_v18  ;;  %v1025_v44 = vpop.f32.mrb[17].mxu1  ;;  %v1086_v18 = vld [vmem:[%s6024_s7 + $0xd0] sm:$0xff] }
 0x21f   : > { %v1026_v11 = vadd.f32 %v1025_v44, %v4730_v17  ;;  %v4734_v7 = vpop.f32.mrb[18].mxu1  ;;  %v1226_v44 = vmul.f32 0.0, %v3776_v16 }
 0x220   : > { %6420 = vst [vmem:[#allocation87_spill] sm:$0xff] %v4734_v7  ;;  %3779 = vtanh.f32 %v1024_v38  ;;  %v4736_v63 = vpop.f32.mrb[19].mxu1 }
 0x221   : > { %6421 = vst [vmem:[#allocation88_spill] sm:$0xff] %v4736_v63  ;;  %v1221_v13 = vsub.f32 0.0, %v1026_v11 }
 0x223   : > { %v1222_v39 = vmul.f32 1.442695, %v1221_v13 }
 0x225   : > { %3781 = vpow2.f32 %v1222_v39  ;;  %v4738_v46 = vpop.f32.mrb[20].mxu1 }
 0x226   : > { %6422 = vst [vmem:[#allocation89_spill] sm:$0xff] %v4738_v46  ;;  %v4740_v37 = vpop.f32.mrb[21].mxu1 }
 0x227   : > { %6423 = vst [vmem:[#allocation90_spill] sm:$0xff] %v4740_v37  ;;  %v4742_v8 = vpop.f32.mrb[22].mxu1 }
 0x228   : > { %6424 = vst [vmem:[#allocation91_spill] sm:$0xff] %v4742_v8  ;;  %v4744_v27 = vpop.f32.mrb[23].mxu1 }
 0x229   : > { %6425 = vst [vmem:[#allocation92_spill] sm:$0xff] %v4744_v27 }
 0x22a   : > { %v3780_v40 = vpop.eup %3779 }
 0x22b   : > { %v1227_v17 = vmul.f32 %v3780_v40, %v3778_v20  ;;  %v1070_v40 = vld [vmem:[%s6024_s7 + $0x50] sm:$0xff] }
 0x22d   : > { %v4746_v9 = vadd.f32 %v1227_v17, %v1226_v44  ;;  %v4748_v38 = vpop.f32.mrb[24].mxu1  ;;  %v1074_v17 = vld [vmem:[%s6024_s7 + $0x70] sm:$0xff]  ;;  %v1071_v44 = vld [vmem:[%s6024_s7 + $0x58] sm:$0xff] }
 0x22e   : > { %6427 = vst [vmem:[#allocation94_spill] sm:$0xff] %v4748_v38  ;;  %v4750_v11 = vpop.f32.mrb[25].mxu1 }
 0x22f   : > { %6426 = vst [vmem:[#allocation93_spill] sm:$0xff] %v4746_v9  ;;  %6428 = vst [vmem:[#allocation95_spill] sm:$0xff] %v4750_v11  ;;  %v3782_v13 = vpop.eup %3781  ;;  %v4752_v39 = vpop.f32.mrb[26].mxu1  ;;  %3783 = vtanh.f32 %v4746_v9  ;;  %v4791_v11 = vcombine.low %v1070_v40, %v1074_v17 }
 0x230   : > { %6429 = vst [vmem:[#allocation96_spill] sm:$0xff] %v4752_v39  ;;  %v1224_v46 = vadd.f32 1.0, %v3782_v13  ;;  %v4754_v37 = vpop.f32.mrb[27].mxu1  ;;  %v4774_v13 = vcombine.high %v1070_v40, %v1074_v17  ;;  %v1079_v39 = vld [vmem:[%s6024_s7 + $0x98] sm:$0xff]  ;;  %v1090_v40 = vld [vmem:[%s6024_s7 + $0xf0] sm:$0xff] }
 0x231   : > { %6430 = vst [vmem:[#allocation97_spill] sm:$0xff] %v4754_v37  ;;  %v1082_v37 = vld [vmem:[%s6024_s7 + $0xb0] sm:$0xff]  ;;  %6433 = vst [vmem:[#allocation100_spill] sm:$0xff] %v4791_v11  ;;  %v1087_v17 = vld [vmem:[%s6024_s7 + $0xd8] sm:$0xff] }
 0x232   : > { %3785 = vrcp.f32 %v1224_v46  ;;  %v1075_v46 = vld [vmem:[%s6024_s7 + $0x78] sm:$0xff]  ;;  %6431 = vst [vmem:[#allocation98_spill] sm:$0xff] %v4774_v13 }
 0x233   : > { %v4793_v38 = vcombine.low %v1071_v44, %v1075_v46 }
 0x235   : > { %6434 = vst [vmem:[#allocation101_spill] sm:$0xff] %v4793_v38 }
 0x239   : > { %v3784_v27 = vpop.eup %3783 }
 0x23c   : > { %v3786_v8 = vpop.eup %3785 }
 0x23d   : > { %v1230_v63 = vmul.f32 %v3786_v8, %v3784_v27  ;;  %v1078_v27 = vld [vmem:[%s6024_s7 + $0x90] sm:$0xff] }
 0x23e   : > { %v4795_v9 = vcombine.high %v1078_v27, %v1082_v37 }
 0x23f   : > { %v1231_v16 = vpack.c.bf16 %v1230_v63, %v1230_v63 }
 0x240   : > { %6435 = vst [vmem:[#allocation102_spill] sm:$0xff] %v4795_v9 }
 0x241   : > { %1232 = vst [vmem:[#allocation2] sm:$0xf] %v1231_v16  ;;  %v4776_v16 = vcombine.high %v1071_v44, %v1075_v46  ;;  %v1091_v44 = vld [vmem:[%s6024_s7 + $0xf8] sm:$0xff]  ;;  %v4815_v46 = vcombine.low %v1078_v27, %v1082_v37  ;;  %v4839_v27 = vcombine.low %v1086_v18, %v1090_v40 }
 0x242   : > { %v1095_v37 = vld [vmem:[%s6024_s7 + $0x118] sm:$0xff] }
 0x243   : > { %6432 = vst [vmem:[#allocation99_spill] sm:$0xff] %v4776_v16  ;;  %6437 = vst [vmem:[#allocation104_spill] sm:$0xff] %v4815_v46 }
 0x244   : > { %6441 = vst [vmem:[#allocation108_spill] sm:$0xff] %v4839_v27 }
 0x248   : > { %v1234_v20 = vld [vmem:[#allocation2] sm:$0xff] }
 0x249   : > { %v3498_v8 = vcombine.high %v1234_v20, %v1234_v20  ;;  %v4769_v63 = vcombine.low %v1234_v20, %v1234_v20  ;;  %v1083_v20 = vld [vmem:[%s6024_s7 + $0xb8] sm:$0xff] }
 0x24a   : > { %v4797_v7 = vcombine.high %v1079_v39, %v1083_v20 }
 0x24b   : > { %1914 = vmatprep.mubr.bf16.mxu0 %v3498_v8  ;;  %1955 = vmatprep.mubr.bf16.mxu1 %v3498_v8 }
 0x24c   : > { %1915 = vmatmul.mubr.bf16.vlgmr.msra.gmra.mrb[28].mxu0 %v4769_v63  ;;  %1956 = vmatmul.mubr.bf16.vlgmr.msra.gmra.mrb[32].mxu1 %v4769_v63  ;;  %6436 = vst [vmem:[#allocation103_spill] sm:$0xff] %v4797_v7 }
 0x24d   : > { %1965 = vmatpush1.bf16.msra.mxu0 %v4679_v55  ;;  %2006 = vmatpush1.bf16.msra.mxu1 %v4682_v52  ;;  %v1094_v52 = vld [vmem:[%s6024_s7 + $0x110] sm:$0xff] }
 0x24e   : > { %1996 = vmatprep.mubr.bf16.mxu0 %v3498_v8  ;;  %2037 = vmatprep.mubr.bf16.mxu1 %v3498_v8  ;;  %v4817_v8 = vcombine.low %v1079_v39, %v1083_v20  ;;  %v1099_v39 = vld [vmem:[%s6024_s7 + $0x138] sm:$0xff]  ;;  %v4841_v20 = vcombine.low %v1087_v17, %v1091_v44 }
 0x24f   : > { %1966 = vmatprep.subr.bf16.mxu0 %v4774_v13  ;;  %2007 = vmatprep.subr.bf16.mxu1 %v4776_v16  ;;  %v4821_v16 = vcombine.high %v1086_v18, %v1090_v40  ;;  %v4823_v13 = vcombine.high %v1087_v17, %v1091_v44  ;;  %v1103_v18 = vld [vmem:[%s6024_s7 + $0x158] sm:$0xff]  ;;  %v4865_v44 = vcombine.low %v1095_v37, %v1099_v39 }
 0x250   : > { %6438 = vst [vmem:[#allocation105_spill] sm:$0xff] %v4817_v8  ;;  %6442 = vst [vmem:[#allocation109_spill] sm:$0xff] %v4841_v20  ;;  %v1107_v40 = vld [vmem:[%s6024_s7 + $0x178] sm:$0xff] }
 0x251   : > { %1967 = vmatpush1.bf16.msra.mxu0 %v4791_v11  ;;  %2008 = vmatpush1.bf16.msra.mxu1 %v4793_v38  ;;  %6439 = vst [vmem:[#allocation106_spill] sm:$0xff] %v4821_v16  ;;  %6440 = vst [vmem:[#allocation107_spill] sm:$0xff] %v4823_v13  ;;  %v1098_v38 = vld [vmem:[%s6024_s7 + $0x130] sm:$0xff] }
 0x252   : > { %1968 = vmatprep.subr.bf16.mxu0 %v4795_v9  ;;  %2009 = vmatprep.subr.bf16.mxu1 %v4797_v7  ;;  %v4845_v7 = vcombine.high %v1094_v52, %v1098_v38  ;;  %v4847_v9 = vcombine.high %v1095_v37, %v1099_v39  ;;  %v1102_v11 = vld [vmem:[%s6024_s7 + $0x150] sm:$0xff]  ;;  %v4863_v17 = vcombine.low %v1094_v52, %v1098_v38  ;;  %v1111_v52 = vld [vmem:[%s6024_s7 + $0x198] sm:$0xff] }
 0x253   : > { %6446 = vst [vmem:[#allocation113_spill] sm:$0xff] %v4865_v44  ;;  %v1115_v38 = vld [vmem:[%s6024_s7 + $0x1b8] sm:$0xff]  ;;  %v4889_v39 = vcombine.low %v1103_v18, %v1107_v40 }
 0x254   : > { %6443 = vst [vmem:[#allocation110_spill] sm:$0xff] %v4845_v7  ;;  %6444 = vst [vmem:[#allocation111_spill] sm:$0xff] %v4847_v9 }
 0x255   : > { %1969 = vmatpush1.bf16.msra.mxu0 %v4815_v46  ;;  %2010 = vmatpush1.bf16.msra.mxu1 %v4817_v8  ;;  %v1106_v8 = vld [vmem:[%s6024_s7 + $0x170] sm:$0xff]  ;;  %6445 = vst [vmem:[#allocation112_spill] sm:$0xff] %v4863_v17  ;;  %6450 = vst [vmem:[#allocation117_spill] sm:$0xff] %v4889_v39 }
 0x256   : > { %1970 = vmatprep.subr.bf16.mxu0 %v4821_v16  ;;  %2011 = vmatprep.subr.bf16.mxu1 %v4823_v13  ;;  %v4869_v13 = vcombine.high %v1102_v11, %v1106_v8  ;;  %v4871_v16 = vcombine.high %v1103_v18, %v1107_v40  ;;  %v1110_v46 = vld [vmem:[%s6024_s7 + $0x190] sm:$0xff]  ;;  %v4887_v37 = vcombine.low %v1102_v11, %v1106_v8  ;;  %v1119_v11 = vld [vmem:[%s6024_s7 + $0x1d8] sm:$0xff] }
 0x257   : > { %v1123_v8 = vld [vmem:[%s6024_s7 + $0x1f8] sm:$0xff]  ;;  %v4913_v40 = vcombine.low %v1111_v52, %v1115_v38 }
 0x258   : > { %6447 = vst [vmem:[#allocation114_spill] sm:$0xff] %v4869_v13  ;;  %6448 = vst [vmem:[#allocation115_spill] sm:$0xff] %v4871_v16 }
 0x259   : > { %1971 = vmatpush1.bf16.msra.mxu0 %v4839_v27  ;;  %2012 = vmatpush1.bf16.msra.mxu1 %v4841_v20  ;;  %v1114_v20 = vld [vmem:[%s6024_s7 + $0x1b0] sm:$0xff]  ;;  %6449 = vst [vmem:[#allocation116_spill] sm:$0xff] %v4887_v37  ;;  %6454 = vst [vmem:[#allocation121_spill] sm:$0xff] %v4913_v40 }
 0x25a   : > { %1972 = vmatprep.subr.bf16.mxu0 %v4845_v7  ;;  %2013 = vmatprep.subr.bf16.mxu1 %v4847_v9  ;;  %v4893_v9 = vcombine.high %v1110_v46, %v1114_v20  ;;  %v4895_v7 = vcombine.high %v1111_v52, %v1115_v38  ;;  %v1118_v27 = vld [vmem:[%s6024_s7 + $0x1d0] sm:$0xff]  ;;  %v4911_v18 = vcombine.low %v1110_v46, %v1114_v20  ;;  %v1127_v46 = vld [vmem:[%s6024_s7 + $0x218] sm:$0xff] }
 0x25b   : > { %v1131_v20 = vld [vmem:[%s6024_s7 + $0x238] sm:$0xff]  ;;  %v4937_v38 = vcombine.low %v1119_v11, %v1123_v8 }
 0x25c   : > { %6451 = vst [vmem:[#allocation118_spill] sm:$0xff] %v4893_v9  ;;  %6452 = vst [vmem:[#allocation119_spill] sm:$0xff] %v4895_v7 }
 0x25d   : > { %1973 = vmatpush1.bf16.msra.mxu0 %v4863_v17  ;;  %2014 = vmatpush1.bf16.msra.mxu1 %v4865_v44  ;;  %v1122_v44 = vld [vmem:[%s6024_s7 + $0x1f0] sm:$0xff]  ;;  %6453 = vst [vmem:[#allocation120_spill] sm:$0xff] %v4911_v18  ;;  %6458 = vst [vmem:[#allocation125_spill] sm:$0xff] %v4937_v38 }
 0x25e   : > { %1974 = vmatprep.subr.bf16.mxu0 %v4869_v13  ;;  %2015 = vmatprep.subr.bf16.mxu1 %v4871_v16  ;;  %v4917_v16 = vcombine.high %v1118_v27, %v1122_v44  ;;  %v4919_v13 = vcombine.high %v1119_v11, %v1123_v8  ;;  %v1126_v17 = vld [vmem:[%s6024_s7 + $0x210] sm:$0xff]  ;;  %v4935_v52 = vcombine.low %v1118_v27, %v1122_v44  ;;  %v1135_v27 = vld [vmem:[%s6024_s7 + $0x258] sm:$0xff] }
 0x25f   : > { %v1139_v44 = vld [vmem:[%s6024_s7 + $0x278] sm:$0xff]  ;;  %v4961_v8 = vcombine.low %v1127_v46, %v1131_v20 }
 0x260   : > { %6455 = vst [vmem:[#allocation122_spill] sm:$0xff] %v4917_v16  ;;  %6456 = vst [vmem:[#allocation123_spill] sm:$0xff] %v4919_v13 }
 0x261   : > { %1975 = vmatpush1.bf16.msra.mxu0 %v4887_v37  ;;  %2016 = vmatpush1.bf16.msra.mxu1 %v4889_v39  ;;  %v1130_v39 = vld [vmem:[%s6024_s7 + $0x230] sm:$0xff]  ;;  %6457 = vst [vmem:[#allocation124_spill] sm:$0xff] %v4935_v52  ;;  %6462 = vst [vmem:[#allocation129_spill] sm:$0xff] %v4961_v8 }
 0x262   : > { %1976 = vmatprep.subr.bf16.mxu0 %v4893_v9  ;;  %2017 = vmatprep.subr.bf16.mxu1 %v4895_v7  ;;  %v4941_v7 = vcombine.high %v1126_v17, %v1130_v39  ;;  %v4943_v9 = vcombine.high %v1127_v46, %v1131_v20  ;;  %v1134_v37 = vld [vmem:[%s6024_s7 + $0x250] sm:$0xff]  ;;  %v4959_v11 = vcombine.low %v1126_v17, %v1130_v39  ;;  %v1143_v17 = vld [vmem:[%s6024_s7 + $0x298] sm:$0xff] }
 0x263   : > { %v1147_v39 = vld [vmem:[%s6024_s7 + $0x2b8] sm:$0xff]  ;;  %v4985_v20 = vcombine.low %v1135_v27, %v1139_v44 }
 0x264   : > { %6459 = vst [vmem:[#allocation126_spill] sm:$0xff] %v4941_v7  ;;  %6460 = vst [vmem:[#allocation127_spill] sm:$0xff] %v4943_v9 }
 0x265   : > { %1977 = vmatpush1.bf16.msra.mxu0 %v4911_v18  ;;  %2018 = vmatpush1.bf16.msra.mxu1 %v4913_v40  ;;  %v1138_v40 = vld [vmem:[%s6024_s7 + $0x270] sm:$0xff]  ;;  %6461 = vst [vmem:[#allocation128_spill] sm:$0xff] %v4959_v11  ;;  %6466 = vst [vmem:[#allocation133_spill] sm:$0xff] %v4985_v20 }
 0x266   : > { %1978 = vmatprep.subr.bf16.mxu0 %v4917_v16  ;;  %2019 = vmatprep.subr.bf16.mxu1 %v4919_v13  ;;  %v4965_v13 = vcombine.high %v1134_v37, %v1138_v40  ;;  %v4967_v16 = vcombine.high %v1135_v27, %v1139_v44  ;;  %v1142_v18 = vld [vmem:[%s6024_s7 + $0x290] sm:$0xff]  ;;  %v4983_v46 = vcombine.low %v1134_v37, %v1138_v40  ;;  %v1151_v37 = vld [vmem:[%s6024_s7 + $0x2d8] sm:$0xff] }
 0x267   : > { %v1155_v40 = vld [vmem:[%s6024_s7 + $0x2f8] sm:$0xff]  ;;  %v5009_v44 = vcombine.low %v1143_v17, %v1147_v39 }
 0x268   : > { %6463 = vst [vmem:[#allocation130_spill] sm:$0xff] %v4965_v13  ;;  %6464 = vst [vmem:[#allocation131_spill] sm:$0xff] %v4967_v16 }
 0x269   : > { %1979 = vmatpush1.bf16.msra.mxu0 %v4935_v52  ;;  %2020 = vmatpush1.bf16.msra.mxu1 %v4937_v38  ;;  %v1146_v38 = vld [vmem:[%s6024_s7 + $0x2b0] sm:$0xff]  ;;  %6465 = vst [vmem:[#allocation132_spill] sm:$0xff] %v4983_v46  ;;  %6470 = vst [vmem:[#allocation137_spill] sm:$0xff] %v5009_v44 }
 0x26a   : > { %1980 = vmatprep.subr.bf16.mxu0 %v4941_v7  ;;  %2021 = vmatprep.subr.bf16.mxu1 %v4943_v9  ;;  %v4989_v9 = vcombine.high %v1142_v18, %v1146_v38  ;;  %v4991_v7 = vcombine.high %v1143_v17, %v1147_v39  ;;  %v1150_v52 = vld [vmem:[%s6024_s7 + $0x2d0] sm:$0xff]  ;;  %v5007_v27 = vcombine.low %v1142_v18, %v1146_v38  ;;  %v1159_v18 = vld [vmem:[%s6024_s7 + $0x318] sm:$0xff] }
 0x26b   : > { %v1163_v38 = vld [vmem:[%s6024_s7 + $0x338] sm:$0xff]  ;;  %v5033_v39 = vcombine.low %v1151_v37, %v1155_v40 }
 0x26c   : > { %6467 = vst [vmem:[#allocation134_spill] sm:$0xff] %v4989_v9  ;;  %6468 = vst [vmem:[#allocation135_spill] sm:$0xff] %v4991_v7 }
 0x26d   : > { %1981 = vmatpush1.bf16.msra.mxu0 %v4959_v11  ;;  %2022 = vmatpush1.bf16.msra.mxu1 %v4961_v8  ;;  %v1154_v8 = vld [vmem:[%s6024_s7 + $0x2f0] sm:$0xff]  ;;  %6469 = vst [vmem:[#allocation136_spill] sm:$0xff] %v5007_v27  ;;  %6474 = vst [vmem:[#allocation141_spill] sm:$0xff] %v5033_v39 }
 0x26e   : > { %1982 = vmatprep.subr.bf16.mxu0 %v4965_v13  ;;  %2023 = vmatprep.subr.bf16.mxu1 %v4967_v16  ;;  %v5013_v16 = vcombine.high %v1150_v52, %v1154_v8  ;;  %v5015_v13 = vcombine.high %v1151_v37, %v1155_v40  ;;  %v1158_v11 = vld [vmem:[%s6024_s7 + $0x310] sm:$0xff]  ;;  %v5031_v17 = vcombine.low %v1150_v52, %v1154_v8  ;;  %v1167_v52 = vld [vmem:[%s6024_s7 + $0x358] sm:$0xff] }
 0x26f   : > { %v1171_v8 = vld [vmem:[%s6024_s7 + $0x378] sm:$0xff]  ;;  %v5057_v40 = vcombine.low %v1159_v18, %v1163_v38 }
 0x270   : > { %6471 = vst [vmem:[#allocation138_spill] sm:$0xff] %v5013_v16  ;;  %6472 = vst [vmem:[#allocation139_spill] sm:$0xff] %v5015_v13 }
 0x271   : > { %1983 = vmatpush1.bf16.msra.mxu0 %v4983_v46  ;;  %2024 = vmatpush1.bf16.msra.mxu1 %v4985_v20  ;;  %v1162_v20 = vld [vmem:[%s6024_s7 + $0x330] sm:$0xff]  ;;  %6473 = vst [vmem:[#allocation140_spill] sm:$0xff] %v5031_v17  ;;  %6478 = vst [vmem:[#allocation145_spill] sm:$0xff] %v5057_v40 }
 0x272   : > { %1984 = vmatprep.subr.bf16.mxu0 %v4989_v9  ;;  %2025 = vmatprep.subr.bf16.mxu1 %v4991_v7  ;;  %v5037_v7 = vcombine.high %v1158_v11, %v1162_v20  ;;  %v5039_v9 = vcombine.high %v1159_v18, %v1163_v38  ;;  %v1166_v46 = vld [vmem:[%s6024_s7 + $0x350] sm:$0xff]  ;;  %v5055_v37 = vcombine.low %v1158_v11, %v1162_v20  ;;  %v1175_v11 = vld [vmem:[%s6024_s7 + $0x398] sm:$0xff] }
 0x273   : > { %v1179_v20 = vld [vmem:[%s6024_s7 + $0x3b8] sm:$0xff]  ;;  %v5081_v38 = vcombine.low %v1167_v52, %v1171_v8 }
 0x274   : > { %6475 = vst [vmem:[#allocation142_spill] sm:$0xff] %v5037_v7  ;;  %6476 = vst [vmem:[#allocation143_spill] sm:$0xff] %v5039_v9 }
 0x275   : > { %1985 = vmatpush1.bf16.msra.mxu0 %v5007_v27  ;;  %2026 = vmatpush1.bf16.msra.mxu1 %v5009_v44  ;;  %v1170_v44 = vld [vmem:[%s6024_s7 + $0x370] sm:$0xff]  ;;  %6477 = vst [vmem:[#allocation144_spill] sm:$0xff] %v5055_v37  ;;  %6482 = vst [vmem:[#allocation149_spill] sm:$0xff] %v5081_v38 }
 0x276   : > { %1986 = vmatprep.subr.bf16.mxu0 %v5013_v16  ;;  %2027 = vmatprep.subr.bf16.mxu1 %v5015_v13  ;;  %v5061_v13 = vcombine.high %v1166_v46, %v1170_v44  ;;  %v5063_v16 = vcombine.high %v1167_v52, %v1171_v8  ;;  %v1174_v27 = vld [vmem:[%s6024_s7 + $0x390] sm:$0xff]  ;;  %v5079_v18 = vcombine.low %v1166_v46, %v1170_v44  ;;  %v1183_v46 = vld [vmem:[%s6024_s7 + $0x3d8] sm:$0xff] }
 0x277   : > { %v1187_v44 = vld [vmem:[%s6024_s7 + $0x3f8] sm:$0xff]  ;;  %v5105_v8 = vcombine.low %v1175_v11, %v1179_v20 }
 0x278   : > { %6479 = vst [vmem:[#allocation146_spill] sm:$0xff] %v5061_v13  ;;  %6480 = vst [vmem:[#allocation147_spill] sm:$0xff] %v5063_v16 }
 0x279   : > { %1987 = vmatpush1.bf16.msra.mxu0 %v5031_v17  ;;  %2028 = vmatpush1.bf16.msra.mxu1 %v5033_v39  ;;  %v1178_v39 = vld [vmem:[%s6024_s7 + $0x3b0] sm:$0xff]  ;;  %6481 = vst [vmem:[#allocation148_spill] sm:$0xff] %v5079_v18  ;;  %6486 = vst [vmem:[#allocation153_spill] sm:$0xff] %v5105_v8 }
 0x27a   : > { %1988 = vmatprep.subr.bf16.mxu0 %v5037_v7  ;;  %2029 = vmatprep.subr.bf16.mxu1 %v5039_v9  ;;  %v5085_v9 = vcombine.high %v1174_v27, %v1178_v39  ;;  %v5087_v7 = vcombine.high %v1175_v11, %v1179_v20  ;;  %v1182_v17 = vld [vmem:[%s6024_s7 + $0x3d0] sm:$0xff]  ;;  %v5103_v52 = vcombine.low %v1174_v27, %v1178_v39  ;;  %v6492_v27 = vld [vmem:[#allocation50_spill] sm:$0xff] }
 0x27b   : > { %v6494_v39 = vld [vmem:[#allocation52_spill] sm:$0xff]  ;;  %v6496_v11 = vld [vmem:[#allocation54_spill] sm:$0xff]  ;;  %v6497_v20 = vld [vmem:[#allocation55_spill] sm:$0xff] }
 0x27c   : > { %6483 = vst [vmem:[#allocation150_spill] sm:$0xff] %v5085_v9  ;;  %6484 = vst [vmem:[#allocation151_spill] sm:$0xff] %v5087_v7 }
 0x27d   : > { %1989 = vmatpush1.bf16.msra.mxu0 %v5055_v37  ;;  %2030 = vmatpush1.bf16.msra.mxu1 %v5057_v40  ;;  %v1186_v40 = vld [vmem:[%s6024_s7 + $0x3f0] sm:$0xff]  ;;  %6485 = vst [vmem:[#allocation152_spill] sm:$0xff] %v5103_v52 }
 0x27e   : > { %1990 = vmatprep.subr.bf16.mxu0 %v5061_v13  ;;  %2031 = vmatprep.subr.bf16.mxu1 %v5063_v16  ;;  %v5109_v16 = vcombine.high %v1182_v17, %v1186_v40  ;;  %v5111_v13 = vcombine.high %v1183_v46, %v1187_v44  ;;  %v5115_v37 = vcombine.low %v1182_v17, %v1186_v40  ;;  %v6493_v17 = vld [vmem:[#allocation51_spill] sm:$0xff]  ;;  %v6495_v40 = vld [vmem:[#allocation53_spill] sm:$0xff] }
 0x280   : > { %6487 = vst [vmem:[#allocation154_spill] sm:$0xff] %v5109_v16  ;;  %6488 = vst [vmem:[#allocation155_spill] sm:$0xff] %v5111_v13 }
 0x281   : > { %1991 = vmatpush1.bf16.msra.mxu0 %v5079_v18  ;;  %2032 = vmatpush1.bf16.msra.mxu1 %v5081_v38  ;;  %6489 = vst [vmem:[#allocation156_spill] sm:$0xff] %v5115_v37  ;;  %v5117_v18 = vcombine.low %v1183_v46, %v1187_v44  ;;  %v6498_v46 = vld [vmem:[#allocation56_spill] sm:$0xff]  ;;  %v6499_v44 = vld [vmem:[#allocation57_spill] sm:$0xff] }
 0x282   : > { %1992 = vmatprep.subr.bf16.mxu0 %v5085_v9  ;;  %2033 = vmatprep.subr.bf16.mxu1 %v5087_v7 }
 0x283   : > { %6490 = vst [vmem:[#allocation157_spill] sm:$0xff] %v5117_v18 }
 0x285   : > { %1993 = vmatpush1.bf16.msra.mxu0 %v5103_v52  ;;  %2034 = vmatpush1.bf16.msra.mxu1 %v5105_v8 }
 0x286   : > { %1994 = vmatprep.subr.bf16.mxu0 %v5109_v16  ;;  %2035 = vmatprep.subr.bf16.mxu1 %v5111_v13 }
 0x289   : > { %1995 = vmatpush1.bf16.msra.mxu0 %v5115_v37  ;;  %2036 = vmatpush1.bf16.msra.mxu1 %v5117_v18 }
 0x28a   : > { %2108 = vmatprep.subr.bf16.mxu0 %v4288_v23  ;;  %2149 = vmatprep.subr.bf16.mxu1 %v4293_v24 }
 0x28c   : > { %1997 = vmatmul.mubr.bf16.vlgmr.msra.gmra.mrb[32].mxu0 %v4769_v63  ;;  %2038 = vmatmul.mubr.bf16.vlgmr.msra.gmra.mrb[36].mxu1 %v4769_v63  ;;  %v6491_v63 = vld [vmem:[#allocation49_spill] sm:$0xff] }
 0x28d   : > { %2109 = vmatpush1.bf16.msra.mxu0 %v4295_v25  ;;  %2150 = vmatpush1.bf16.msra.mxu1 %v4297_v26 }
 0x28e   : > { %2110 = vmatprep.subr.bf16.mxu0 %v4312_v30  ;;  %2151 = vmatprep.subr.bf16.mxu1 %v4317_v32 }
 0x291   : > { %2111 = vmatpush1.bf16.msra.mxu0 %v4319_v34  ;;  %2152 = vmatpush1.bf16.msra.mxu1 %v4321_v36 }
 0x292   : > { %2112 = vmatprep.subr.bf16.mxu0 %v4336_v41  ;;  %2153 = vmatprep.subr.bf16.mxu1 %v4349_v47 }
 0x295   : > { %2113 = vmatpush1.bf16.msra.mxu0 %v4341_v43  ;;  %2154 = vmatpush1.bf16.msra.mxu1 %v4351_v48 }
 0x296   : > { %2114 = vmatprep.subr.bf16.mxu0 %v4353_v49  ;;  %2155 = vmatprep.subr.bf16.mxu1 %v4365_v53 }
 0x299   : > { %2115 = vmatpush1.bf16.msra.mxu0 %v4378_v57  ;;  %2156 = vmatpush1.bf16.msra.mxu1 %v4382_v58 }
 0x29a   : > { %2116 = vmatprep.subr.bf16.mxu0 %v4384_v59  ;;  %2157 = vmatprep.subr.bf16.mxu1 %v4387_v60 }
 0x29d   : > { %2117 = vmatpush1.bf16.msra.mxu0 %v4390_v61  ;;  %2158 = vmatpush1.bf16.msra.mxu1 %v4394_v62 }
 0x29e   : > { %2118 = vmatprep.subr.bf16.mxu0 %v4408_v2  ;;  %2159 = vmatprep.subr.bf16.mxu1 %v4413_v4 }
 0x2a1   : > { %2119 = vmatpush1.bf16.msra.mxu0 %v4415_v5  ;;  %2160 = vmatpush1.bf16.msra.mxu1 %v4417_v6 }
 0x2a2   : > { %2120 = vmatprep.subr.bf16.mxu0 %v4432_v10  ;;  %2161 = vmatprep.subr.bf16.mxu1 %v4437_v12 }
 0x2a5   : > { %2121 = vmatpush1.bf16.msra.mxu0 %v4439_v14  ;;  %2162 = vmatpush1.bf16.msra.mxu1 %v4441_v15 }
 0x2a6   : > { %2122 = vmatprep.subr.bf16.mxu0 %v4456_v19  ;;  %2163 = vmatprep.subr.bf16.mxu1 %v4461_v21 }
 0x2a9   : > { %2123 = vmatpush1.bf16.msra.mxu0 %v4463_v22  ;;  %2164 = vmatpush1.bf16.msra.mxu1 %v4465_v35 }
 0x2aa   : > { %2124 = vmatprep.subr.bf16.mxu0 %v4480_v33  ;;  %2165 = vmatprep.subr.bf16.mxu1 %v4485_v28 }
 0x2ad   : > { %2125 = vmatpush1.bf16.msra.mxu0 %v4487_v29  ;;  %2166 = vmatpush1.bf16.msra.mxu1 %v4489_v31 }
 0x2ae   : > { %2126 = vmatprep.subr.bf16.mxu0 %v4504_v42  ;;  %2167 = vmatprep.subr.bf16.mxu1 %v4509_v45 }
 0x2b1   : > { %2127 = vmatpush1.bf16.msra.mxu0 %v4511_v50  ;;  %2168 = vmatpush1.bf16.msra.mxu1 %v4513_v51  ;;  %v6519_v50 = vld [vmem:[#allocation88_spill] sm:$0xff] }
 0x2b2   : > { %2128 = vmatprep.subr.bf16.mxu0 %v4528_v56  ;;  %2169 = vmatprep.subr.bf16.mxu1 %v4533_v0  ;;  %v6515_v0 = vld [vmem:[#allocation87_spill] sm:$0xff] }
 0x2b3   : > { %v6516_v56 = vld [vmem:[#allocation75_spill] sm:$0xff] }
 0x2b5   : > { %2129 = vmatpush1.bf16.msra.mxu0 %v4535_v1  ;;  %2170 = vmatpush1.bf16.msra.mxu1 %v4537_v3  ;;  %v6500_v1 = vld [vmem:[#allocation58_spill] sm:$0xff]  ;;  %v6501_v3 = vld [vmem:[#allocation59_spill] sm:$0xff] }
 0x2b6   : > { %2130 = vmatprep.subr.bf16.mxu0 %v6491_v63  ;;  %2171 = vmatprep.subr.bf16.mxu1 %v6492_v27  ;;  %v6502_v63 = vld [vmem:[#allocation60_spill] sm:$0xff]  ;;  %v6503_v27 = vld [vmem:[#allocation61_spill] sm:$0xff] }
 0x2b9   : > { %2131 = vmatpush1.bf16.msra.mxu0 %v6493_v17  ;;  %2172 = vmatpush1.bf16.msra.mxu1 %v6494_v39  ;;  %v6504_v17 = vld [vmem:[#allocation62_spill] sm:$0xff]  ;;  %v6505_v39 = vld [vmem:[#allocation63_spill] sm:$0xff] }
 0x2ba   : > { %2132 = vmatprep.subr.bf16.mxu0 %v6495_v40  ;;  %2173 = vmatprep.subr.bf16.mxu1 %v6496_v11  ;;  %v6506_v40 = vld [vmem:[#allocation64_spill] sm:$0xff]  ;;  %v6507_v11 = vld [vmem:[#allocation65_spill] sm:$0xff] }
 0x2bd   : > { %2133 = vmatpush1.bf16.msra.mxu0 %v6497_v20  ;;  %2174 = vmatpush1.bf16.msra.mxu1 %v6498_v46  ;;  %v6508_v20 = vld [vmem:[#allocation66_spill] sm:$0xff]  ;;  %v6509_v46 = vld [vmem:[#allocation67_spill] sm:$0xff] }
 0x2be   : > { %2134 = vmatprep.subr.bf16.mxu0 %v6499_v44  ;;  %2175 = vmatprep.subr.bf16.mxu1 %v6500_v1  ;;  %v6510_v44 = vld [vmem:[#allocation68_spill] sm:$0xff]  ;;  %v6511_v1 = vld [vmem:[#allocation69_spill] sm:$0xff] }
 0x2c1   : > { %2135 = vmatpush1.bf16.msra.mxu0 %v6501_v3  ;;  %2176 = vmatpush1.bf16.msra.mxu1 %v6502_v63  ;;  %v6512_v3 = vld [vmem:[#allocation70_spill] sm:$0xff] }
 0x2c2   : > { %2136 = vmatprep.subr.bf16.mxu0 %v6503_v27  ;;  %2177 = vmatprep.subr.bf16.mxu1 %v6504_v17  ;;  %v6513_v27 = vld [vmem:[#allocation72_spill] sm:$0xff]  ;;  %v6514_v17 = vld [vmem:[#allocation85_spill] sm:$0xff] }
 0x2c3   : > { %v957_v63 = vadd.f32 %v6513_v27, %v4704_v54 }
 0x2c5   : > { %2137 = vmatpush1.bf16.msra.mxu0 %v6505_v39  ;;  %2178 = vmatpush1.bf16.msra.mxu1 %v6506_v40  ;;  %v1028_v39 = vadd.f32 %v6515_v0, %v6514_v17  ;;  %v6517_v40 = vld [vmem:[#allocation73_spill] sm:$0xff] }
 0x2c6   : > { %2138 = vmatprep.subr.bf16.mxu0 %v6507_v11  ;;  %2179 = vmatprep.subr.bf16.mxu1 %v6508_v20  ;;  %v959_v51 = vadd.f32 %v6517_v40, %v6516_v56  ;;  %v6518_v11 = vld [vmem:[#allocation86_spill] sm:$0xff] }
 0x2c7   : > { %v1030_v20 = vadd.f32 %v6519_v50, %v6518_v11 }
 0x2c9   : > { %2139 = vmatpush1.bf16.msra.mxu0 %v6509_v46  ;;  %2180 = vmatpush1.bf16.msra.mxu1 %v6510_v44 }
 0x2ca   : > { %2190 = vmatprep.subr.bf16.mxu0 %v6511_v1  ;;  %2231 = vmatprep.subr.bf16.mxu1 %v6512_v3 }
 0x31f   : > { %v1916_v45 = vpop.f32.mrb[28].mxu0  ;;  %v1957_v46 = vpop.f32.mrb[32].mxu1 }
 0x320   : > { %v2073_v42 = vadd.f32 %v1916_v45, %v957_v63  ;;  %v2075_v44 = vadd.f32 %v1957_v46, %v1028_v39  ;;  %v1918_v31 = vpop.f32.mrb[29].mxu0  ;;  %v1959_v1 = vpop.f32.mrb[33].mxu1 }
 0x321   : > { %v2074_v29 = vadd.f32 %v1918_v31, %v959_v51  ;;  %v2076_v3 = vadd.f32 %v1959_v1, %v1030_v20  ;;  %v1920_v28 = vpop.f32.mrb[30].mxu0  ;;  %v1961_v33 = vpop.f32.mrb[34].mxu1  ;;  %v6520_v51 = vld [vmem:[#allocation93_spill] sm:$0xff] }
 0x322   : > { %v2077_v27 = vsub.f32 0.0, %v2073_v42  ;;  %v1921_v54 = vpop.f32.mrb[31].mxu0  ;;  %v1962_v35 = vpop.f32.mrb[35].mxu1 }
 0x323   : > { %v2082_v0 = vsub.f32 0.0, %v2074_v29  ;;  %v2088_v40 = vsub.f32 0.0, %v2076_v3 }
 0x324   : > { %v2078_v17 = vmul.f32 1.442695, %v2077_v27 }
 0x325   : > { %v2083_v22 = vmul.f32 1.442695, %v2082_v0  ;;  %v2089_v50 = vmul.f32 1.442695, %v2088_v40 }
 0x326   : > { %3787 = vpow2.f32 %v2078_v17 }
 0x327   : > { %3789 = vpow2.f32 %v2083_v22 }
 0x328   : > { %3791 = vpow2.f32 %v2089_v50 }
 0x329   : > { %3793 = vtanh.f32 %v2075_v44 }
 0x330   : > { %v3788_v11 = vpop.eup %3787 }
 0x331   : > { %v3790_v56 = vpop.eup %3789  ;;  %v2080_v45 = vadd.f32 1.0, %v3788_v11  ;;  %v6521_v11 = vld [vmem:[#allocation74_spill] sm:$0xff] }
 0x332   : > { %v2085_v63 = vadd.f32 1.0, %v3790_v56  ;;  %v3792_v28 = vpop.eup %3791  ;;  %v1188_v56 = vld [vmem:[%s6025_s8] sm:$0xf]  ;;  %v6522_v20 = vsub.s32 0, %v6521_v11  ;;  %v6523_v44 = vsub.s32 1, %v6521_v11 }
 0x333   : > { %3795 = vrcp.f32 %v2080_v45  ;;  %v3794_v33 = vpop.eup %3793  ;;  %v2091_v29 = vadd.f32 1.0, %v3792_v28 }
 0x334   : > { %3797 = vrcp.f32 %v2085_v63  ;;  %v5208_v46 = vrot.slane %v1188_v56, %v6522_v20  ;;  %v5212_v27 = vrot.slane %v1188_v56, %v6523_v44  ;;  %v6525_v44 = vsub.s32 2, %v6521_v11 }
 0x335   : > { %3799 = vrcp.f32 %v2091_v29 }
 0x33d   : > { %v3796_v31 = vpop.eup %3795 }
 0x33e   : > { %v3798_v42 = vpop.eup %3797  ;;  %v2094_v35 = vmul.f32 %v3796_v31, %v3794_v33  ;;  %v6524_v33 = vsub.s32 3, %v6521_v11 }
 0x33f   : > { %v2093_v1 = vmul.f32 %v3798_v42, %v6520_v51  ;;  %v3800_v22 = vpop.eup %3799 }
 0x340   : > { %v5218_v31 = vrot.slane %v1188_v56, %v6524_v33 }
 0x341   : > { %v5200_v54 = vadd.f32 %v2094_v35, %v2093_v1 }
 0x343   : > { %3801 = vtanh.f32 %v5200_v54 }
 0x34d   : > { %v3802_v3 = vpop.eup %3801 }
 0x34e   : > { %v2097_v17 = vmul.f32 %v3802_v3, %v3800_v22 }
 0x350   : > { %v2098_v39 = vpack.c.bf16 %v2097_v17, %v2097_v17 }
 0x352   : > { %2099 = vst [vmem:[#allocation2] sm:$0xf] %v2098_v39 }
 0x35f   : > { %v1998_v0 = vpop.f32.mrb[32].mxu0  ;;  %v2039_v40 = vpop.f32.mrb[36].mxu1 }
 0x360   : > { %v2046_v50 = vadd.f32 %v1998_v0, %v5208_v46  ;;  %v2000_v45 = vpop.f32.mrb[33].mxu0  ;;  %v2041_v63 = vpop.f32.mrb[37].mxu1  ;;  %v5223_v0 = vrot.slane %v1188_v56, %v6525_v44 }
 0x361   : > { %v2047_v28 = vadd.f32 %v2000_v45, %v5212_v27  ;;  %v2002_v42 = vpop.f32.mrb[34].mxu0  ;;  %v2043_v35 = vpop.f32.mrb[38].mxu1  ;;  %v2049_v39 = vadd.f32 %v2041_v63, %v5218_v31 }
 0x362   : > { %v2050_v29 = vsub.f32 0.0, %v2046_v50  ;;  %v2003_v51 = vpop.f32.mrb[35].mxu0  ;;  %v2044_v1 = vpop.f32.mrb[39].mxu1  ;;  %v2048_v33 = vadd.f32 %v2039_v40, %v5223_v0 }
 0x363   : > { %v2055_v22 = vsub.f32 0.0, %v2047_v28  ;;  %v2061_v20 = vsub.f32 0.0, %v2049_v39 }
 0x364   : > { %v2051_v3 = vmul.f32 1.442695, %v2050_v29 }
 0x365   : > { %v2056_v17 = vmul.f32 1.442695, %v2055_v22  ;;  %v2062_v45 = vmul.f32 1.442695, %v2061_v20 }
 0x366   : > { %3803 = vpow2.f32 %v2051_v3 }
 0x367   : > { %3805 = vpow2.f32 %v2056_v17 }
 0x368   : > { %3807 = vpow2.f32 %v2062_v45 }
 0x369   : > { %3809 = vtanh.f32 %v2048_v33 }
 0x370   : > { %v3804_v42 = vpop.eup %3803 }
 0x371   : > { %v3806_v35 = vpop.eup %3805  ;;  %v2053_v50 = vadd.f32 1.0, %v3804_v42  ;;  %v6526_v42 = vld [vmem:[#allocation71_spill] sm:$0xff] }
 0x372   : > { %v2058_v28 = vadd.f32 1.0, %v3806_v35  ;;  %v3808_v29 = vpop.eup %3807  ;;  %v6527_v35 = vld [vmem:[#allocation98_spill] sm:$0xff] }
 0x373   : > { %3811 = vrcp.f32 %v2053_v50  ;;  %v3810_v63 = vpop.eup %3809  ;;  %v2064_v3 = vadd.f32 1.0, %v3808_v29  ;;  %v6528_v50 = vld [vmem:[#allocation99_spill] sm:$0xff]  ;;  %v6530_v29 = vld [vmem:[#allocation101_spill] sm:$0xff] }
 0x374   : > { %3813 = vrcp.f32 %v2058_v28  ;;  %v6529_v28 = vld [vmem:[#allocation100_spill] sm:$0xff] }
 0x375   : > { %3815 = vrcp.f32 %v2064_v3  ;;  %v6535_v3 = vld [vmem:[#allocation106_spill] sm:$0xff] }
 0x37d   : > { %v3812_v51 = vpop.eup %3811 }
 0x37e   : > { %v3814_v1 = vpop.eup %3813  ;;  %v2067_v22 = vmul.f32 %v3812_v51, %v3810_v63  ;;  %v6531_v63 = vld [vmem:[#allocation102_spill] sm:$0xff]  ;;  %v6532_v51 = vld [vmem:[#allocation103_spill] sm:$0xff] }
 0x37f   : > { %v2066_v11 = vmul.f32 0.0, %v3814_v1  ;;  %v3816_v40 = vpop.eup %3815  ;;  %v6533_v1 = vld [vmem:[#allocation104_spill] sm:$0xff] }
 0x381   : > { %v5226_v56 = vadd.f32 %v2067_v22, %v2066_v11  ;;  %v6534_v22 = vld [vmem:[#allocation105_spill] sm:$0xff]  ;;  %v6536_v11 = vld [vmem:[#allocation107_spill] sm:$0xff] }
 0x383   : > { %3817 = vtanh.f32 %v5226_v56 }
 0x38d   : > { %v3818_v17 = vpop.eup %3817 }
 0x38e   : > { %v2070_v39 = vmul.f32 %v3818_v17, %v3816_v40  ;;  %v6537_v40 = vld [vmem:[#allocation108_spill] sm:$0xff]  ;;  %v6538_v17 = vld [vmem:[#allocation109_spill] sm:$0xff] }
 0x390   : > { %v2071_v20 = vpack.c.bf16 %v2070_v39, %v2070_v39  ;;  %v6539_v39 = vld [vmem:[#allocation110_spill] sm:$0xff] }
 0x392   : > { %2072 = vst [vmem:[#allocation2 + $0x4] sm:$0xf] %v2071_v20  ;;  %v6540_v20 = vld [vmem:[#allocation111_spill] sm:$0xff] }
 0x399   : > { %v2100_v44 = vld [vmem:[#allocation2] sm:$0xff] }
 0x39a   : > { %v3628_v45 = vcombine.high %v2100_v44, %v2100_v44  ;;  %v5229_v33 = vcombine.low %v2100_v44, %v2100_v44  ;;  %v6541_v44 = vld [vmem:[#allocation112_spill] sm:$0xff] }
 0x39c   : > { %2140 = vmatprep.mubr.bf16.mxu0 %v3628_v45  ;;  %2181 = vmatprep.mubr.bf16.mxu1 %v3628_v45 }
 0x39d   : > { %2141 = vmatmul.mubr.bf16.vlgmr.msra.gmra.mrb[36].mxu0 %v5229_v33  ;;  %2182 = vmatmul.mubr.bf16.vlgmr.msra.gmra.mrb[40].mxu1 %v5229_v33 }
 0x39e   : > { %2191 = vmatpush1.bf16.msra.mxu0 %v4679_v55  ;;  %2232 = vmatpush1.bf16.msra.mxu1 %v6526_v42 }
 0x39f   : > { %2222 = vmatprep.mubr.bf16.mxu0 %v3628_v45  ;;  %2263 = vmatprep.mubr.bf16.mxu1 %v3628_v45  ;;  %v6542_v45 = vld [vmem:[#allocation113_spill] sm:$0xff] }
 0x3a0   : > { %2192 = vmatprep.subr.bf16.mxu0 %v6527_v35  ;;  %2233 = vmatprep.subr.bf16.mxu1 %v6528_v50 }
 0x3a2   : > { %2193 = vmatpush1.bf16.msra.mxu0 %v6529_v28  ;;  %2234 = vmatpush1.bf16.msra.mxu1 %v6530_v29 }
 0x3a3   : > { %2194 = vmatprep.subr.bf16.mxu0 %v6531_v63  ;;  %2235 = vmatprep.subr.bf16.mxu1 %v6532_v51  ;;  %v6543_v51 = vld [vmem:[#allocation114_spill] sm:$0xff] }
 0x3a6   : > { %2195 = vmatpush1.bf16.msra.mxu0 %v6533_v1  ;;  %2236 = vmatpush1.bf16.msra.mxu1 %v6534_v22  ;;  %v6544_v1 = vld [vmem:[#allocation115_spill] sm:$0xff]  ;;  %v6545_v22 = vld [vmem:[#allocation116_spill] sm:$0xff] }
 0x3a7   : > { %2196 = vmatprep.subr.bf16.mxu0 %v6535_v3  ;;  %2237 = vmatprep.subr.bf16.mxu1 %v6536_v11  ;;  %v6546_v3 = vld [vmem:[#allocation117_spill] sm:$0xff]  ;;  %v6547_v11 = vld [vmem:[#allocation118_spill] sm:$0xff] }
 0x3aa   : > { %2197 = vmatpush1.bf16.msra.mxu0 %v6537_v40  ;;  %2238 = vmatpush1.bf16.msra.mxu1 %v6538_v17  ;;  %v6548_v40 = vld [vmem:[#allocation119_spill] sm:$0xff]  ;;  %v6549_v17 = vld [vmem:[#allocation120_spill] sm:$0xff] }
 0x3ab   : > { %2198 = vmatprep.subr.bf16.mxu0 %v6539_v39  ;;  %2239 = vmatprep.subr.bf16.mxu1 %v6540_v20  ;;  %v6550_v39 = vld [vmem:[#allocation121_spill] sm:$0xff]  ;;  %v6551_v20 = vld [vmem:[#allocation122_spill] sm:$0xff] }
 0x3ae   : > { %2199 = vmatpush1.bf16.msra.mxu0 %v6541_v44  ;;  %2240 = vmatpush1.bf16.msra.mxu1 %v6542_v45  ;;  %v6552_v44 = vld [vmem:[#allocation123_spill] sm:$0xff]  ;;  %v6553_v45 = vld [vmem:[#allocation124_spill] sm:$0xff] }
 0x3af   : > { %2200 = vmatprep.subr.bf16.mxu0 %v6543_v51  ;;  %2241 = vmatprep.subr.bf16.mxu1 %v6544_v1  ;;  %v6554_v51 = vld [vmem:[#allocation125_spill] sm:$0xff]  ;;  %v6555_v1 = vld [vmem:[#allocation126_spill] sm:$0xff] }
 0x3b2   : > { %2201 = vmatpush1.bf16.msra.mxu0 %v6545_v22  ;;  %2242 = vmatpush1.bf16.msra.mxu1 %v6546_v3  ;;  %v6556_v22 = vld [vmem:[#allocation127_spill] sm:$0xff]  ;;  %v6557_v3 = vld [vmem:[#allocation128_spill] sm:$0xff] }
 0x3b3   : > { %2202 = vmatprep.subr.bf16.mxu0 %v6547_v11  ;;  %2243 = vmatprep.subr.bf16.mxu1 %v6548_v40  ;;  %v6558_v11 = vld [vmem:[#allocation129_spill] sm:$0xff]  ;;  %v6559_v40 = vld [vmem:[#allocation130_spill] sm:$0xff] }
 0x3b6   : > { %2203 = vmatpush1.bf16.msra.mxu0 %v6549_v17  ;;  %2244 = vmatpush1.bf16.msra.mxu1 %v6550_v39  ;;  %v6560_v17 = vld [vmem:[#allocation131_spill] sm:$0xff]  ;;  %v6561_v39 = vld [vmem:[#allocation132_spill] sm:$0xff] }
 0x3b7   : > { %2204 = vmatprep.subr.bf16.mxu0 %v6551_v20  ;;  %2245 = vmatprep.subr.bf16.mxu1 %v6552_v44  ;;  %v6562_v20 = vld [vmem:[#allocation133_spill] sm:$0xff]  ;;  %v6563_v44 = vld [vmem:[#allocation134_spill] sm:$0xff] }
 0x3ba   : > { %2205 = vmatpush1.bf16.msra.mxu0 %v6553_v45  ;;  %2246 = vmatpush1.bf16.msra.mxu1 %v6554_v51  ;;  %v6564_v45 = vld [vmem:[#allocation135_spill] sm:$0xff]  ;;  %v6565_v51 = vld [vmem:[#allocation136_spill] sm:$0xff] }
 0x3bb   : > { %2206 = vmatprep.subr.bf16.mxu0 %v6555_v1  ;;  %2247 = vmatprep.subr.bf16.mxu1 %v6556_v22  ;;  %v6566_v1 = vld [vmem:[#allocation137_spill] sm:$0xff]  ;;  %v6567_v22 = vld [vmem:[#allocation138_spill] sm:$0xff] }
 0x3be   : > { %2207 = vmatpush1.bf16.msra.mxu0 %v6557_v3  ;;  %2248 = vmatpush1.bf16.msra.mxu1 %v6558_v11  ;;  %v6568_v3 = vld [vmem:[#allocation139_spill] sm:$0xff]  ;;  %v6569_v11 = vld [vmem:[#allocation140_spill] sm:$0xff] }
 0x3bf   : > { %2208 = vmatprep.subr.bf16.mxu0 %v6559_v40  ;;  %2249 = vmatprep.subr.bf16.mxu1 %v6560_v17  ;;  %v6570_v40 = vld [vmem:[#allocation141_spill] sm:$0xff]  ;;  %v6571_v17 = vld [vmem:[#allocation142_spill] sm:$0xff] }
 0x3c2   : > { %2209 = vmatpush1.bf16.msra.mxu0 %v6561_v39  ;;  %2250 = vmatpush1.bf16.msra.mxu1 %v6562_v20  ;;  %v6572_v39 = vld [vmem:[#allocation143_spill] sm:$0xff]  ;;  %v6573_v20 = vld [vmem:[#allocation144_spill] sm:$0xff] }
 0x3c3   : > { %2210 = vmatprep.subr.bf16.mxu0 %v6563_v44  ;;  %2251 = vmatprep.subr.bf16.mxu1 %v6564_v45  ;;  %v6574_v44 = vld [vmem:[#allocation145_spill] sm:$0xff]  ;;  %v6575_v45 = vld [vmem:[#allocation146_spill] sm:$0xff] }
 0x3c6   : > { %2211 = vmatpush1.bf16.msra.mxu0 %v6565_v51  ;;  %2252 = vmatpush1.bf16.msra.mxu1 %v6566_v1  ;;  %v6576_v51 = vld [vmem:[#allocation147_spill] sm:$0xff]  ;;  %v6577_v1 = vld [vmem:[#allocation148_spill] sm:$0xff] }
 0x3c7   : > { %2212 = vmatprep.subr.bf16.mxu0 %v6567_v22  ;;  %2253 = vmatprep.subr.bf16.mxu1 %v6568_v3 }
 0x3ca   : > { %2213 = vmatpush1.bf16.msra.mxu0 %v6569_v11  ;;  %2254 = vmatpush1.bf16.msra.mxu1 %v6570_v40 }
 0x3cb   : > { %2214 = vmatprep.subr.bf16.mxu0 %v6571_v17  ;;  %2255 = vmatprep.subr.bf16.mxu1 %v6572_v39 }
 0x3ce   : > { %2215 = vmatpush1.bf16.msra.mxu0 %v6573_v20  ;;  %2256 = vmatpush1.bf16.msra.mxu1 %v6574_v44 }
 0x3cf   : > { %2216 = vmatprep.subr.bf16.mxu0 %v6575_v45  ;;  %2257 = vmatprep.subr.bf16.mxu1 %v6576_v51 }
 0x3d2   : > { %2217 = vmatpush1.bf16.msra.mxu0 %v6577_v1  ;;  %2258 = vmatpush1.bf16.msra.mxu1 %v5081_v38 }
 0x3d3   : > { %2218 = vmatprep.subr.bf16.mxu0 %v5085_v9  ;;  %2259 = vmatprep.subr.bf16.mxu1 %v5087_v7 }
 0x3d6   : > { %2219 = vmatpush1.bf16.msra.mxu0 %v5103_v52  ;;  %2260 = vmatpush1.bf16.msra.mxu1 %v5105_v8 }
 0x3d7   : > { %2220 = vmatprep.subr.bf16.mxu0 %v5109_v16  ;;  %2261 = vmatprep.subr.bf16.mxu1 %v5111_v13 }
 0x3da   : > { %2221 = vmatpush1.bf16.msra.mxu0 %v5115_v37  ;;  %2262 = vmatpush1.bf16.msra.mxu1 %v5117_v18 }
 0x3db   : > { %2334 = vmatprep.subr.bf16.mxu0 %v4288_v23  ;;  %2375 = vmatprep.subr.bf16.mxu1 %v4293_v24 }
 0x3dd   : > { %2223 = vmatmul.mubr.bf16.vlgmr.msra.gmra.mrb[40].mxu0 %v5229_v33  ;;  %2264 = vmatmul.mubr.bf16.vlgmr.msra.gmra.mrb[44].mxu1 %v5229_v33  ;;  %v6578_v33 = vld [vmem:[#allocation35_spill] sm:$0xff] }
 0x3de   : > { %2335 = vmatpush1.bf16.msra.mxu0 %v4295_v25  ;;  %2376 = vmatpush1.bf16.msra.mxu1 %v4297_v26 }
 0x3df   : > { %2336 = vmatprep.subr.bf16.mxu0 %v4312_v30  ;;  %2377 = vmatprep.subr.bf16.mxu1 %v4317_v32 }
 0x3e2   : > { %2337 = vmatpush1.bf16.msra.mxu0 %v4319_v34  ;;  %2378 = vmatpush1.bf16.msra.mxu1 %v4321_v36 }
 0x3e3   : > { %2338 = vmatprep.subr.bf16.mxu0 %v4336_v41  ;;  %2379 = vmatprep.subr.bf16.mxu1 %v4349_v47 }
 0x3e6   : > { %2339 = vmatpush1.bf16.msra.mxu0 %v4341_v43  ;;  %2380 = vmatpush1.bf16.msra.mxu1 %v4351_v48 }
 0x3e7   : > { %2340 = vmatprep.subr.bf16.mxu0 %v4353_v49  ;;  %2381 = vmatprep.subr.bf16.mxu1 %v4365_v53 }
 0x3ea   : > { %2341 = vmatpush1.bf16.msra.mxu0 %v4378_v57  ;;  %2382 = vmatpush1.bf16.msra.mxu1 %v4382_v58  ;;  %v6621_v58 = vld [vmem:[#allocation90_spill] sm:$0xff] }
 0x3eb   : > { %2342 = vmatprep.subr.bf16.mxu0 %v4384_v59  ;;  %2383 = vmatprep.subr.bf16.mxu1 %v4387_v60  ;;  %v6618_v60 = vld [vmem:[#allocation75_spill] sm:$0xff] }
 0x3ee   : > { %2343 = vmatpush1.bf16.msra.mxu0 %v4390_v61  ;;  %2384 = vmatpush1.bf16.msra.mxu1 %v4394_v62  ;;  %v6617_v61 = vld [vmem:[#allocation89_spill] sm:$0xff] }
 0x3ef   : > { %2344 = vmatprep.subr.bf16.mxu0 %v4408_v2  ;;  %2385 = vmatprep.subr.bf16.mxu1 %v4413_v4  ;;  %v6579_v2 = vld [vmem:[#allocation36_spill] sm:$0xff]  ;;  %v6580_v4 = vld [vmem:[#allocation37_spill] sm:$0xff] }
 0x3f2   : > { %2345 = vmatpush1.bf16.msra.mxu0 %v4415_v5  ;;  %2386 = vmatpush1.bf16.msra.mxu1 %v4417_v6  ;;  %v6581_v5 = vld [vmem:[#allocation38_spill] sm:$0xff]  ;;  %v6582_v6 = vld [vmem:[#allocation39_spill] sm:$0xff] }
 0x3f3   : > { %2346 = vmatprep.subr.bf16.mxu0 %v4432_v10  ;;  %2387 = vmatprep.subr.bf16.mxu1 %v4437_v12  ;;  %v6583_v10 = vld [vmem:[#allocation40_spill] sm:$0xff]  ;;  %v6584_v12 = vld [vmem:[#allocation41_spill] sm:$0xff] }
 0x3f6   : > { %2347 = vmatpush1.bf16.msra.mxu0 %v4439_v14  ;;  %2388 = vmatpush1.bf16.msra.mxu1 %v4441_v15  ;;  %v6585_v14 = vld [vmem:[#allocation42_spill] sm:$0xff]  ;;  %v6586_v15 = vld [vmem:[#allocation43_spill] sm:$0xff] }
 0x3f7   : > { %2348 = vmatprep.subr.bf16.mxu0 %v4456_v19  ;;  %2389 = vmatprep.subr.bf16.mxu1 %v4461_v21  ;;  %v6587_v19 = vld [vmem:[#allocation44_spill] sm:$0xff]  ;;  %v6588_v21 = vld [vmem:[#allocation45_spill] sm:$0xff] }
 0x3fa   : > { %2349 = vmatpush1.bf16.msra.mxu0 %v6578_v33  ;;  %2390 = vmatpush1.bf16.msra.mxu1 %v6579_v2  ;;  %v6589_v33 = vld [vmem:[#allocation46_spill] sm:$0xff]  ;;  %v6590_v2 = vld [vmem:[#allocation47_spill] sm:$0xff] }
 0x3fb   : > { %2350 = vmatprep.subr.bf16.mxu0 %v6580_v4  ;;  %2391 = vmatprep.subr.bf16.mxu1 %v6581_v5  ;;  %v6591_v4 = vld [vmem:[#allocation48_spill] sm:$0xff]  ;;  %v6592_v5 = vld [vmem:[#allocation49_spill] sm:$0xff] }
 0x3fe   : > { %2351 = vmatpush1.bf16.msra.mxu0 %v6582_v6  ;;  %2392 = vmatpush1.bf16.msra.mxu1 %v6583_v10  ;;  %v6593_v6 = vld [vmem:[#allocation50_spill] sm:$0xff]  ;;  %v6594_v10 = vld [vmem:[#allocation51_spill] sm:$0xff] }
 0x3ff   : > { %2352 = vmatprep.subr.bf16.mxu0 %v6584_v12  ;;  %2393 = vmatprep.subr.bf16.mxu1 %v6585_v14  ;;  %v6595_v12 = vld [vmem:[#allocation52_spill] sm:$0xff]  ;;  %v6596_v14 = vld [vmem:[#allocation53_spill] sm:$0xff] }
 0x402   : > { %2353 = vmatpush1.bf16.msra.mxu0 %v6586_v15  ;;  %2394 = vmatpush1.bf16.msra.mxu1 %v6587_v19  ;;  %v6597_v15 = vld [vmem:[#allocation54_spill] sm:$0xff]  ;;  %v6598_v19 = vld [vmem:[#allocation55_spill] sm:$0xff] }
 0x403   : > { %2354 = vmatprep.subr.bf16.mxu0 %v6588_v21  ;;  %2395 = vmatprep.subr.bf16.mxu1 %v6589_v33  ;;  %v6599_v21 = vld [vmem:[#allocation56_spill] sm:$0xff]  ;;  %v6600_v33 = vld [vmem:[#allocation57_spill] sm:$0xff] }
 0x406   : > { %2355 = vmatpush1.bf16.msra.mxu0 %v6590_v2  ;;  %2396 = vmatpush1.bf16.msra.mxu1 %v6591_v4  ;;  %v6601_v2 = vld [vmem:[#allocation58_spill] sm:$0xff]  ;;  %v6602_v4 = vld [vmem:[#allocation59_spill] sm:$0xff] }
 0x407   : > { %2356 = vmatprep.subr.bf16.mxu0 %v6592_v5  ;;  %2397 = vmatprep.subr.bf16.mxu1 %v6593_v6  ;;  %v6603_v5 = vld [vmem:[#allocation60_spill] sm:$0xff]  ;;  %v6604_v6 = vld [vmem:[#allocation61_spill] sm:$0xff] }
 0x40a   : > { %2357 = vmatpush1.bf16.msra.mxu0 %v6594_v10  ;;  %2398 = vmatpush1.bf16.msra.mxu1 %v6595_v12  ;;  %v6605_v10 = vld [vmem:[#allocation62_spill] sm:$0xff]  ;;  %v6606_v12 = vld [vmem:[#allocation63_spill] sm:$0xff] }
 0x40b   : > { %2358 = vmatprep.subr.bf16.mxu0 %v6596_v14  ;;  %2399 = vmatprep.subr.bf16.mxu1 %v6597_v15  ;;  %v6607_v14 = vld [vmem:[#allocation64_spill] sm:$0xff]  ;;  %v6608_v15 = vld [vmem:[#allocation65_spill] sm:$0xff] }
 0x40e   : > { %2359 = vmatpush1.bf16.msra.mxu0 %v6598_v19  ;;  %2400 = vmatpush1.bf16.msra.mxu1 %v6599_v21  ;;  %v6609_v19 = vld [vmem:[#allocation66_spill] sm:$0xff]  ;;  %v6610_v21 = vld [vmem:[#allocation67_spill] sm:$0xff] }
 0x40f   : > { %2360 = vmatprep.subr.bf16.mxu0 %v6600_v33  ;;  %2401 = vmatprep.subr.bf16.mxu1 %v6601_v2  ;;  %v6611_v33 = vld [vmem:[#allocation68_spill] sm:$0xff]  ;;  %v6612_v2 = vld [vmem:[#allocation69_spill] sm:$0xff] }
 0x412   : > { %2361 = vmatpush1.bf16.msra.mxu0 %v6602_v4  ;;  %2402 = vmatpush1.bf16.msra.mxu1 %v6603_v5  ;;  %v6613_v4 = vld [vmem:[#allocation70_spill] sm:$0xff]  ;;  %v6614_v5 = vld [vmem:[#allocation77_spill] sm:$0xff] }
 0x413   : > { %2362 = vmatprep.subr.bf16.mxu0 %v6604_v6  ;;  %2403 = vmatprep.subr.bf16.mxu1 %v6605_v10  ;;  %v6615_v6 = vld [vmem:[#allocation76_spill] sm:$0xff]  ;;  %v6616_v10 = vld [vmem:[#allocation85_spill] sm:$0xff] }
 0x414   : > { %v963_v62 = vadd.f32 %v6615_v6, %v6614_v5 }
 0x416   : > { %2363 = vmatpush1.bf16.msra.mxu0 %v6606_v12  ;;  %2404 = vmatpush1.bf16.msra.mxu1 %v6607_v14  ;;  %v1034_v12 = vadd.f32 %v6617_v61, %v6616_v10  ;;  %v6619_v14 = vld [vmem:[#allocation78_spill] sm:$0xff] }
 0x417   : > { %2364 = vmatprep.subr.bf16.mxu0 %v6608_v15  ;;  %2405 = vmatprep.subr.bf16.mxu1 %v6609_v19  ;;  %v965_v59 = vadd.f32 %v6619_v14, %v6618_v60  ;;  %v6620_v15 = vld [vmem:[#allocation86_spill] sm:$0xff] }
 0x418   : > { %v1036_v19 = vadd.f32 %v6621_v58, %v6620_v15 }
 0x41a   : > { %2365 = vmatpush1.bf16.msra.mxu0 %v6610_v21  ;;  %2406 = vmatpush1.bf16.msra.mxu1 %v6611_v33 }
 0x41b   : > { %2416 = vmatprep.subr.bf16.mxu0 %v6612_v2  ;;  %2457 = vmatprep.subr.bf16.mxu1 %v6613_v4 }
 0x470   : > { %v2142_v57 = vpop.f32.mrb[36].mxu0  ;;  %v2183_v21 = vpop.f32.mrb[40].mxu1 }
 0x471   : > { %v2299_v53 = vadd.f32 %v2142_v57, %v963_v62  ;;  %v2301_v33 = vadd.f32 %v2183_v21, %v1034_v12  ;;  %v2144_v49 = vpop.f32.mrb[37].mxu0  ;;  %v2185_v2 = vpop.f32.mrb[41].mxu1 }
 0x472   : > { %v2300_v48 = vadd.f32 %v2144_v49, %v965_v59  ;;  %v2302_v4 = vadd.f32 %v2185_v2, %v1036_v19  ;;  %v2146_v43 = vpop.f32.mrb[38].mxu0  ;;  %v2187_v47 = vpop.f32.mrb[42].mxu1 }
 0x473   : > { %v2303_v6 = vsub.f32 0.0, %v2299_v53  ;;  %v2147_v5 = vpop.f32.mrb[39].mxu0  ;;  %v2188_v41 = vpop.f32.mrb[43].mxu1 }
 0x474   : > { %v2308_v61 = vsub.f32 0.0, %v2300_v48  ;;  %v2314_v14 = vsub.f32 0.0, %v2302_v4 }
 0x475   : > { %v2304_v10 = vmul.f32 1.442695, %v2303_v6 }
 0x476   : > { %v2309_v36 = vmul.f32 1.442695, %v2308_v61  ;;  %v2315_v58 = vmul.f32 1.442695, %v2314_v14 }
 0x477   : > { %3819 = vpow2.f32 %v2304_v10 }
 0x478   : > { %3821 = vpow2.f32 %v2309_v36 }
 0x479   : > { %3823 = vpow2.f32 %v2315_v58 }
 0x47a   : > { %3825 = vtanh.f32 %v2301_v33 }
 0x481   : > { %v3820_v15 = vpop.eup %3819 }
 0x482   : > { %v3822_v60 = vpop.eup %3821  ;;  %v2306_v57 = vadd.f32 1.0, %v3820_v15 }
 0x483   : > { %v2311_v62 = vadd.f32 1.0, %v3822_v60  ;;  %v3824_v43 = vpop.eup %3823 }
 0x484   : > { %3827 = vrcp.f32 %v2306_v57  ;;  %v3826_v47 = vpop.eup %3825  ;;  %v2317_v48 = vadd.f32 1.0, %v3824_v43 }
 0x485   : > { %3829 = vrcp.f32 %v2311_v62 }
 0x486   : > { %3831 = vrcp.f32 %v2317_v48 }
 0x48e   : > { %v3828_v49 = vpop.eup %3827 }
 0x48f   : > { %v3830_v53 = vpop.eup %3829  ;;  %v2320_v41 = vmul.f32 %v3828_v49, %v3826_v47 }
 0x490   : > { %v2319_v59 = vmul.f32 %v3830_v53, %v5200_v54  ;;  %v3832_v36 = vpop.eup %3831 }
 0x492   : > { %v5372_v2 = vadd.f32 %v2320_v41, %v2319_v59 }
 0x494   : > { %3833 = vtanh.f32 %v5372_v2 }
 0x49e   : > { %v3834_v4 = vpop.eup %3833 }
 0x49f   : > { %v2323_v5 = vmul.f32 %v3834_v4, %v3832_v36 }
 0x4a1   : > { %v2324_v10 = vpack.c.bf16 %v2323_v5, %v2323_v5 }
 0x4a3   : > { %2325 = vst [vmem:[#allocation2] sm:$0xf] %v2324_v10 }
 0x4b0   : > { %v2224_v60 = vpop.f32.mrb[40].mxu0  ;;  %v2265_v12 = vpop.f32.mrb[44].mxu1 }
 0x4b1   : > { %v2272_v15 = vadd.f32 %v2224_v60, %v5208_v46  ;;  %v2226_v19 = vpop.f32.mrb[41].mxu0  ;;  %v2267_v21 = vpop.f32.mrb[45].mxu1  ;;  %v2274_v41 = vadd.f32 %v2265_v12, %v5223_v0 }
 0x4b2   : > { %v2273_v33 = vadd.f32 %v2226_v19, %v5212_v27  ;;  %v2228_v6 = vpop.f32.mrb[42].mxu0  ;;  %v2269_v54 = vpop.f32.mrb[46].mxu1  ;;  %v2275_v47 = vadd.f32 %v2267_v21, %v5218_v31 }
 0x4b3   : > { %v2276_v61 = vsub.f32 0.0, %v2272_v15  ;;  %v2229_v14 = vpop.f32.mrb[43].mxu0  ;;  %v2270_v58 = vpop.f32.mrb[47].mxu1 }
 0x4b4   : > { %v2281_v57 = vsub.f32 0.0, %v2273_v33  ;;  %v2287_v49 = vsub.f32 0.0, %v2275_v47  ;;  %v6624_v47 = vld [vmem:[#allocation105_spill] sm:$0xff] }
 0x4b5   : > { %v2277_v62 = vmul.f32 1.442695, %v2276_v61 }
 0x4b6   : > { %v2282_v43 = vmul.f32 1.442695, %v2281_v57  ;;  %v2288_v53 = vmul.f32 1.442695, %v2287_v49  ;;  %v6625_v49 = vld [vmem:[#allocation106_spill] sm:$0xff] }
 0x4b7   : > { %3835 = vpow2.f32 %v2277_v62 }
 0x4b8   : > { %3837 = vpow2.f32 %v2282_v43  ;;  %v6623_v43 = vld [vmem:[#allocation104_spill] sm:$0xff] }
 0x4b9   : > { %3839 = vpow2.f32 %v2288_v53  ;;  %v6626_v53 = vld [vmem:[#allocation107_spill] sm:$0xff] }
 0x4ba   : > { %3841 = vtanh.f32 %v2274_v41  ;;  %v6627_v41 = vld [vmem:[#allocation108_spill] sm:$0xff] }
 0x4c1   : > { %v3836_v48 = vpop.eup %3835 }
 0x4c2   : > { %v3838_v59 = vpop.eup %3837  ;;  %v2279_v36 = vadd.f32 1.0, %v3836_v48  ;;  %v6628_v48 = vld [vmem:[#allocation109_spill] sm:$0xff] }
 0x4c3   : > { %v2284_v4 = vadd.f32 1.0, %v3838_v59  ;;  %v3840_v5 = vpop.eup %3839  ;;  %v6629_v59 = vld [vmem:[#allocation110_spill] sm:$0xff] }
 0x4c4   : > { %3843 = vrcp.f32 %v2279_v36  ;;  %v3842_v10 = vpop.eup %3841  ;;  %v2290_v21 = vadd.f32 1.0, %v3840_v5  ;;  %v6630_v36 = vld [vmem:[#allocation111_spill] sm:$0xff]  ;;  %v6632_v5 = vld [vmem:[#allocation113_spill] sm:$0xff] }
 0x4c5   : > { %3845 = vrcp.f32 %v2284_v4  ;;  %v6631_v4 = vld [vmem:[#allocation112_spill] sm:$0xff] }
 0x4c6   : > { %3847 = vrcp.f32 %v2290_v21  ;;  %v6637_v21 = vld [vmem:[#allocation118_spill] sm:$0xff] }
 0x4ce   : > { %v3844_v60 = vpop.eup %3843 }
 0x4cf   : > { %v3846_v15 = vpop.eup %3845  ;;  %v2293_v19 = vmul.f32 %v3844_v60, %v3842_v10  ;;  %v6633_v10 = vld [vmem:[#allocation114_spill] sm:$0xff]  ;;  %v6634_v60 = vld [vmem:[#allocation115_spill] sm:$0xff] }
 0x4d0   : > { %v2292_v33 = vmul.f32 %v3846_v15, %v5226_v56  ;;  %v3848_v12 = vpop.eup %3847  ;;  %v6622_v56 = vld [vmem:[#allocation103_spill] sm:$0xff]  ;;  %v6635_v15 = vld [vmem:[#allocation116_spill] sm:$0xff] }
 0x4d2   : > { %v5380_v6 = vadd.f32 %v2293_v19, %v2292_v33  ;;  %v6636_v19 = vld [vmem:[#allocation117_spill] sm:$0xff]  ;;  %v6638_v33 = vld [vmem:[#allocation119_spill] sm:$0xff] }
 0x4d4   : > { %3849 = vtanh.f32 %v5380_v6 }
 0x4de   : > { %v3850_v54 = vpop.eup %3849 }
 0x4df   : > { %v2296_v61 = vmul.f32 %v3850_v54, %v3848_v12  ;;  %v6639_v12 = vld [vmem:[#allocation120_spill] sm:$0xff]  ;;  %v6640_v54 = vld [vmem:[#allocation121_spill] sm:$0xff] }
 0x4e1   : > { %v2297_v14 = vpack.c.bf16 %v2296_v61, %v2296_v61  ;;  %v6641_v61 = vld [vmem:[#allocation122_spill] sm:$0xff] }
 0x4e3   : > { %2298 = vst [vmem:[#allocation2 + $0x4] sm:$0xf] %v2297_v14  ;;  %v6642_v14 = vld [vmem:[#allocation123_spill] sm:$0xff] }
 0x4ea   : > { %v2326_v58 = vld [vmem:[#allocation2] sm:$0xff] }
 0x4eb   : > { %v3630_v57 = vcombine.high %v2326_v58, %v2326_v58  ;;  %v5383_v62 = vcombine.low %v2326_v58, %v2326_v58  ;;  %v6643_v58 = vld [vmem:[#allocation124_spill] sm:$0xff] }
 0x4ed   : > { %2366 = vmatprep.mubr.bf16.mxu0 %v3630_v57  ;;  %2407 = vmatprep.mubr.bf16.mxu1 %v3630_v57 }
 0x4ee   : > { %2367 = vmatmul.mubr.bf16.vlgmr.msra.gmra.mrb[44].mxu0 %v5383_v62  ;;  %2408 = vmatmul.mubr.bf16.vlgmr.msra.gmra.mrb[48].mxu1 %v5383_v62 }
 0x4ef   : > { %2417 = vmatpush1.bf16.msra.mxu0 %v4679_v55  ;;  %2458 = vmatpush1.bf16.msra.mxu1 %v6526_v42 }
 0x4f0   : > { %2448 = vmatprep.mubr.bf16.mxu0 %v3630_v57  ;;  %2489 = vmatprep.mubr.bf16.mxu1 %v3630_v57  ;;  %v6644_v57 = vld [vmem:[#allocation125_spill] sm:$0xff] }
 0x4f1   : > { %2418 = vmatprep.subr.bf16.mxu0 %v6527_v35  ;;  %2459 = vmatprep.subr.bf16.mxu1 %v6528_v50 }
 0x4f3   : > { %2419 = vmatpush1.bf16.msra.mxu0 %v6529_v28  ;;  %2460 = vmatpush1.bf16.msra.mxu1 %v6530_v29 }
 0x4f4   : > { %2420 = vmatprep.subr.bf16.mxu0 %v6531_v63  ;;  %2461 = vmatprep.subr.bf16.mxu1 %v6622_v56 }
 0x4f7   : > { %2421 = vmatpush1.bf16.msra.mxu0 %v6623_v43  ;;  %2462 = vmatpush1.bf16.msra.mxu1 %v6624_v47 }
 0x4f8   : > { %2422 = vmatprep.subr.bf16.mxu0 %v6625_v49  ;;  %2463 = vmatprep.subr.bf16.mxu1 %v6626_v53 }
 0x4fb   : > { %2423 = vmatpush1.bf16.msra.mxu0 %v6627_v41  ;;  %2464 = vmatpush1.bf16.msra.mxu1 %v6628_v48 }
 0x4fc   : > { %2424 = vmatprep.subr.bf16.mxu0 %v6629_v59  ;;  %2465 = vmatprep.subr.bf16.mxu1 %v6630_v36 }
 0x4ff   : > { %2425 = vmatpush1.bf16.msra.mxu0 %v6631_v4  ;;  %2466 = vmatpush1.bf16.msra.mxu1 %v6632_v5 }
 0x500   : > { %2426 = vmatprep.subr.bf16.mxu0 %v6633_v10  ;;  %2467 = vmatprep.subr.bf16.mxu1 %v6634_v60  ;;  %v6645_v60 = vld [vmem:[#allocation126_spill] sm:$0xff] }
 0x503   : > { %2427 = vmatpush1.bf16.msra.mxu0 %v6635_v15  ;;  %2468 = vmatpush1.bf16.msra.mxu1 %v6636_v19  ;;  %v6646_v15 = vld [vmem:[#allocation127_spill] sm:$0xff]  ;;  %v6647_v19 = vld [vmem:[#allocation128_spill] sm:$0xff] }
 0x504   : > { %2428 = vmatprep.subr.bf16.mxu0 %v6637_v21  ;;  %2469 = vmatprep.subr.bf16.mxu1 %v6638_v33  ;;  %v6648_v21 = vld [vmem:[#allocation129_spill] sm:$0xff]  ;;  %v6649_v33 = vld [vmem:[#allocation130_spill] sm:$0xff] }
 0x507   : > { %2429 = vmatpush1.bf16.msra.mxu0 %v6639_v12  ;;  %2470 = vmatpush1.bf16.msra.mxu1 %v6640_v54  ;;  %v6650_v12 = vld [vmem:[#allocation131_spill] sm:$0xff]  ;;  %v6651_v54 = vld [vmem:[#allocation132_spill] sm:$0xff] }
 0x508   : > { %2430 = vmatprep.subr.bf16.mxu0 %v6641_v61  ;;  %2471 = vmatprep.subr.bf16.mxu1 %v6642_v14  ;;  %v6652_v61 = vld [vmem:[#allocation133_spill] sm:$0xff]  ;;  %v6653_v14 = vld [vmem:[#allocation134_spill] sm:$0xff] }
 0x50b   : > { %2431 = vmatpush1.bf16.msra.mxu0 %v6643_v58  ;;  %2472 = vmatpush1.bf16.msra.mxu1 %v6644_v57  ;;  %v6654_v58 = vld [vmem:[#allocation135_spill] sm:$0xff]  ;;  %v6655_v57 = vld [vmem:[#allocation136_spill] sm:$0xff] }
 0x50c   : > { %2432 = vmatprep.subr.bf16.mxu0 %v6645_v60  ;;  %2473 = vmatprep.subr.bf16.mxu1 %v6646_v15  ;;  %v6656_v60 = vld [vmem:[#allocation137_spill] sm:$0xff] }
 0x50f   : > { %2433 = vmatpush1.bf16.msra.mxu0 %v6647_v19  ;;  %2474 = vmatpush1.bf16.msra.mxu1 %v6648_v21 }
 0x510   : > { %2434 = vmatprep.subr.bf16.mxu0 %v6649_v33  ;;  %2475 = vmatprep.subr.bf16.mxu1 %v6650_v12 }
 0x513   : > { %2435 = vmatpush1.bf16.msra.mxu0 %v6651_v54  ;;  %2476 = vmatpush1.bf16.msra.mxu1 %v6652_v61 }
 0x514   : > { %2436 = vmatprep.subr.bf16.mxu0 %v6653_v14  ;;  %2477 = vmatprep.subr.bf16.mxu1 %v6654_v58 }
 0x517   : > { %2437 = vmatpush1.bf16.msra.mxu0 %v6655_v57  ;;  %2478 = vmatpush1.bf16.msra.mxu1 %v6656_v60 }
 0x518   : > { %2438 = vmatprep.subr.bf16.mxu0 %v6567_v22  ;;  %2479 = vmatprep.subr.bf16.mxu1 %v6568_v3 }
 0x51b   : > { %2439 = vmatpush1.bf16.msra.mxu0 %v6569_v11  ;;  %2480 = vmatpush1.bf16.msra.mxu1 %v6570_v40 }
 0x51c   : > { %2440 = vmatprep.subr.bf16.mxu0 %v6571_v17  ;;  %2481 = vmatprep.subr.bf16.mxu1 %v6572_v39 }
 0x51f   : > { %2441 = vmatpush1.bf16.msra.mxu0 %v6573_v20  ;;  %2482 = vmatpush1.bf16.msra.mxu1 %v6574_v44 }
 0x520   : > { %2442 = vmatprep.subr.bf16.mxu0 %v6575_v45  ;;  %2483 = vmatprep.subr.bf16.mxu1 %v6576_v51 }
 0x523   : > { %2443 = vmatpush1.bf16.msra.mxu0 %v6577_v1  ;;  %2484 = vmatpush1.bf16.msra.mxu1 %v5081_v38 }
 0x524   : > { %2444 = vmatprep.subr.bf16.mxu0 %v5085_v9  ;;  %2485 = vmatprep.subr.bf16.mxu1 %v5087_v7  ;;  %v6723_v9 = vld [vmem:[#allocation92_spill] sm:$0xff] }
 0x527   : > { %2445 = vmatpush1.bf16.msra.mxu0 %v5103_v52  ;;  %2486 = vmatpush1.bf16.msra.mxu1 %v5105_v8  ;;  %v6719_v8 = vld [vmem:[#allocation91_spill] sm:$0xff] }
 0x528   : > { %2446 = vmatprep.subr.bf16.mxu0 %v5109_v16  ;;  %2487 = vmatprep.subr.bf16.mxu1 %v5111_v13  ;;  %v6661_v13 = vld [vmem:[#allocation16_spill] sm:$0xff]  ;;  %v6720_v52 = vld [vmem:[#allocation75_spill] sm:$0xff] }
 0x52b   : > { %2447 = vmatpush1.bf16.msra.mxu0 %v5115_v37  ;;  %2488 = vmatpush1.bf16.msra.mxu1 %v5117_v18  ;;  %v6657_v37 = vld [vmem:[#allocation12_spill] sm:$0xff]  ;;  %v6658_v18 = vld [vmem:[#allocation13_spill] sm:$0xff] }
 0x52c   : > { %2560 = vmatprep.subr.bf16.mxu0 %v4288_v23  ;;  %2601 = vmatprep.subr.bf16.mxu1 %v4293_v24  ;;  %v6659_v23 = vld [vmem:[#allocation15_spill] sm:$0xff]  ;;  %v6660_v24 = vld [vmem:[#allocation14_spill] sm:$0xff] }
 0x52e   : > { %2449 = vmatmul.mubr.bf16.vlgmr.msra.gmra.mrb[48].mxu0 %v5383_v62  ;;  %2490 = vmatmul.mubr.bf16.vlgmr.msra.gmra.mrb[52].mxu1 %v5383_v62  ;;  %v6662_v62 = vld [vmem:[#allocation17_spill] sm:$0xff] }
 0x52f   : > { %2561 = vmatpush1.bf16.msra.mxu0 %v4295_v25  ;;  %2602 = vmatpush1.bf16.msra.mxu1 %v4297_v26  ;;  %v6663_v25 = vld [vmem:[#allocation18_spill] sm:$0xff]  ;;  %v6664_v26 = vld [vmem:[#allocation19_spill] sm:$0xff] }
 0x530   : > { %2562 = vmatprep.subr.bf16.mxu0 %v4312_v30  ;;  %2603 = vmatprep.subr.bf16.mxu1 %v4317_v32  ;;  %v6665_v30 = vld [vmem:[#allocation20_spill] sm:$0xff]  ;;  %v6666_v32 = vld [vmem:[#allocation21_spill] sm:$0xff] }
 0x533   : > { %2563 = vmatpush1.bf16.msra.mxu0 %v4319_v34  ;;  %2604 = vmatpush1.bf16.msra.mxu1 %v6657_v37  ;;  %v6667_v34 = vld [vmem:[#allocation22_spill] sm:$0xff]  ;;  %v6668_v37 = vld [vmem:[#allocation23_spill] sm:$0xff] }
 0x534   : > { %2564 = vmatprep.subr.bf16.mxu0 %v6658_v18  ;;  %2605 = vmatprep.subr.bf16.mxu1 %v6659_v23  ;;  %v6669_v18 = vld [vmem:[#allocation24_spill] sm:$0xff]  ;;  %v6670_v23 = vld [vmem:[#allocation25_spill] sm:$0xff] }
 0x537   : > { %2565 = vmatpush1.bf16.msra.mxu0 %v6660_v24  ;;  %2606 = vmatpush1.bf16.msra.mxu1 %v6661_v13  ;;  %v6671_v24 = vld [vmem:[#allocation26_spill] sm:$0xff]  ;;  %v6672_v13 = vld [vmem:[#allocation27_spill] sm:$0xff] }
 0x538   : > { %2566 = vmatprep.subr.bf16.mxu0 %v6662_v62  ;;  %2607 = vmatprep.subr.bf16.mxu1 %v6663_v25  ;;  %v6673_v62 = vld [vmem:[#allocation28_spill] sm:$0xff]  ;;  %v6674_v25 = vld [vmem:[#allocation29_spill] sm:$0xff] }
 0x53b   : > { %2567 = vmatpush1.bf16.msra.mxu0 %v6664_v26  ;;  %2608 = vmatpush1.bf16.msra.mxu1 %v6665_v30  ;;  %v6675_v26 = vld [vmem:[#allocation30_spill] sm:$0xff]  ;;  %v6676_v30 = vld [vmem:[#allocation31_spill] sm:$0xff] }
 0x53c   : > { %2568 = vmatprep.subr.bf16.mxu0 %v6666_v32  ;;  %2609 = vmatprep.subr.bf16.mxu1 %v6667_v34  ;;  %v6677_v32 = vld [vmem:[#allocation32_spill] sm:$0xff]  ;;  %v6678_v34 = vld [vmem:[#allocation33_spill] sm:$0xff] }
 0x53f   : > { %2569 = vmatpush1.bf16.msra.mxu0 %v6668_v37  ;;  %2610 = vmatpush1.bf16.msra.mxu1 %v6669_v18  ;;  %v6679_v37 = vld [vmem:[#allocation34_spill] sm:$0xff]  ;;  %v6680_v18 = vld [vmem:[#allocation35_spill] sm:$0xff] }
 0x540   : > { %2570 = vmatprep.subr.bf16.mxu0 %v6670_v23  ;;  %2611 = vmatprep.subr.bf16.mxu1 %v6671_v24  ;;  %v6681_v23 = vld [vmem:[#allocation36_spill] sm:$0xff]  ;;  %v6682_v24 = vld [vmem:[#allocation37_spill] sm:$0xff] }
 0x543   : > { %2571 = vmatpush1.bf16.msra.mxu0 %v6672_v13  ;;  %2612 = vmatpush1.bf16.msra.mxu1 %v6673_v62  ;;  %v6683_v13 = vld [vmem:[#allocation38_spill] sm:$0xff]  ;;  %v6684_v62 = vld [vmem:[#allocation39_spill] sm:$0xff] }
 0x544   : > { %2572 = vmatprep.subr.bf16.mxu0 %v6674_v25  ;;  %2613 = vmatprep.subr.bf16.mxu1 %v6675_v26  ;;  %v6685_v25 = vld [vmem:[#allocation40_spill] sm:$0xff]  ;;  %v6686_v26 = vld [vmem:[#allocation41_spill] sm:$0xff] }
 0x547   : > { %2573 = vmatpush1.bf16.msra.mxu0 %v6676_v30  ;;  %2614 = vmatpush1.bf16.msra.mxu1 %v6677_v32  ;;  %v6687_v30 = vld [vmem:[#allocation42_spill] sm:$0xff]  ;;  %v6688_v32 = vld [vmem:[#allocation43_spill] sm:$0xff] }
 0x548   : > { %2574 = vmatprep.subr.bf16.mxu0 %v6678_v34  ;;  %2615 = vmatprep.subr.bf16.mxu1 %v6679_v37  ;;  %v6689_v34 = vld [vmem:[#allocation44_spill] sm:$0xff]  ;;  %v6690_v37 = vld [vmem:[#allocation45_spill] sm:$0xff] }
 0x54b   : > { %2575 = vmatpush1.bf16.msra.mxu0 %v6680_v18  ;;  %2616 = vmatpush1.bf16.msra.mxu1 %v6681_v23  ;;  %v6691_v18 = vld [vmem:[#allocation46_spill] sm:$0xff]  ;;  %v6692_v23 = vld [vmem:[#allocation47_spill] sm:$0xff] }
 0x54c   : > { %2576 = vmatprep.subr.bf16.mxu0 %v6682_v24  ;;  %2617 = vmatprep.subr.bf16.mxu1 %v6683_v13  ;;  %v6693_v24 = vld [vmem:[#allocation48_spill] sm:$0xff]  ;;  %v6694_v13 = vld [vmem:[#allocation49_spill] sm:$0xff] }
 0x54f   : > { %2577 = vmatpush1.bf16.msra.mxu0 %v6684_v62  ;;  %2618 = vmatpush1.bf16.msra.mxu1 %v6685_v25  ;;  %v6695_v62 = vld [vmem:[#allocation50_spill] sm:$0xff]  ;;  %v6696_v25 = vld [vmem:[#allocation51_spill] sm:$0xff] }
 0x550   : > { %2578 = vmatprep.subr.bf16.mxu0 %v6686_v26  ;;  %2619 = vmatprep.subr.bf16.mxu1 %v6687_v30  ;;  %v6697_v26 = vld [vmem:[#allocation52_spill] sm:$0xff]  ;;  %v6698_v30 = vld [vmem:[#allocation53_spill] sm:$0xff] }
 0x553   : > { %2579 = vmatpush1.bf16.msra.mxu0 %v6688_v32  ;;  %2620 = vmatpush1.bf16.msra.mxu1 %v6689_v34  ;;  %v6699_v32 = vld [vmem:[#allocation54_spill] sm:$0xff]  ;;  %v6700_v34 = vld [vmem:[#allocation55_spill] sm:$0xff] }
 0x554   : > { %2580 = vmatprep.subr.bf16.mxu0 %v6690_v37  ;;  %2621 = vmatprep.subr.bf16.mxu1 %v6691_v18  ;;  %v6701_v37 = vld [vmem:[#allocation56_spill] sm:$0xff]  ;;  %v6702_v18 = vld [vmem:[#allocation57_spill] sm:$0xff] }
 0x557   : > { %2581 = vmatpush1.bf16.msra.mxu0 %v6692_v23  ;;  %2622 = vmatpush1.bf16.msra.mxu1 %v6693_v24  ;;  %v6703_v23 = vld [vmem:[#allocation58_spill] sm:$0xff]  ;;  %v6704_v24 = vld [vmem:[#allocation59_spill] sm:$0xff] }
 0x558   : > { %2582 = vmatprep.subr.bf16.mxu0 %v6694_v13  ;;  %2623 = vmatprep.subr.bf16.mxu1 %v6695_v62  ;;  %v6705_v13 = vld [vmem:[#allocation60_spill] sm:$0xff]  ;;  %v6706_v62 = vld [vmem:[#allocation61_spill] sm:$0xff] }
 0x55b   : > { %2583 = vmatpush1.bf16.msra.mxu0 %v6696_v25  ;;  %2624 = vmatpush1.bf16.msra.mxu1 %v6697_v26  ;;  %v6707_v25 = vld [vmem:[#allocation62_spill] sm:$0xff]  ;;  %v6708_v26 = vld [vmem:[#allocation63_spill] sm:$0xff] }
 0x55c   : > { %2584 = vmatprep.subr.bf16.mxu0 %v6698_v30  ;;  %2625 = vmatprep.subr.bf16.mxu1 %v6699_v32  ;;  %v6709_v30 = vld [vmem:[#allocation64_spill] sm:$0xff]  ;;  %v6710_v32 = vld [vmem:[#allocation65_spill] sm:$0xff] }
 0x55f   : > { %2585 = vmatpush1.bf16.msra.mxu0 %v6700_v34  ;;  %2626 = vmatpush1.bf16.msra.mxu1 %v6701_v37  ;;  %v6711_v34 = vld [vmem:[#allocation66_spill] sm:$0xff]  ;;  %v6712_v37 = vld [vmem:[#allocation67_spill] sm:$0xff] }
 0x560   : > { %2586 = vmatprep.subr.bf16.mxu0 %v6702_v18  ;;  %2627 = vmatprep.subr.bf16.mxu1 %v6703_v23  ;;  %v6713_v18 = vld [vmem:[#allocation68_spill] sm:$0xff]  ;;  %v6714_v23 = vld [vmem:[#allocation69_spill] sm:$0xff] }
 0x563   : > { %2587 = vmatpush1.bf16.msra.mxu0 %v6704_v24  ;;  %2628 = vmatpush1.bf16.msra.mxu1 %v6705_v13  ;;  %v6715_v24 = vld [vmem:[#allocation70_spill] sm:$0xff]  ;;  %v6716_v13 = vld [vmem:[#allocation77_spill] sm:$0xff] }
 0x564   : > { %2588 = vmatprep.subr.bf16.mxu0 %v6706_v62  ;;  %2629 = vmatprep.subr.bf16.mxu1 %v6707_v25  ;;  %v6717_v62 = vld [vmem:[#allocation79_spill] sm:$0xff]  ;;  %v6718_v25 = vld [vmem:[#allocation85_spill] sm:$0xff] }
 0x565   : > { %v967_v16 = vadd.f32 %v6717_v62, %v6716_v13 }
 0x567   : > { %2589 = vmatpush1.bf16.msra.mxu0 %v6708_v26  ;;  %2630 = vmatpush1.bf16.msra.mxu1 %v6709_v30  ;;  %v1038_v26 = vadd.f32 %v6719_v8, %v6718_v25  ;;  %v6721_v30 = vld [vmem:[#allocation80_spill] sm:$0xff] }
 0x568   : > { %2590 = vmatprep.subr.bf16.mxu0 %v6710_v32  ;;  %2631 = vmatprep.subr.bf16.mxu1 %v6711_v34  ;;  %v969_v7 = vadd.f32 %v6721_v30, %v6720_v52  ;;  %v6722_v32 = vld [vmem:[#allocation86_spill] sm:$0xff] }
 0x569   : > { %v1040_v34 = vadd.f32 %v6723_v9, %v6722_v32 }
 0x56b   : > { %2591 = vmatpush1.bf16.msra.mxu0 %v6712_v37  ;;  %2632 = vmatpush1.bf16.msra.mxu1 %v6713_v18 }
 0x56c   : > { %2642 = vmatprep.subr.bf16.mxu0 %v6714_v23  ;;  %2683 = vmatprep.subr.bf16.mxu1 %v6715_v24 }
 0x5c1   : > { %v2368_v38 = vpop.f32.mrb[44].mxu0  ;;  %v2409_v37 = vpop.f32.mrb[48].mxu1 }
 0x5c2   : > { %v2525_v1 = vadd.f32 %v2368_v38, %v967_v16  ;;  %v2527_v18 = vadd.f32 %v2409_v37, %v1038_v26  ;;  %v2370_v51 = vpop.f32.mrb[45].mxu0  ;;  %v2411_v23 = vpop.f32.mrb[49].mxu1 }
 0x5c3   : > { %v2526_v45 = vadd.f32 %v2370_v51, %v969_v7  ;;  %v2528_v24 = vadd.f32 %v2411_v23, %v1040_v34  ;;  %v2372_v44 = vpop.f32.mrb[46].mxu0  ;;  %v2413_v20 = vpop.f32.mrb[50].mxu1 }
 0x5c4   : > { %v2529_v62 = vsub.f32 0.0, %v2525_v1  ;;  %v2373_v13 = vpop.f32.mrb[47].mxu0  ;;  %v2414_v39 = vpop.f32.mrb[51].mxu1 }
 0x5c5   : > { %v2534_v8 = vsub.f32 0.0, %v2526_v45  ;;  %v2540_v30 = vsub.f32 0.0, %v2528_v24 }
 0x5c6   : > { %v2530_v25 = vmul.f32 1.442695, %v2529_v62 }
 0x5c7   : > { %v2535_v17 = vmul.f32 1.442695, %v2534_v8  ;;  %v2541_v9 = vmul.f32 1.442695, %v2540_v30 }
 0x5c8   : > { %3851 = vpow2.f32 %v2530_v25 }
 0x5c9   : > { %3853 = vpow2.f32 %v2535_v17 }
 0x5ca   : > { %3855 = vpow2.f32 %v2541_v9 }
 0x5cb   : > { %3857 = vtanh.f32 %v2527_v18 }
 0x5d2   : > { %v3852_v32 = vpop.eup %3851 }
 0x5d3   : > { %v3854_v52 = vpop.eup %3853  ;;  %v2532_v16 = vadd.f32 1.0, %v3852_v32 }
 0x5d4   : > { %v2537_v26 = vadd.f32 1.0, %v3854_v52  ;;  %v3856_v23 = vpop.eup %3855 }
 0x5d5   : > { %3859 = vrcp.f32 %v2532_v16  ;;  %v3858_v34 = vpop.eup %3857  ;;  %v2543_v38 = vadd.f32 1.0, %v3856_v23 }
 0x5d6   : > { %3861 = vrcp.f32 %v2537_v26 }
 0x5d7   : > { %3863 = vrcp.f32 %v2543_v38 }
 0x5df   : > { %v3860_v7 = vpop.eup %3859 }
 0x5e0   : > { %v3862_v13 = vpop.eup %3861  ;;  %v2546_v37 = vmul.f32 %v3860_v7, %v3858_v34 }
 0x5e1   : > { %v2545_v51 = vmul.f32 %v3862_v13, %v5372_v2  ;;  %v3864_v24 = vpop.eup %3863 }
 0x5e3   : > { %v5526_v25 = vadd.f32 %v2546_v37, %v2545_v51 }
 0x5e5   : > { %3865 = vtanh.f32 %v5526_v25 }
 0x5ef   : > { %v3866_v32 = vpop.eup %3865 }
 0x5f0   : > { %v2549_v1 = vmul.f32 %v3866_v32, %v3864_v24 }
 0x5f2   : > { %v2550_v18 = vpack.c.bf16 %v2549_v1, %v2549_v1 }
 0x5f4   : > { %2551 = vst [vmem:[#allocation2] sm:$0xf] %v2550_v18 }
 0x601   : > { %v2450_v52 = vpop.f32.mrb[48].mxu0  ;;  %v2491_v17 = vpop.f32.mrb[52].mxu1 }
 0x602   : > { %v2498_v39 = vadd.f32 %v2450_v52, %v5208_v46  ;;  %v2452_v20 = vpop.f32.mrb[49].mxu0  ;;  %v2493_v44 = vpop.f32.mrb[53].mxu1  ;;  %v2500_v37 = vadd.f32 %v2491_v17, %v5223_v0 }
 0x603   : > { %v2499_v45 = vadd.f32 %v2452_v20, %v5212_v27  ;;  %v2454_v62 = vpop.f32.mrb[50].mxu0  ;;  %v2495_v2 = vpop.f32.mrb[54].mxu1  ;;  %v2501_v34 = vadd.f32 %v2493_v44, %v5218_v31 }
 0x604   : > { %v2502_v8 = vsub.f32 0.0, %v2498_v39  ;;  %v2455_v30 = vpop.f32.mrb[51].mxu0  ;;  %v2496_v9 = vpop.f32.mrb[55].mxu1 }
 0x605   : > { %v2507_v16 = vsub.f32 0.0, %v2499_v45  ;;  %v2513_v7 = vsub.f32 0.0, %v2501_v34  ;;  %v6726_v34 = vld [vmem:[#allocation117_spill] sm:$0xff] }
 0x606   : > { %v2503_v26 = vmul.f32 1.442695, %v2502_v8 }
 0x607   : > { %v2508_v23 = vmul.f32 1.442695, %v2507_v16  ;;  %v2514_v13 = vmul.f32 1.442695, %v2513_v7  ;;  %v6727_v7 = vld [vmem:[#allocation118_spill] sm:$0xff] }
 0x608   : > { %3867 = vpow2.f32 %v2503_v26 }
 0x609   : > { %3869 = vpow2.f32 %v2508_v23  ;;  %v6725_v23 = vld [vmem:[#allocation116_spill] sm:$0xff] }
 0x60a   : > { %3871 = vpow2.f32 %v2514_v13  ;;  %v6728_v13 = vld [vmem:[#allocation119_spill] sm:$0xff] }
 0x60b   : > { %3873 = vtanh.f32 %v2500_v37  ;;  %v6729_v37 = vld [vmem:[#allocation120_spill] sm:$0xff] }
 0x612   : > { %v3868_v38 = vpop.eup %3867 }
 0x613   : > { %v3870_v51 = vpop.eup %3869  ;;  %v2505_v24 = vadd.f32 1.0, %v3868_v38  ;;  %v6730_v38 = vld [vmem:[#allocation121_spill] sm:$0xff] }
 0x614   : > { %v2510_v32 = vadd.f32 1.0, %v3870_v51  ;;  %v3872_v1 = vpop.eup %3871  ;;  %v6731_v51 = vld [vmem:[#allocation122_spill] sm:$0xff] }
 0x615   : > { %3875 = vrcp.f32 %v2505_v24  ;;  %v3874_v18 = vpop.eup %3873  ;;  %v2516_v44 = vadd.f32 1.0, %v3872_v1  ;;  %v6732_v24 = vld [vmem:[#allocation123_spill] sm:$0xff]  ;;  %v6734_v1 = vld [vmem:[#allocation125_spill] sm:$0xff] }
 0x616   : > { %3877 = vrcp.f32 %v2510_v32  ;;  %v6733_v32 = vld [vmem:[#allocation124_spill] sm:$0xff] }
 0x617   : > { %3879 = vrcp.f32 %v2516_v44  ;;  %v6739_v44 = vld [vmem:[#allocation145_spill] sm:$0xff] }
 0x61f   : > { %v3876_v52 = vpop.eup %3875 }
 0x620   : > { %v3878_v39 = vpop.eup %3877  ;;  %v2519_v20 = vmul.f32 %v3876_v52, %v3874_v18  ;;  %v6735_v18 = vld [vmem:[#allocation126_spill] sm:$0xff] }
 0x621   : > { %v2518_v45 = vmul.f32 %v3878_v39, %v5380_v6  ;;  %v3880_v17 = vpop.eup %3879  ;;  %v6724_v6 = vld [vmem:[#allocation115_spill] sm:$0xff]  ;;  %v6736_v52 = vld [vmem:[#allocation142_spill] sm:$0xff] }
 0x622   : > { %v6737_v39 = vld [vmem:[#allocation143_spill] sm:$0xff] }
 0x623   : > { %v5534_v62 = vadd.f32 %v2519_v20, %v2518_v45  ;;  %v6738_v20 = vld [vmem:[#allocation144_spill] sm:$0xff]  ;;  %v6740_v45 = vld [vmem:[#allocation146_spill] sm:$0xff] }
 0x625   : > { %3881 = vtanh.f32 %v5534_v62 }
 0x62f   : > { %v3882_v2 = vpop.eup %3881 }
 0x630   : > { %v2522_v8 = vmul.f32 %v3882_v2, %v3880_v17  ;;  %v6741_v17 = vld [vmem:[#allocation147_spill] sm:$0xff]  ;;  %v6742_v2 = vld [vmem:[#allocation148_spill] sm:$0xff] }
 0x632   : > { %v2523_v30 = vpack.c.bf16 %v2522_v8, %v2522_v8  ;;  %v6743_v8 = vld [vmem:[#allocation149_spill] sm:$0xff] }
 0x634   : > { %2524 = vst [vmem:[#allocation2 + $0x4] sm:$0xf] %v2523_v30  ;;  %v6744_v30 = vld [vmem:[#allocation150_spill] sm:$0xff] }
 0x63b   : > { %v2552_v9 = vld [vmem:[#allocation2] sm:$0xff] }
 0x63c   : > { %v3632_v16 = vcombine.high %v2552_v9, %v2552_v9  ;;  %v5537_v26 = vcombine.low %v2552_v9, %v2552_v9  ;;  %v6745_v9 = vld [vmem:[#allocation151_spill] sm:$0xff] }
 0x63e   : > { %2592 = vmatprep.mubr.bf16.mxu0 %v3632_v16  ;;  %2633 = vmatprep.mubr.bf16.mxu1 %v3632_v16 }
 0x63f   : > { %2593 = vmatmul.mubr.bf16.vlgmr.msra.gmra.mrb[52].mxu0 %v5537_v26  ;;  %2634 = vmatmul.mubr.bf16.vlgmr.msra.gmra.mrb[56].mxu1 %v5537_v26 }
 0x640   : > { %2643 = vmatpush1.bf16.msra.mxu0 %v4679_v55  ;;  %2684 = vmatpush1.bf16.msra.mxu1 %v6526_v42 }
 0x641   : > { %2674 = vmatprep.mubr.bf16.mxu0 %v3632_v16  ;;  %2715 = vmatprep.mubr.bf16.mxu1 %v3632_v16  ;;  %v6746_v16 = vld [vmem:[#allocation152_spill] sm:$0xff] }
 0x642   : > { %2644 = vmatprep.subr.bf16.mxu0 %v6527_v35  ;;  %2685 = vmatprep.subr.bf16.mxu1 %v6528_v50 }
 0x644   : > { %2645 = vmatpush1.bf16.msra.mxu0 %v6529_v28  ;;  %2686 = vmatpush1.bf16.msra.mxu1 %v6530_v29 }
 0x645   : > { %2646 = vmatprep.subr.bf16.mxu0 %v6531_v63  ;;  %2687 = vmatprep.subr.bf16.mxu1 %v6622_v56 }
 0x648   : > { %2647 = vmatpush1.bf16.msra.mxu0 %v6623_v43  ;;  %2688 = vmatpush1.bf16.msra.mxu1 %v6624_v47 }
 0x649   : > { %2648 = vmatprep.subr.bf16.mxu0 %v6625_v49  ;;  %2689 = vmatprep.subr.bf16.mxu1 %v6626_v53 }
 0x64c   : > { %2649 = vmatpush1.bf16.msra.mxu0 %v6627_v41  ;;  %2690 = vmatpush1.bf16.msra.mxu1 %v6628_v48 }
 0x64d   : > { %2650 = vmatprep.subr.bf16.mxu0 %v6629_v59  ;;  %2691 = vmatprep.subr.bf16.mxu1 %v6630_v36 }
 0x650   : > { %2651 = vmatpush1.bf16.msra.mxu0 %v6631_v4  ;;  %2692 = vmatpush1.bf16.msra.mxu1 %v6632_v5 }
 0x651   : > { %2652 = vmatprep.subr.bf16.mxu0 %v6633_v10  ;;  %2693 = vmatprep.subr.bf16.mxu1 %v6724_v6 }
 0x654   : > { %2653 = vmatpush1.bf16.msra.mxu0 %v6725_v23  ;;  %2694 = vmatpush1.bf16.msra.mxu1 %v6726_v34 }
 0x655   : > { %2654 = vmatprep.subr.bf16.mxu0 %v6727_v7  ;;  %2695 = vmatprep.subr.bf16.mxu1 %v6728_v13 }
 0x658   : > { %2655 = vmatpush1.bf16.msra.mxu0 %v6729_v37  ;;  %2696 = vmatpush1.bf16.msra.mxu1 %v6730_v38 }
 0x659   : > { %2656 = vmatprep.subr.bf16.mxu0 %v6731_v51  ;;  %2697 = vmatprep.subr.bf16.mxu1 %v6732_v24 }
 0x65c   : > { %2657 = vmatpush1.bf16.msra.mxu0 %v6733_v32  ;;  %2698 = vmatpush1.bf16.msra.mxu1 %v6734_v1 }
 0x65d   : > { %2658 = vmatprep.subr.bf16.mxu0 %v6735_v18  ;;  %2699 = vmatprep.subr.bf16.mxu1 %v6646_v15 }
 0x660   : > { %2659 = vmatpush1.bf16.msra.mxu0 %v6647_v19  ;;  %2700 = vmatpush1.bf16.msra.mxu1 %v6648_v21 }
 0x661   : > { %2660 = vmatprep.subr.bf16.mxu0 %v6649_v33  ;;  %2701 = vmatprep.subr.bf16.mxu1 %v6650_v12 }
 0x664   : > { %2661 = vmatpush1.bf16.msra.mxu0 %v6651_v54  ;;  %2702 = vmatpush1.bf16.msra.mxu1 %v6652_v61 }
 0x665   : > { %2662 = vmatprep.subr.bf16.mxu0 %v6653_v14  ;;  %2703 = vmatprep.subr.bf16.mxu1 %v6654_v58 }
 0x668   : > { %2663 = vmatpush1.bf16.msra.mxu0 %v6655_v57  ;;  %2704 = vmatpush1.bf16.msra.mxu1 %v6656_v60 }
 0x669   : > { %2664 = vmatprep.subr.bf16.mxu0 %v6567_v22  ;;  %2705 = vmatprep.subr.bf16.mxu1 %v6568_v3  ;;  %v6825_v22 = vld [vmem:[#allocation95_spill] sm:$0xff] }
 0x66c   : > { %2665 = vmatpush1.bf16.msra.mxu0 %v6569_v11  ;;  %2706 = vmatpush1.bf16.msra.mxu1 %v6570_v40  ;;  %v6821_v40 = vld [vmem:[#allocation94_spill] sm:$0xff]  ;;  %v6822_v11 = vld [vmem:[#allocation75_spill] sm:$0xff] }
 0x66d   : > { %2666 = vmatprep.subr.bf16.mxu0 %v6736_v52  ;;  %2707 = vmatprep.subr.bf16.mxu1 %v6737_v39  ;;  %v6747_v52 = vld [vmem:[#allocation153_spill] sm:$0xff]  ;;  %v6748_v39 = vld [vmem:[#allocation154_spill] sm:$0xff] }
 0x670   : > { %2667 = vmatpush1.bf16.msra.mxu0 %v6738_v20  ;;  %2708 = vmatpush1.bf16.msra.mxu1 %v6739_v44  ;;  %v6749_v20 = vld [vmem:[#allocation155_spill] sm:$0xff]  ;;  %v6750_v44 = vld [vmem:[#allocation156_spill] sm:$0xff] }
 0x671   : > { %2668 = vmatprep.subr.bf16.mxu0 %v6740_v45  ;;  %2709 = vmatprep.subr.bf16.mxu1 %v6741_v17  ;;  %v6751_v45 = vld [vmem:[#allocation157_spill] sm:$0xff] }
 0x672   : > { %v6752_v17 = vld [vmem:[#allocation5_spill] sm:$0xff] }
 0x674   : > { %2669 = vmatpush1.bf16.msra.mxu0 %v6742_v2  ;;  %2710 = vmatpush1.bf16.msra.mxu1 %v6743_v8  ;;  %v6753_v2 = vld [vmem:[#allocation6_spill] sm:$0xff] }
 0x675   : > { %2670 = vmatprep.subr.bf16.mxu0 %v6744_v30  ;;  %2711 = vmatprep.subr.bf16.mxu1 %v6745_v9  ;;  %v6754_v9 = vld [vmem:[#allocation7_spill] sm:$0xff]  ;;  %v6763_v30 = vld [vmem:[#allocation16_spill] sm:$0xff] }
 0x678   : > { %2671 = vmatpush1.bf16.msra.mxu0 %v6746_v16  ;;  %2712 = vmatpush1.bf16.msra.mxu1 %v6747_v52  ;;  %v6755_v16 = vld [vmem:[#allocation8_spill] sm:$0xff]  ;;  %v6756_v52 = vld [vmem:[#allocation9_spill] sm:$0xff] }
 0x679   : > { %2672 = vmatprep.subr.bf16.mxu0 %v6748_v39  ;;  %2713 = vmatprep.subr.bf16.mxu1 %v6749_v20  ;;  %v6757_v39 = vld [vmem:[#allocation10_spill] sm:$0xff]  ;;  %v6758_v20 = vld [vmem:[#allocation11_spill] sm:$0xff] }
 0x67c   : > { %2673 = vmatpush1.bf16.msra.mxu0 %v6750_v44  ;;  %2714 = vmatpush1.bf16.msra.mxu1 %v6751_v45  ;;  %v6759_v44 = vld [vmem:[#allocation12_spill] sm:$0xff]  ;;  %v6760_v45 = vld [vmem:[#allocation13_spill] sm:$0xff] }
 0x67d   : > { %2786 = vmatprep.subr.bf16.mxu0 %v6752_v17  ;;  %2827 = vmatprep.subr.bf16.mxu1 %v6753_v2  ;;  %v6761_v17 = vld [vmem:[#allocation15_spill] sm:$0xff]  ;;  %v6762_v2 = vld [vmem:[#allocation14_spill] sm:$0xff] }
 0x67f   : > { %2675 = vmatmul.mubr.bf16.vlgmr.msra.gmra.mrb[56].mxu0 %v5537_v26  ;;  %2716 = vmatmul.mubr.bf16.vlgmr.msra.gmra.mrb[60].mxu1 %v5537_v26  ;;  %v6764_v26 = vld [vmem:[#allocation17_spill] sm:$0xff] }
 0x680   : > { %2787 = vmatpush1.bf16.msra.mxu0 %v6754_v9  ;;  %2828 = vmatpush1.bf16.msra.mxu1 %v6755_v16  ;;  %v6765_v9 = vld [vmem:[#allocation18_spill] sm:$0xff]  ;;  %v6766_v16 = vld [vmem:[#allocation19_spill] sm:$0xff] }
 0x681   : > { %2788 = vmatprep.subr.bf16.mxu0 %v6756_v52  ;;  %2829 = vmatprep.subr.bf16.mxu1 %v6757_v39  ;;  %v6767_v52 = vld [vmem:[#allocation20_spill] sm:$0xff]  ;;  %v6768_v39 = vld [vmem:[#allocation21_spill] sm:$0xff] }
 0x684   : > { %2789 = vmatpush1.bf16.msra.mxu0 %v6758_v20  ;;  %2830 = vmatpush1.bf16.msra.mxu1 %v6759_v44  ;;  %v6769_v20 = vld [vmem:[#allocation22_spill] sm:$0xff]  ;;  %v6770_v44 = vld [vmem:[#allocation23_spill] sm:$0xff] }
 0x685   : > { %2790 = vmatprep.subr.bf16.mxu0 %v6760_v45  ;;  %2831 = vmatprep.subr.bf16.mxu1 %v6761_v17  ;;  %v6771_v45 = vld [vmem:[#allocation24_spill] sm:$0xff]  ;;  %v6772_v17 = vld [vmem:[#allocation25_spill] sm:$0xff] }
 0x688   : > { %2791 = vmatpush1.bf16.msra.mxu0 %v6762_v2  ;;  %2832 = vmatpush1.bf16.msra.mxu1 %v6763_v30  ;;  %v6773_v2 = vld [vmem:[#allocation26_spill] sm:$0xff]  ;;  %v6774_v30 = vld [vmem:[#allocation27_spill] sm:$0xff] }
 0x689   : > { %2792 = vmatprep.subr.bf16.mxu0 %v6764_v26  ;;  %2833 = vmatprep.subr.bf16.mxu1 %v6765_v9  ;;  %v6775_v26 = vld [vmem:[#allocation28_spill] sm:$0xff]  ;;  %v6776_v9 = vld [vmem:[#allocation29_spill] sm:$0xff] }
 0x68c   : > { %2793 = vmatpush1.bf16.msra.mxu0 %v6766_v16  ;;  %2834 = vmatpush1.bf16.msra.mxu1 %v6767_v52  ;;  %v6777_v16 = vld [vmem:[#allocation30_spill] sm:$0xff]  ;;  %v6778_v52 = vld [vmem:[#allocation31_spill] sm:$0xff] }
 0x68d   : > { %2794 = vmatprep.subr.bf16.mxu0 %v6768_v39  ;;  %2835 = vmatprep.subr.bf16.mxu1 %v6769_v20  ;;  %v6779_v39 = vld [vmem:[#allocation32_spill] sm:$0xff]  ;;  %v6780_v20 = vld [vmem:[#allocation33_spill] sm:$0xff] }
 0x690   : > { %2795 = vmatpush1.bf16.msra.mxu0 %v6770_v44  ;;  %2836 = vmatpush1.bf16.msra.mxu1 %v6771_v45  ;;  %v6781_v44 = vld [vmem:[#allocation34_spill] sm:$0xff]  ;;  %v6782_v45 = vld [vmem:[#allocation35_spill] sm:$0xff] }
 0x691   : > { %2796 = vmatprep.subr.bf16.mxu0 %v6772_v17  ;;  %2837 = vmatprep.subr.bf16.mxu1 %v6773_v2  ;;  %v6783_v17 = vld [vmem:[#allocation36_spill] sm:$0xff]  ;;  %v6784_v2 = vld [vmem:[#allocation37_spill] sm:$0xff] }
 0x694   : > { %2797 = vmatpush1.bf16.msra.mxu0 %v6774_v30  ;;  %2838 = vmatpush1.bf16.msra.mxu1 %v6775_v26  ;;  %v6785_v30 = vld [vmem:[#allocation38_spill] sm:$0xff]  ;;  %v6786_v26 = vld [vmem:[#allocation39_spill] sm:$0xff] }
 0x695   : > { %2798 = vmatprep.subr.bf16.mxu0 %v6776_v9  ;;  %2839 = vmatprep.subr.bf16.mxu1 %v6777_v16  ;;  %v6787_v9 = vld [vmem:[#allocation40_spill] sm:$0xff]  ;;  %v6788_v16 = vld [vmem:[#allocation41_spill] sm:$0xff] }
 0x698   : > { %2799 = vmatpush1.bf16.msra.mxu0 %v6778_v52  ;;  %2840 = vmatpush1.bf16.msra.mxu1 %v6779_v39  ;;  %v6789_v52 = vld [vmem:[#allocation42_spill] sm:$0xff]  ;;  %v6790_v39 = vld [vmem:[#allocation43_spill] sm:$0xff] }
 0x699   : > { %2800 = vmatprep.subr.bf16.mxu0 %v6780_v20  ;;  %2841 = vmatprep.subr.bf16.mxu1 %v6781_v44  ;;  %v6791_v20 = vld [vmem:[#allocation44_spill] sm:$0xff]  ;;  %v6792_v44 = vld [vmem:[#allocation45_spill] sm:$0xff] }
 0x69c   : > { %2801 = vmatpush1.bf16.msra.mxu0 %v6782_v45  ;;  %2842 = vmatpush1.bf16.msra.mxu1 %v6783_v17  ;;  %v6793_v45 = vld [vmem:[#allocation46_spill] sm:$0xff]  ;;  %v6794_v17 = vld [vmem:[#allocation47_spill] sm:$0xff] }
 0x69d   : > { %2802 = vmatprep.subr.bf16.mxu0 %v6784_v2  ;;  %2843 = vmatprep.subr.bf16.mxu1 %v6785_v30  ;;  %v6795_v2 = vld [vmem:[#allocation48_spill] sm:$0xff]  ;;  %v6796_v30 = vld [vmem:[#allocation49_spill] sm:$0xff] }
 0x6a0   : > { %2803 = vmatpush1.bf16.msra.mxu0 %v6786_v26  ;;  %2844 = vmatpush1.bf16.msra.mxu1 %v6787_v9  ;;  %v6797_v26 = vld [vmem:[#allocation50_spill] sm:$0xff]  ;;  %v6798_v9 = vld [vmem:[#allocation51_spill] sm:$0xff] }
 0x6a1   : > { %2804 = vmatprep.subr.bf16.mxu0 %v6788_v16  ;;  %2845 = vmatprep.subr.bf16.mxu1 %v6789_v52  ;;  %v6799_v16 = vld [vmem:[#allocation52_spill] sm:$0xff]  ;;  %v6800_v52 = vld [vmem:[#allocation53_spill] sm:$0xff] }
 0x6a4   : > { %2805 = vmatpush1.bf16.msra.mxu0 %v6790_v39  ;;  %2846 = vmatpush1.bf16.msra.mxu1 %v6791_v20  ;;  %v6801_v39 = vld [vmem:[#allocation54_spill] sm:$0xff]  ;;  %v6802_v20 = vld [vmem:[#allocation55_spill] sm:$0xff] }
 0x6a5   : > { %2806 = vmatprep.subr.bf16.mxu0 %v6792_v44  ;;  %2847 = vmatprep.subr.bf16.mxu1 %v6793_v45  ;;  %v6803_v44 = vld [vmem:[#allocation56_spill] sm:$0xff]  ;;  %v6804_v45 = vld [vmem:[#allocation57_spill] sm:$0xff] }
 0x6a8   : > { %2807 = vmatpush1.bf16.msra.mxu0 %v6794_v17  ;;  %2848 = vmatpush1.bf16.msra.mxu1 %v6795_v2  ;;  %v6805_v17 = vld [vmem:[#allocation58_spill] sm:$0xff]  ;;  %v6806_v2 = vld [vmem:[#allocation59_spill] sm:$0xff] }
 0x6a9   : > { %2808 = vmatprep.subr.bf16.mxu0 %v6796_v30  ;;  %2849 = vmatprep.subr.bf16.mxu1 %v6797_v26  ;;  %v6807_v30 = vld [vmem:[#allocation60_spill] sm:$0xff]  ;;  %v6808_v26 = vld [vmem:[#allocation61_spill] sm:$0xff] }
 0x6ac   : > { %2809 = vmatpush1.bf16.msra.mxu0 %v6798_v9  ;;  %2850 = vmatpush1.bf16.msra.mxu1 %v6799_v16  ;;  %v6809_v9 = vld [vmem:[#allocation62_spill] sm:$0xff]  ;;  %v6810_v16 = vld [vmem:[#allocation63_spill] sm:$0xff] }
 0x6ad   : > { %2810 = vmatprep.subr.bf16.mxu0 %v6800_v52  ;;  %2851 = vmatprep.subr.bf16.mxu1 %v6801_v39  ;;  %v6811_v52 = vld [vmem:[#allocation64_spill] sm:$0xff]  ;;  %v6812_v39 = vld [vmem:[#allocation65_spill] sm:$0xff] }
 0x6b0   : > { %2811 = vmatpush1.bf16.msra.mxu0 %v6802_v20  ;;  %2852 = vmatpush1.bf16.msra.mxu1 %v6803_v44  ;;  %v6813_v20 = vld [vmem:[#allocation66_spill] sm:$0xff]  ;;  %v6814_v44 = vld [vmem:[#allocation67_spill] sm:$0xff] }
 0x6b1   : > { %2812 = vmatprep.subr.bf16.mxu0 %v6804_v45  ;;  %2853 = vmatprep.subr.bf16.mxu1 %v6805_v17  ;;  %v6815_v45 = vld [vmem:[#allocation68_spill] sm:$0xff]  ;;  %v6816_v17 = vld [vmem:[#allocation69_spill] sm:$0xff] }
 0x6b4   : > { %2813 = vmatpush1.bf16.msra.mxu0 %v6806_v2  ;;  %2854 = vmatpush1.bf16.msra.mxu1 %v6807_v30  ;;  %v6817_v2 = vld [vmem:[#allocation70_spill] sm:$0xff]  ;;  %v6818_v30 = vld [vmem:[#allocation77_spill] sm:$0xff] }
 0x6b5   : > { %2814 = vmatprep.subr.bf16.mxu0 %v6808_v26  ;;  %2855 = vmatprep.subr.bf16.mxu1 %v6809_v9  ;;  %v6819_v26 = vld [vmem:[#allocation81_spill] sm:$0xff] }
 0x6b6   : > { %v973_v8 = vadd.f32 %v6819_v26, %v6818_v30  ;;  %v6820_v9 = vld [vmem:[#allocation85_spill] sm:$0xff] }
 0x6b8   : > { %2815 = vmatpush1.bf16.msra.mxu0 %v6810_v16  ;;  %2856 = vmatpush1.bf16.msra.mxu1 %v6811_v52  ;;  %v1044_v16 = vadd.f32 %v6821_v40, %v6820_v9  ;;  %v6823_v52 = vld [vmem:[#allocation82_spill] sm:$0xff] }
 0x6b9   : > { %2816 = vmatprep.subr.bf16.mxu0 %v6812_v39  ;;  %2857 = vmatprep.subr.bf16.mxu1 %v6813_v20  ;;  %v975_v3 = vadd.f32 %v6823_v52, %v6822_v11  ;;  %v6824_v39 = vld [vmem:[#allocation86_spill] sm:$0xff] }
 0x6ba   : > { %v1046_v20 = vadd.f32 %v6825_v22, %v6824_v39 }
 0x6bc   : > { %2817 = vmatpush1.bf16.msra.mxu0 %v6814_v44  ;;  %2858 = vmatpush1.bf16.msra.mxu1 %v6815_v45 }
 0x6bd   : > { %2868 = vmatprep.subr.bf16.mxu0 %v6816_v17  ;;  %2909 = vmatprep.subr.bf16.mxu1 %v6817_v2 }
 0x712   : > { %v2594_v60 = vpop.f32.mrb[52].mxu0  ;;  %v2635_v44 = vpop.f32.mrb[56].mxu1 }
 0x713   : > { %v2751_v57 = vadd.f32 %v2594_v60, %v973_v8  ;;  %v2753_v45 = vadd.f32 %v2635_v44, %v1044_v16  ;;  %v2596_v58 = vpop.f32.mrb[53].mxu0  ;;  %v2637_v17 = vpop.f32.mrb[57].mxu1 }
 0x714   : > { %v2752_v14 = vadd.f32 %v2596_v58, %v975_v3  ;;  %v2754_v2 = vadd.f32 %v2637_v17, %v1046_v20  ;;  %v2598_v61 = vpop.f32.mrb[54].mxu0  ;;  %v2639_v54 = vpop.f32.mrb[58].mxu1 }
 0x715   : > { %v2755_v26 = vsub.f32 0.0, %v2751_v57  ;;  %v2599_v30 = vpop.f32.mrb[55].mxu0  ;;  %v2640_v12 = vpop.f32.mrb[59].mxu1 }
 0x716   : > { %v2760_v40 = vsub.f32 0.0, %v2752_v14  ;;  %v2766_v52 = vsub.f32 0.0, %v2754_v2 }
 0x717   : > { %v2756_v9 = vmul.f32 1.442695, %v2755_v26 }
 0x718   : > { %v2761_v33 = vmul.f32 1.442695, %v2760_v40  ;;  %v2767_v22 = vmul.f32 1.442695, %v2766_v52 }
 0x719   : > { %3883 = vpow2.f32 %v2756_v9 }
 0x71a   : > { %3885 = vpow2.f32 %v2761_v33 }
 0x71b   : > { %3887 = vpow2.f32 %v2767_v22 }
 0x71c   : > { %3889 = vtanh.f32 %v2753_v45 }
 0x723   : > { %v3884_v39 = vpop.eup %3883 }
 0x724   : > { %v3886_v11 = vpop.eup %3885  ;;  %v2758_v60 = vadd.f32 1.0, %v3884_v39 }
 0x725   : > { %v2763_v44 = vadd.f32 1.0, %v3886_v11  ;;  %v3888_v3 = vpop.eup %3887 }
 0x726   : > { %3891 = vrcp.f32 %v2758_v60  ;;  %v3890_v54 = vpop.eup %3889  ;;  %v2769_v14 = vadd.f32 1.0, %v3888_v3 }
 0x727   : > { %3893 = vrcp.f32 %v2763_v44 }
 0x728   : > { %3895 = vrcp.f32 %v2769_v14 }
 0x730   : > { %v3892_v61 = vpop.eup %3891 }
 0x731   : > { %v3894_v58 = vpop.eup %3893  ;;  %v2772_v12 = vmul.f32 %v3892_v61, %v3890_v54 }
 0x732   : > { %v2771_v57 = vmul.f32 %v3894_v58, %v5526_v25  ;;  %v3896_v33 = vpop.eup %3895 }
 0x734   : > { %v5680_v20 = vadd.f32 %v2772_v12, %v2771_v57 }
 0x736   : > { %3897 = vtanh.f32 %v5680_v20 }
 0x740   : > { %v3898_v39 = vpop.eup %3897 }
 0x741   : > { %v2775_v17 = vmul.f32 %v3898_v39, %v3896_v33 }
 0x743   : > { %v2776_v45 = vpack.c.bf16 %v2775_v17, %v2775_v17 }
 0x745   : > { %2777 = vst [vmem:[#allocation2] sm:$0xf] %v2776_v45 }
 0x752   : > { %v2676_v11 = vpop.f32.mrb[56].mxu0  ;;  %v2717_v2 = vpop.f32.mrb[60].mxu1 }
 0x753   : > { %v2724_v8 = vadd.f32 %v2676_v11, %v5208_v46  ;;  %v2678_v30 = vpop.f32.mrb[57].mxu0  ;;  %v2719_v9 = vpop.f32.mrb[61].mxu1  ;;  %v2726_v12 = vadd.f32 %v2717_v2, %v5223_v0 }
 0x754   : > { %v2725_v16 = vadd.f32 %v2678_v30, %v5212_v27  ;;  %v2680_v26 = vpop.f32.mrb[58].mxu0  ;;  %v2721_v25 = vpop.f32.mrb[62].mxu1  ;;  %v2727_v54 = vadd.f32 %v2719_v9, %v5218_v31 }
 0x755   : > { %v2728_v40 = vsub.f32 0.0, %v2724_v8  ;;  %v2681_v52 = vpop.f32.mrb[59].mxu0  ;;  %v2722_v22 = vpop.f32.mrb[63].mxu1 }
 0x756   : > { %v2733_v60 = vsub.f32 0.0, %v2725_v16  ;;  %v2739_v61 = vsub.f32 0.0, %v2727_v54  ;;  %v6828_v54 = vld [vmem:[#allocation132_spill] sm:$0xff] }
 0x757   : > { %v2729_v44 = vmul.f32 1.442695, %v2728_v40 }
 0x758   : > { %v2734_v3 = vmul.f32 1.442695, %v2733_v60  ;;  %v2740_v58 = vmul.f32 1.442695, %v2739_v61  ;;  %v6829_v61 = vld [vmem:[#allocation133_spill] sm:$0xff] }
 0x759   : > { %3899 = vpow2.f32 %v2729_v44 }
 0x75a   : > { %3901 = vpow2.f32 %v2734_v3  ;;  %v6827_v3 = vld [vmem:[#allocation131_spill] sm:$0xff] }
 0x75b   : > { %3903 = vpow2.f32 %v2740_v58  ;;  %v6830_v58 = vld [vmem:[#allocation134_spill] sm:$0xff] }
 0x75c   : > { %3905 = vtanh.f32 %v2726_v12  ;;  %v6831_v12 = vld [vmem:[#allocation135_spill] sm:$0xff] }
 0x763   : > { %v3900_v14 = vpop.eup %3899 }
 0x764   : > { %v3902_v57 = vpop.eup %3901  ;;  %v2731_v33 = vadd.f32 1.0, %v3900_v14  ;;  %v6832_v14 = vld [vmem:[#allocation136_spill] sm:$0xff] }
 0x765   : > { %v2736_v39 = vadd.f32 1.0, %v3902_v57  ;;  %v3904_v17 = vpop.eup %3903  ;;  %v6833_v57 = vld [vmem:[#allocation137_spill] sm:$0xff] }
 0x766   : > { %3907 = vrcp.f32 %v2731_v33  ;;  %v3906_v45 = vpop.eup %3905  ;;  %v2742_v9 = vadd.f32 1.0, %v3904_v17  ;;  %v6834_v33 = vld [vmem:[#allocation138_spill] sm:$0xff]  ;;  %v6836_v17 = vld [vmem:[#allocation140_spill] sm:$0xff] }
 0x767   : > { %3909 = vrcp.f32 %v2736_v39  ;;  %v6835_v39 = vld [vmem:[#allocation139_spill] sm:$0xff] }
 0x768   : > { %3911 = vrcp.f32 %v2742_v9  ;;  %v6841_v9 = vld [vmem:[#allocation145_spill] sm:$0xff] }
 0x770   : > { %v3908_v11 = vpop.eup %3907 }
 0x771   : > { %v3910_v8 = vpop.eup %3909  ;;  %v2745_v30 = vmul.f32 %v3908_v11, %v3906_v45  ;;  %v6837_v45 = vld [vmem:[#allocation141_spill] sm:$0xff]  ;;  %v6838_v11 = vld [vmem:[#allocation142_spill] sm:$0xff] }
 0x772   : > { %v2744_v16 = vmul.f32 %v3910_v8, %v5534_v62  ;;  %v3912_v2 = vpop.eup %3911  ;;  %v6826_v62 = vld [vmem:[#allocation130_spill] sm:$0xff]  ;;  %v6839_v8 = vld [vmem:[#allocation143_spill] sm:$0xff] }
 0x774   : > { %v5688_v26 = vadd.f32 %v2745_v30, %v2744_v16  ;;  %v6840_v30 = vld [vmem:[#allocation144_spill] sm:$0xff]  ;;  %v6842_v16 = vld [vmem:[#allocation146_spill] sm:$0xff] }
 0x776   : > { %3913 = vtanh.f32 %v5688_v26 }
 0x780   : > { %v3914_v25 = vpop.eup %3913 }
 0x781   : > { %v2748_v40 = vmul.f32 %v3914_v25, %v3912_v2  ;;  %v6843_v2 = vld [vmem:[#allocation147_spill] sm:$0xff]  ;;  %v6844_v25 = vld [vmem:[#allocation148_spill] sm:$0xff] }
 0x783   : > { %v2749_v52 = vpack.c.bf16 %v2748_v40, %v2748_v40  ;;  %v6845_v40 = vld [vmem:[#allocation149_spill] sm:$0xff] }
 0x785   : > { %2750 = vst [vmem:[#allocation2 + $0x4] sm:$0xf] %v2749_v52  ;;  %v6846_v52 = vld [vmem:[#allocation150_spill] sm:$0xff] }
 0x78c   : > { %v2778_v22 = vld [vmem:[#allocation2] sm:$0xff] }
 0x78d   : > { %v3634_v60 = vcombine.high %v2778_v22, %v2778_v22  ;;  %v5691_v44 = vcombine.low %v2778_v22, %v2778_v22  ;;  %v6847_v22 = vld [vmem:[#allocation151_spill] sm:$0xff] }
 0x78f   : > { %2818 = vmatprep.mubr.bf16.mxu0 %v3634_v60  ;;  %2859 = vmatprep.mubr.bf16.mxu1 %v3634_v60 }
 0x790   : > { %2819 = vmatmul.mubr.bf16.vlgmr.msra.gmra.mrb[60].mxu0 %v5691_v44  ;;  %2860 = vmatmul.mubr.bf16.vlgmr.msra.gmra.mrb[64].mxu1 %v5691_v44 }
 0x791   : > { %2869 = vmatpush1.bf16.msra.mxu0 %v4679_v55  ;;  %2910 = vmatpush1.bf16.msra.mxu1 %v6526_v42 }
 0x792   : > { %2900 = vmatprep.mubr.bf16.mxu0 %v3634_v60  ;;  %2941 = vmatprep.mubr.bf16.mxu1 %v3634_v60  ;;  %v6848_v60 = vld [vmem:[#allocation152_spill] sm:$0xff] }
 0x793   : > { %2870 = vmatprep.subr.bf16.mxu0 %v6527_v35  ;;  %2911 = vmatprep.subr.bf16.mxu1 %v6528_v50 }
 0x795   : > { %2871 = vmatpush1.bf16.msra.mxu0 %v6529_v28  ;;  %2912 = vmatpush1.bf16.msra.mxu1 %v6530_v29 }
 0x796   : > { %2872 = vmatprep.subr.bf16.mxu0 %v6531_v63  ;;  %2913 = vmatprep.subr.bf16.mxu1 %v6622_v56 }
 0x799   : > { %2873 = vmatpush1.bf16.msra.mxu0 %v6623_v43  ;;  %2914 = vmatpush1.bf16.msra.mxu1 %v6624_v47 }
 0x79a   : > { %2874 = vmatprep.subr.bf16.mxu0 %v6625_v49  ;;  %2915 = vmatprep.subr.bf16.mxu1 %v6626_v53 }
 0x79d   : > { %2875 = vmatpush1.bf16.msra.mxu0 %v6627_v41  ;;  %2916 = vmatpush1.bf16.msra.mxu1 %v6628_v48 }
 0x79e   : > { %2876 = vmatprep.subr.bf16.mxu0 %v6629_v59  ;;  %2917 = vmatprep.subr.bf16.mxu1 %v6630_v36 }
 0x7a1   : > { %2877 = vmatpush1.bf16.msra.mxu0 %v6631_v4  ;;  %2918 = vmatpush1.bf16.msra.mxu1 %v6632_v5 }
 0x7a2   : > { %2878 = vmatprep.subr.bf16.mxu0 %v6633_v10  ;;  %2919 = vmatprep.subr.bf16.mxu1 %v6724_v6 }
 0x7a5   : > { %2879 = vmatpush1.bf16.msra.mxu0 %v6725_v23  ;;  %2920 = vmatpush1.bf16.msra.mxu1 %v6726_v34 }
 0x7a6   : > { %2880 = vmatprep.subr.bf16.mxu0 %v6727_v7  ;;  %2921 = vmatprep.subr.bf16.mxu1 %v6728_v13 }
 0x7a9   : > { %2881 = vmatpush1.bf16.msra.mxu0 %v6729_v37  ;;  %2922 = vmatpush1.bf16.msra.mxu1 %v6730_v38 }
 0x7aa   : > { %2882 = vmatprep.subr.bf16.mxu0 %v6731_v51  ;;  %2923 = vmatprep.subr.bf16.mxu1 %v6732_v24 }
 0x7ad   : > { %2883 = vmatpush1.bf16.msra.mxu0 %v6733_v32  ;;  %2924 = vmatpush1.bf16.msra.mxu1 %v6734_v1 }
 0x7ae   : > { %2884 = vmatprep.subr.bf16.mxu0 %v6735_v18  ;;  %2925 = vmatprep.subr.bf16.mxu1 %v6646_v15 }
 0x7b1   : > { %2885 = vmatpush1.bf16.msra.mxu0 %v6647_v19  ;;  %2926 = vmatpush1.bf16.msra.mxu1 %v6648_v21 }
 0x7b2   : > { %2886 = vmatprep.subr.bf16.mxu0 %v6826_v62  ;;  %2927 = vmatprep.subr.bf16.mxu1 %v6827_v3 }
 0x7b5   : > { %2887 = vmatpush1.bf16.msra.mxu0 %v6828_v54  ;;  %2928 = vmatpush1.bf16.msra.mxu1 %v6829_v61 }
 0x7b6   : > { %2888 = vmatprep.subr.bf16.mxu0 %v6830_v58  ;;  %2929 = vmatprep.subr.bf16.mxu1 %v6831_v12  ;;  %v6855_v12 = vld [vmem:[#allocation69_spill] sm:$0xff] }
 0x7b9   : > { %2889 = vmatpush1.bf16.msra.mxu0 %v6832_v14  ;;  %2930 = vmatpush1.bf16.msra.mxu1 %v6833_v57  ;;  %v6853_v57 = vld [vmem:[#allocation157_spill] sm:$0xff] }
 0x7ba   : > { %2890 = vmatprep.subr.bf16.mxu0 %v6834_v33  ;;  %2931 = vmatprep.subr.bf16.mxu1 %v6835_v39  ;;  %v6851_v39 = vld [vmem:[#allocation155_spill] sm:$0xff] }
 0x7bd   : > { %2891 = vmatpush1.bf16.msra.mxu0 %v6836_v17  ;;  %2932 = vmatpush1.bf16.msra.mxu1 %v6837_v45  ;;  %v6849_v45 = vld [vmem:[#allocation153_spill] sm:$0xff] }
 0x7be   : > { %2892 = vmatprep.subr.bf16.mxu0 %v6838_v11  ;;  %2933 = vmatprep.subr.bf16.mxu1 %v6839_v8  ;;  %v6850_v8 = vld [vmem:[#allocation154_spill] sm:$0xff] }
 0x7c1   : > { %2893 = vmatpush1.bf16.msra.mxu0 %v6840_v30  ;;  %2934 = vmatpush1.bf16.msra.mxu1 %v6841_v9  ;;  %v6852_v9 = vld [vmem:[#allocation156_spill] sm:$0xff] }
 0x7c2   : > { %2894 = vmatprep.subr.bf16.mxu0 %v6842_v16  ;;  %2935 = vmatprep.subr.bf16.mxu1 %v6843_v2  ;;  %v6854_v2 = vld [vmem:[#allocation5_spill] sm:$0xff] }
 0x7c5   : > { %2895 = vmatpush1.bf16.msra.mxu0 %v6844_v25  ;;  %2936 = vmatpush1.bf16.msra.mxu1 %v6845_v40 }
 0x7c6   : > { %2896 = vmatprep.subr.bf16.mxu0 %v6846_v52  ;;  %2937 = vmatprep.subr.bf16.mxu1 %v6847_v22  ;;  %v6856_v22 = vld [vmem:[#allocation7_spill] sm:$0xff] }
 0x7c9   : > { %2897 = vmatpush1.bf16.msra.mxu0 %v6848_v60  ;;  %2938 = vmatpush1.bf16.msra.mxu1 %v6849_v45  ;;  %v6857_v45 = vld [vmem:[#allocation9_spill] sm:$0xff] }
 0x7ca   : > { %2898 = vmatprep.subr.bf16.mxu0 %v6850_v8  ;;  %2939 = vmatprep.subr.bf16.mxu1 %v6851_v39  ;;  %v6858_v39 = vld [vmem:[#allocation11_spill] sm:$0xff] }
 0x7cd   : > { %2899 = vmatpush1.bf16.msra.mxu0 %v6852_v9  ;;  %2940 = vmatpush1.bf16.msra.mxu1 %v6853_v57  ;;  %v6859_v57 = vld [vmem:[#allocation13_spill] sm:$0xff] }
 0x7ce   : > { %3012 = vmatprep.subr.bf16.mxu1 %v6854_v2  ;;  %3094 = vmatprep.subr.bf16.mxu0 %v6855_v12  ;;  %v6860_v2 = vld [vmem:[#allocation14_spill] sm:$0xff] }
 0x7d0   : > { %2901 = vmatmul.mubr.bf16.vlgmr.msra.gmra.mrb[64].mxu0 %v5691_v44  ;;  %2942 = vmatmul.mubr.bf16.vlgmr.msra.gmra.mrb[68].mxu1 %v5691_v44  ;;  %v6861_v44 = vld [vmem:[#allocation17_spill] sm:$0xff] }
 0x7d1   : > { %3013 = vmatpush1.bf16.msra.mxu1 %v6856_v22  ;;  %3095 = vmatpush1.bf16.msra.mxu0 %v4679_v55  ;;  %v6862_v22 = vld [vmem:[#allocation19_spill] sm:$0xff] }
 0x7d2   : > { %3014 = vmatprep.subr.bf16.mxu1 %v6857_v45  ;;  %3096 = vmatprep.subr.bf16.mxu0 %v6527_v35  ;;  %v6863_v45 = vld [vmem:[#allocation21_spill] sm:$0xff] }
 0x7d5   : > { %3015 = vmatpush1.bf16.msra.mxu1 %v6858_v39  ;;  %3097 = vmatpush1.bf16.msra.mxu0 %v6529_v28  ;;  %v6864_v39 = vld [vmem:[#allocation23_spill] sm:$0xff] }
 0x7d6   : > { %3016 = vmatprep.subr.bf16.mxu1 %v6859_v57  ;;  %3098 = vmatprep.subr.bf16.mxu0 %v6531_v63  ;;  %v6865_v57 = vld [vmem:[#allocation25_spill] sm:$0xff] }
 0x7d9   : > { %3017 = vmatpush1.bf16.msra.mxu1 %v6860_v2  ;;  %3099 = vmatpush1.bf16.msra.mxu0 %v6623_v43  ;;  %v6866_v2 = vld [vmem:[#allocation27_spill] sm:$0xff] }
 0x7da   : > { %3018 = vmatprep.subr.bf16.mxu1 %v6861_v44  ;;  %3100 = vmatprep.subr.bf16.mxu0 %v6625_v49  ;;  %v6867_v44 = vld [vmem:[#allocation29_spill] sm:$0xff] }
 0x7dd   : > { %3019 = vmatpush1.bf16.msra.mxu1 %v6862_v22  ;;  %3101 = vmatpush1.bf16.msra.mxu0 %v6627_v41  ;;  %v6868_v22 = vld [vmem:[#allocation31_spill] sm:$0xff] }
 0x7de   : > { %3020 = vmatprep.subr.bf16.mxu1 %v6863_v45  ;;  %3102 = vmatprep.subr.bf16.mxu0 %v6629_v59  ;;  %v6869_v45 = vld [vmem:[#allocation33_spill] sm:$0xff] }
 0x7e1   : > { %3021 = vmatpush1.bf16.msra.mxu1 %v6864_v39  ;;  %3103 = vmatpush1.bf16.msra.mxu0 %v6631_v4  ;;  %v6870_v39 = vld [vmem:[#allocation35_spill] sm:$0xff] }
 0x7e2   : > { %3022 = vmatprep.subr.bf16.mxu1 %v6865_v57  ;;  %3104 = vmatprep.subr.bf16.mxu0 %v6633_v10  ;;  %v6871_v57 = vld [vmem:[#allocation37_spill] sm:$0xff] }
 0x7e5   : > { %3023 = vmatpush1.bf16.msra.mxu1 %v6866_v2  ;;  %3105 = vmatpush1.bf16.msra.mxu0 %v6725_v23  ;;  %v6872_v2 = vld [vmem:[#allocation39_spill] sm:$0xff] }
 0x7e6   : > { %3024 = vmatprep.subr.bf16.mxu1 %v6867_v44  ;;  %3106 = vmatprep.subr.bf16.mxu0 %v6727_v7  ;;  %v6873_v44 = vld [vmem:[#allocation41_spill] sm:$0xff] }
 0x7e9   : > { %3025 = vmatpush1.bf16.msra.mxu1 %v6868_v22  ;;  %3107 = vmatpush1.bf16.msra.mxu0 %v6729_v37  ;;  %v6874_v22 = vld [vmem:[#allocation43_spill] sm:$0xff] }
 0x7ea   : > { %3026 = vmatprep.subr.bf16.mxu1 %v6869_v45  ;;  %3108 = vmatprep.subr.bf16.mxu0 %v6731_v51  ;;  %v6875_v45 = vld [vmem:[#allocation45_spill] sm:$0xff] }
 0x7ed   : > { %3027 = vmatpush1.bf16.msra.mxu1 %v6870_v39  ;;  %3109 = vmatpush1.bf16.msra.mxu0 %v6733_v32  ;;  %v6876_v39 = vld [vmem:[#allocation47_spill] sm:$0xff] }
 0x7ee   : > { %3028 = vmatprep.subr.bf16.mxu1 %v6871_v57  ;;  %3110 = vmatprep.subr.bf16.mxu0 %v6735_v18  ;;  %v6877_v57 = vld [vmem:[#allocation49_spill] sm:$0xff] }
 0x7f1   : > { %3029 = vmatpush1.bf16.msra.mxu1 %v6872_v2  ;;  %3111 = vmatpush1.bf16.msra.mxu0 %v6647_v19  ;;  %v6878_v2 = vld [vmem:[#allocation51_spill] sm:$0xff] }
 0x7f2   : > { %3030 = vmatprep.subr.bf16.mxu1 %v6873_v44  ;;  %3112 = vmatprep.subr.bf16.mxu0 %v6826_v62  ;;  %v6879_v44 = vld [vmem:[#allocation53_spill] sm:$0xff] }
 0x7f5   : > { %3031 = vmatpush1.bf16.msra.mxu1 %v6874_v22  ;;  %3113 = vmatpush1.bf16.msra.mxu0 %v6828_v54  ;;  %v6880_v22 = vld [vmem:[#allocation55_spill] sm:$0xff] }
 0x7f6   : > { %3032 = vmatprep.subr.bf16.mxu1 %v6875_v45  ;;  %3114 = vmatprep.subr.bf16.mxu0 %v6830_v58  ;;  %v6881_v45 = vld [vmem:[#allocation57_spill] sm:$0xff] }
 0x7f9   : > { %3033 = vmatpush1.bf16.msra.mxu1 %v6876_v39  ;;  %3115 = vmatpush1.bf16.msra.mxu0 %v6832_v14  ;;  %v6882_v39 = vld [vmem:[#allocation59_spill] sm:$0xff] }
 0x7fa   : > { %3034 = vmatprep.subr.bf16.mxu1 %v6877_v57  ;;  %3116 = vmatprep.subr.bf16.mxu0 %v6834_v33  ;;  %v6883_v57 = vld [vmem:[#allocation61_spill] sm:$0xff] }
 0x7fb   : > { %v6896_v33 = vld [vmem:[#allocation97_spill] sm:$0xff] }
 0x7fd   : > { %3035 = vmatpush1.bf16.msra.mxu1 %v6878_v2  ;;  %3117 = vmatpush1.bf16.msra.mxu0 %v6836_v17  ;;  %v6884_v2 = vld [vmem:[#allocation63_spill] sm:$0xff] }
 0x7fe   : > { %3036 = vmatprep.subr.bf16.mxu1 %v6879_v44  ;;  %3118 = vmatprep.subr.bf16.mxu0 %v6838_v11  ;;  %v6885_v44 = vld [vmem:[#allocation65_spill] sm:$0xff]  ;;  %v6893_v11 = vld [vmem:[#allocation75_spill] sm:$0xff] }
 0x801   : > { %3037 = vmatpush1.bf16.msra.mxu1 %v6880_v22  ;;  %3119 = vmatpush1.bf16.msra.mxu0 %v6840_v30  ;;  %v6886_v22 = vld [vmem:[#allocation67_spill] sm:$0xff]  ;;  %v6892_v30 = vld [vmem:[#allocation96_spill] sm:$0xff] }
 0x802   : > { %3038 = vmatprep.subr.bf16.mxu1 %v6881_v45  ;;  %3120 = vmatprep.subr.bf16.mxu0 %v6842_v16  ;;  %v6887_v45 = vld [vmem:[#allocation6_spill] sm:$0xff] }
 0x805   : > { %3039 = vmatpush1.bf16.msra.mxu1 %v6882_v39  ;;  %3121 = vmatpush1.bf16.msra.mxu0 %v6844_v25  ;;  %v6888_v39 = vld [vmem:[#allocation70_spill] sm:$0xff]  ;;  %v6889_v25 = vld [vmem:[#allocation77_spill] sm:$0xff] }
 0x806   : > { %3040 = vmatprep.subr.bf16.mxu1 %v6883_v57  ;;  %3122 = vmatprep.subr.bf16.mxu0 %v6846_v52  ;;  %v6890_v57 = vld [vmem:[#allocation83_spill] sm:$0xff]  ;;  %v6891_v52 = vld [vmem:[#allocation85_spill] sm:$0xff] }
 0x807   : > { %v977_v16 = vadd.f32 %v6890_v57, %v6889_v25 }
 0x809   : > { %3041 = vmatpush1.bf16.msra.mxu1 %v6884_v2  ;;  %3123 = vmatpush1.bf16.msra.mxu0 %v6848_v60  ;;  %v1048_v2 = vadd.f32 %v6892_v30, %v6891_v52  ;;  %v6894_v60 = vld [vmem:[#allocation84_spill] sm:$0xff] }
 0x80a   : > { %3042 = vmatprep.subr.bf16.mxu1 %v6885_v44  ;;  %3124 = vmatprep.subr.bf16.mxu0 %v6850_v8  ;;  %v979_v17 = vadd.f32 %v6894_v60, %v6893_v11  ;;  %v6895_v44 = vld [vmem:[#allocation86_spill] sm:$0xff] }
 0x80b   : > { %v1050_v8 = vadd.f32 %v6896_v33, %v6895_v44 }
 0x80d   : > { %3043 = vmatpush1.bf16.msra.mxu1 %v6886_v22  ;;  %3125 = vmatpush1.bf16.msra.mxu0 %v6852_v9 }
 0x80e   : > { %3053 = vmatprep.subr.bf16.mxu1 %v6887_v45  ;;  %3135 = vmatprep.subr.bf16.mxu0 %v6888_v39 }
 0x863   : > { %v2820_v14 = vpop.f32.mrb[60].mxu0  ;;  %v2861_v22 = vpop.f32.mrb[64].mxu1 }
 0x864   : > { %v2977_v58 = vadd.f32 %v2820_v14, %v977_v16  ;;  %v2979_v9 = vadd.f32 %v2861_v22, %v1048_v2  ;;  %v2822_v54 = vpop.f32.mrb[61].mxu0  ;;  %v2863_v45 = vpop.f32.mrb[65].mxu1 }
 0x865   : > { %v2978_v62 = vadd.f32 %v2822_v54, %v979_v17  ;;  %v2980_v19 = vadd.f32 %v2863_v45, %v1050_v8  ;;  %v2824_v18 = vpop.f32.mrb[62].mxu0  ;;  %v2865_v32 = vpop.f32.mrb[66].mxu1 }
 0x866   : > { %v2981_v57 = vsub.f32 0.0, %v2977_v58  ;;  %v2825_v25 = vpop.f32.mrb[63].mxu0  ;;  %v2866_v51 = vpop.f32.mrb[67].mxu1 }
 0x867   : > { %v2986_v30 = vsub.f32 0.0, %v2978_v62  ;;  %v2992_v60 = vsub.f32 0.0, %v2980_v19 }
 0x868   : > { %v2982_v52 = vmul.f32 1.442695, %v2981_v57 }
 0x869   : > { %v2987_v37 = vmul.f32 1.442695, %v2986_v30  ;;  %v2993_v33 = vmul.f32 1.442695, %v2992_v60 }
 0x86a   : > { %3915 = vpow2.f32 %v2982_v52 }
 0x86b   : > { %3917 = vpow2.f32 %v2987_v37 }
 0x86c   : > { %3919 = vpow2.f32 %v2993_v33 }
 0x86d   : > { %3921 = vtanh.f32 %v2979_v9 }
 0x874   : > { %v3916_v44 = vpop.eup %3915 }
 0x875   : > { %v3918_v11 = vpop.eup %3917  ;;  %v2984_v14 = vadd.f32 1.0, %v3916_v44 }
 0x876   : > { %v2989_v16 = vadd.f32 1.0, %v3918_v11  ;;  %v3920_v18 = vpop.eup %3919 }
 0x877   : > { %3923 = vrcp.f32 %v2984_v14  ;;  %v3922_v32 = vpop.eup %3921  ;;  %v2995_v62 = vadd.f32 1.0, %v3920_v18 }
 0x878   : > { %3925 = vrcp.f32 %v2989_v16 }
 0x879   : > { %3927 = vrcp.f32 %v2995_v62 }
 0x881   : > { %v3924_v54 = vpop.eup %3923 }
 0x882   : > { %v3926_v58 = vpop.eup %3925  ;;  %v2998_v51 = vmul.f32 %v3924_v54, %v3922_v32 }
 0x883   : > { %v2997_v17 = vmul.f32 %v3926_v58, %v5680_v20  ;;  %v3928_v19 = vpop.eup %3927 }
 0x885   : > { %v5834_v8 = vadd.f32 %v2998_v51, %v2997_v17 }
 0x887   : > { %3929 = vtanh.f32 %v5834_v8 }
 0x891   : > { %v3930_v37 = vpop.eup %3929 }
 0x892   : > { %v3001_v25 = vmul.f32 %v3930_v37, %v3928_v19 }
 0x894   : > { %v3002_v9 = vpack.c.bf16 %v3001_v25, %v3001_v25 }
 0x896   : > { %3003 = vst [vmem:[#allocation2] sm:$0xf] %v3002_v9 }
 0x8a3   : > { %v2902_v11 = vpop.f32.mrb[64].mxu0  ;;  %v2943_v52 = vpop.f32.mrb[68].mxu1 }
 0x8a4   : > { %v2950_v2 = vadd.f32 %v2902_v11, %v5208_v46  ;;  %v2904_v44 = vpop.f32.mrb[65].mxu0  ;;  %v2945_v22 = vpop.f32.mrb[69].mxu1  ;;  %v2952_v51 = vadd.f32 %v2943_v52, %v5223_v0 }
 0x8a5   : > { %v2951_v45 = vadd.f32 %v2904_v44, %v5212_v27  ;;  %v2906_v57 = vpop.f32.mrb[66].mxu0  ;;  %v2947_v20 = vpop.f32.mrb[70].mxu1  ;;  %v2953_v32 = vadd.f32 %v2945_v22, %v5218_v31 }
 0x8a6   : > { %v2954_v30 = vsub.f32 0.0, %v2950_v2  ;;  %v2907_v60 = vpop.f32.mrb[67].mxu0  ;;  %v2948_v33 = vpop.f32.mrb[71].mxu1 }
 0x8a7   : > { %v2959_v14 = vsub.f32 0.0, %v2951_v45  ;;  %v2965_v54 = vsub.f32 0.0, %v2953_v32  ;;  %v6899_v32 = vld [vmem:[#allocation12_spill] sm:$0xff] }
 0x8a8   : > { %v2955_v16 = vmul.f32 1.442695, %v2954_v30 }
 0x8a9   : > { %v2960_v18 = vmul.f32 1.442695, %v2959_v14  ;;  %v2966_v58 = vmul.f32 1.442695, %v2965_v54  ;;  %v6900_v54 = vld [vmem:[#allocation15_spill] sm:$0xff] }
 0x8aa   : > { %3931 = vpow2.f32 %v2955_v16 }
 0x8ab   : > { %3933 = vpow2.f32 %v2960_v18  ;;  %v6898_v18 = vld [vmem:[#allocation10_spill] sm:$0xff] }
 0x8ac   : > { %3935 = vpow2.f32 %v2966_v58  ;;  %v6901_v58 = vld [vmem:[#allocation16_spill] sm:$0xff] }
 0x8ad   : > { %3937 = vtanh.f32 %v2952_v51  ;;  %v6902_v51 = vld [vmem:[#allocation18_spill] sm:$0xff] }
 0x8b4   : > { %v3932_v62 = vpop.eup %3931 }
 0x8b5   : > { %v3934_v17 = vpop.eup %3933  ;;  %v2957_v19 = vadd.f32 1.0, %v3932_v62  ;;  %v6903_v62 = vld [vmem:[#allocation20_spill] sm:$0xff] }
 0x8b6   : > { %v2962_v37 = vadd.f32 1.0, %v3934_v17  ;;  %v3936_v25 = vpop.eup %3935  ;;  %v6904_v17 = vld [vmem:[#allocation22_spill] sm:$0xff] }
 0x8b7   : > { %3939 = vrcp.f32 %v2957_v19  ;;  %v3938_v9 = vpop.eup %3937  ;;  %v2968_v22 = vadd.f32 1.0, %v3936_v25  ;;  %v6905_v19 = vld [vmem:[#allocation24_spill] sm:$0xff] }
 0x8b8   : > { %3941 = vrcp.f32 %v2962_v37  ;;  %v6906_v37 = vld [vmem:[#allocation26_spill] sm:$0xff]  ;;  %v6907_v25 = vld [vmem:[#allocation28_spill] sm:$0xff] }
 0x8b9   : > { %3943 = vrcp.f32 %v2968_v22  ;;  %v6912_v22 = vld [vmem:[#allocation38_spill] sm:$0xff] }
 0x8c1   : > { %v3940_v11 = vpop.eup %3939 }
 0x8c2   : > { %v3942_v2 = vpop.eup %3941  ;;  %v2971_v44 = vmul.f32 %v3940_v11, %v3938_v9  ;;  %v6908_v9 = vld [vmem:[#allocation30_spill] sm:$0xff]  ;;  %v6909_v11 = vld [vmem:[#allocation32_spill] sm:$0xff] }
 0x8c3   : > { %v2970_v45 = vmul.f32 %v3942_v2, %v5688_v26  ;;  %v3944_v52 = vpop.eup %3943  ;;  %v6897_v26 = vld [vmem:[#allocation8_spill] sm:$0xff]  ;;  %v6910_v2 = vld [vmem:[#allocation34_spill] sm:$0xff] }
 0x8c5   : > { %v5842_v57 = vadd.f32 %v2971_v44, %v2970_v45  ;;  %v6911_v44 = vld [vmem:[#allocation36_spill] sm:$0xff] }
 0x8c6   : > { %v6913_v45 = vld [vmem:[#allocation40_spill] sm:$0xff] }
 0x8c7   : > { %3945 = vtanh.f32 %v5842_v57 }
 0x8d1   : > { %v3946_v20 = vpop.eup %3945 }
 0x8d2   : > { %v2974_v30 = vmul.f32 %v3946_v20, %v3944_v52  ;;  %v6914_v52 = vld [vmem:[#allocation42_spill] sm:$0xff]  ;;  %v6915_v20 = vld [vmem:[#allocation44_spill] sm:$0xff] }
 0x8d4   : > { %v2975_v60 = vpack.c.bf16 %v2974_v30, %v2974_v30  ;;  %v6916_v30 = vld [vmem:[#allocation46_spill] sm:$0xff] }
 0x8d6   : > { %2976 = vst [vmem:[#allocation2 + $0x4] sm:$0xf] %v2975_v60  ;;  %v6917_v60 = vld [vmem:[#allocation135_spill] sm:$0xff] }
 0x8dd   : > { %v3004_v33 = vld [vmem:[#allocation2] sm:$0xff] }
 0x8de   : > { %v3636_v14 = vcombine.high %v3004_v33, %v3004_v33  ;;  %v5845_v16 = vcombine.low %v3004_v33, %v3004_v33  ;;  %v6918_v33 = vld [vmem:[#allocation48_spill] sm:$0xff] }
 0x8e0   : > { %3044 = vmatprep.mubr.bf16.mxu1 %v3636_v14  ;;  %3126 = vmatprep.mubr.bf16.mxu0 %v3636_v14 }
 0x8e1   : > { %3045 = vmatmul.mubr.bf16.vlgmr.msra.gmra.mrb[12].mxu1 %v5845_v16  ;;  %3127 = vmatmul.mubr.bf16.vlgmr.msra.gmra.mrb[68].mxu0 %v5845_v16 }
 0x8e2   : > { %3054 = vmatpush1.bf16.msra.mxu1 %v6897_v26  ;;  %3136 = vmatpush1.bf16.msra.mxu0 %v6526_v42  ;;  %v6920_v26 = vld [vmem:[#allocation50_spill] sm:$0xff] }
 0x8e3   : > { %3085 = vmatprep.mubr.bf16.mxu1 %v3636_v14  ;;  %3167 = vmatprep.mubr.bf16.mxu0 %v3636_v14  ;;  %v6919_v14 = vld [vmem:[#allocation137_spill] sm:$0xff] }
 0x8e4   : > { %3055 = vmatprep.subr.bf16.mxu1 %v6898_v18  ;;  %3137 = vmatprep.subr.bf16.mxu0 %v6528_v50  ;;  %v6921_v18 = vld [vmem:[#allocation139_spill] sm:$0xff] }
 0x8e6   : > { %3056 = vmatpush1.bf16.msra.mxu1 %v6899_v32  ;;  %3138 = vmatpush1.bf16.msra.mxu0 %v6530_v29  ;;  %v6922_v32 = vld [vmem:[#allocation52_spill] sm:$0xff] }
 0x8e7   : > { %3057 = vmatprep.subr.bf16.mxu1 %v6900_v54  ;;  %3139 = vmatprep.subr.bf16.mxu0 %v6622_v56  ;;  %v6923_v54 = vld [vmem:[#allocation141_spill] sm:$0xff] }
 0x8ea   : > { %3058 = vmatpush1.bf16.msra.mxu1 %v6901_v58  ;;  %3140 = vmatpush1.bf16.msra.mxu0 %v6624_v47  ;;  %v6924_v58 = vld [vmem:[#allocation54_spill] sm:$0xff] }
 0x8eb   : > { %3059 = vmatprep.subr.bf16.mxu1 %v6902_v51  ;;  %3141 = vmatprep.subr.bf16.mxu0 %v6626_v53  ;;  %v6925_v51 = vld [vmem:[#allocation143_spill] sm:$0xff] }
 0x8ee   : > { %3060 = vmatpush1.bf16.msra.mxu1 %v6903_v62  ;;  %3142 = vmatpush1.bf16.msra.mxu0 %v6628_v48  ;;  %v6926_v62 = vld [vmem:[#allocation56_spill] sm:$0xff] }
 0x8ef   : > { %3061 = vmatprep.subr.bf16.mxu1 %v6904_v17  ;;  %3143 = vmatprep.subr.bf16.mxu0 %v6630_v36  ;;  %v6927_v17 = vld [vmem:[#allocation145_spill] sm:$0xff] }
 0x8f2   : > { %3062 = vmatpush1.bf16.msra.mxu1 %v6905_v19  ;;  %3144 = vmatpush1.bf16.msra.mxu0 %v6632_v5  ;;  %v6928_v19 = vld [vmem:[#allocation58_spill] sm:$0xff] }
 0x8f3   : > { %3063 = vmatprep.subr.bf16.mxu1 %v6906_v37  ;;  %3145 = vmatprep.subr.bf16.mxu0 %v6724_v6  ;;  %v6929_v37 = vld [vmem:[#allocation147_spill] sm:$0xff] }
 0x8f6   : > { %3064 = vmatpush1.bf16.msra.mxu1 %v6907_v25  ;;  %3146 = vmatpush1.bf16.msra.mxu0 %v6726_v34  ;;  %v6930_v25 = vld [vmem:[#allocation60_spill] sm:$0xff] }
 0x8f7   : > { %3065 = vmatprep.subr.bf16.mxu1 %v6908_v9  ;;  %3147 = vmatprep.subr.bf16.mxu0 %v6728_v13  ;;  %v6931_v9 = vld [vmem:[#allocation62_spill] sm:$0xff] }
 0x8fa   : > { %3066 = vmatpush1.bf16.msra.mxu1 %v6909_v11  ;;  %3148 = vmatpush1.bf16.msra.mxu0 %v6730_v38  ;;  %v6932_v11 = vld [vmem:[#allocation151_spill] sm:$0xff] }
 0x8fb   : > { %3067 = vmatprep.subr.bf16.mxu1 %v6910_v2  ;;  %3149 = vmatprep.subr.bf16.mxu0 %v6732_v24  ;;  %v6933_v2 = vld [vmem:[#allocation64_spill] sm:$0xff] }
 0x8fe   : > { %3068 = vmatpush1.bf16.msra.mxu1 %v6911_v44  ;;  %3150 = vmatpush1.bf16.msra.mxu0 %v6734_v1  ;;  %v6934_v44 = vld [vmem:[#allocation153_spill] sm:$0xff] }
 0x8ff   : > { %3069 = vmatprep.subr.bf16.mxu1 %v6912_v22  ;;  %3151 = vmatprep.subr.bf16.mxu0 %v6646_v15  ;;  %v6935_v22 = vld [vmem:[#allocation66_spill] sm:$0xff] }
 0x902   : > { %3070 = vmatpush1.bf16.msra.mxu1 %v6913_v45  ;;  %3152 = vmatpush1.bf16.msra.mxu0 %v6648_v21  ;;  %v6936_v45 = vld [vmem:[#allocation155_spill] sm:$0xff] }
 0x903   : > { %3071 = vmatprep.subr.bf16.mxu1 %v6914_v52  ;;  %3153 = vmatprep.subr.bf16.mxu0 %v6827_v3  ;;  %v6937_v52 = vld [vmem:[#allocation68_spill] sm:$0xff] }
 0x906   : > { %3072 = vmatpush1.bf16.msra.mxu1 %v6915_v20  ;;  %3154 = vmatpush1.bf16.msra.mxu0 %v6829_v61  ;;  %v6938_v20 = vld [vmem:[#allocation157_spill] sm:$0xff] }
 0x907   : > { %3073 = vmatprep.subr.bf16.mxu1 %v6916_v30  ;;  %3155 = vmatprep.subr.bf16.mxu0 %v6917_v60 }
 0x90a   : > { %3074 = vmatpush1.bf16.msra.mxu1 %v6918_v33  ;;  %3156 = vmatpush1.bf16.msra.mxu0 %v6919_v14 }
 0x90b   : > { %3075 = vmatprep.subr.bf16.mxu1 %v6920_v26  ;;  %3157 = vmatprep.subr.bf16.mxu0 %v6921_v18 }
 0x90e   : > { %3076 = vmatpush1.bf16.msra.mxu1 %v6922_v32  ;;  %3158 = vmatpush1.bf16.msra.mxu0 %v6923_v54 }
 0x90f   : > { %3077 = vmatprep.subr.bf16.mxu1 %v6924_v58  ;;  %3159 = vmatprep.subr.bf16.mxu0 %v6925_v51 }
 0x912   : > { %3078 = vmatpush1.bf16.msra.mxu1 %v6926_v62  ;;  %3160 = vmatpush1.bf16.msra.mxu0 %v6927_v17 }
 0x913   : > { %3079 = vmatprep.subr.bf16.mxu1 %v6928_v19  ;;  %3161 = vmatprep.subr.bf16.mxu0 %v6929_v37 }
 0x916   : > { %3080 = vmatpush1.bf16.msra.mxu1 %v6930_v25  ;;  %3162 = vmatpush1.bf16.msra.mxu0 %v6845_v40 }
 0x917   : > { %3081 = vmatprep.subr.bf16.mxu1 %v6931_v9  ;;  %3163 = vmatprep.subr.bf16.mxu0 %v6932_v11 }
 0x91a   : > { %3082 = vmatpush1.bf16.msra.mxu1 %v6933_v2  ;;  %3164 = vmatpush1.bf16.msra.mxu0 %v6934_v44 }
 0x91b   : > { %3083 = vmatprep.subr.bf16.mxu1 %v6935_v22  ;;  %3165 = vmatprep.subr.bf16.mxu0 %v6936_v45 }
 0x91e   : > { %3084 = vmatpush1.bf16.msra.mxu1 %v6937_v52  ;;  %3166 = vmatpush1.bf16.msra.mxu0 %v6938_v20  ;;  %v6961_v52 = vld [vmem:[#allocation86_spill] sm:$0xff] }
 0x91f   : > { %3238 = vmatprep.subr.bf16.mxu0 %v6855_v12  ;;  %3279 = vmatprep.subr.bf16.mxu1 %v6888_v39 }
 0x921   : > { %3086 = vmatmul.mubr.bf16.vlgmr.msra.gmra.mrb[28].mxu1 %v5845_v16  ;;  %3168 = vmatmul.mubr.bf16.vlgmr.msra.gmra.mrb[72].mxu0 %v5845_v16 }
 0x922   : > { %3239 = vmatpush1.bf16.msra.mxu0 %v4679_v55  ;;  %3280 = vmatpush1.bf16.msra.mxu1 %v6526_v42  ;;  %v6939_v55 = vld [vmem:[#allocation120_spill] sm:$0xff]  ;;  %v6940_v42 = vld [vmem:[#allocation122_spill] sm:$0xff] }
 0x923   : > { %3240 = vmatprep.subr.bf16.mxu0 %v6527_v35  ;;  %3281 = vmatprep.subr.bf16.mxu1 %v6528_v50  ;;  %v6941_v35 = vld [vmem:[#allocation124_spill] sm:$0xff]  ;;  %v6942_v50 = vld [vmem:[#allocation126_spill] sm:$0xff] }
 0x926   : > { %3241 = vmatpush1.bf16.msra.mxu0 %v6529_v28  ;;  %3282 = vmatpush1.bf16.msra.mxu1 %v6530_v29  ;;  %v6943_v28 = vld [vmem:[#allocation128_spill] sm:$0xff]  ;;  %v6944_v29 = vld [vmem:[#allocation130_spill] sm:$0xff] }
 0x927   : > { %3242 = vmatprep.subr.bf16.mxu0 %v6531_v63  ;;  %3283 = vmatprep.subr.bf16.mxu1 %v6622_v56  ;;  %v6945_v63 = vld [vmem:[#allocation132_spill] sm:$0xff]  ;;  %v6946_v56 = vld [vmem:[#allocation134_spill] sm:$0xff] }
 0x92a   : > { %3243 = vmatpush1.bf16.msra.mxu0 %v6623_v43  ;;  %3284 = vmatpush1.bf16.msra.mxu1 %v6624_v47  ;;  %v6947_v43 = vld [vmem:[#allocation136_spill] sm:$0xff]  ;;  %v6948_v47 = vld [vmem:[#allocation138_spill] sm:$0xff] }
 0x92b   : > { %3244 = vmatprep.subr.bf16.mxu0 %v6625_v49  ;;  %3285 = vmatprep.subr.bf16.mxu1 %v6626_v53  ;;  %v6949_v49 = vld [vmem:[#allocation140_spill] sm:$0xff]  ;;  %v6950_v53 = vld [vmem:[#allocation142_spill] sm:$0xff] }
 0x92e   : > { %3245 = vmatpush1.bf16.msra.mxu0 %v6627_v41  ;;  %3286 = vmatpush1.bf16.msra.mxu1 %v6628_v48  ;;  %v6951_v41 = vld [vmem:[#allocation144_spill] sm:$0xff]  ;;  %v6952_v48 = vld [vmem:[#allocation146_spill] sm:$0xff] }
 0x92f   : > { %3246 = vmatprep.subr.bf16.mxu0 %v6629_v59  ;;  %3287 = vmatprep.subr.bf16.mxu1 %v6630_v36  ;;  %v6953_v59 = vld [vmem:[#allocation148_spill] sm:$0xff]  ;;  %v6954_v36 = vld [vmem:[#allocation150_spill] sm:$0xff] }
 0x932   : > { %3247 = vmatpush1.bf16.msra.mxu0 %v6631_v4  ;;  %3288 = vmatpush1.bf16.msra.mxu1 %v6632_v5  ;;  %v6955_v4 = vld [vmem:[#allocation152_spill] sm:$0xff]  ;;  %v6956_v5 = vld [vmem:[#allocation154_spill] sm:$0xff] }
 0x933   : > { %3248 = vmatprep.subr.bf16.mxu0 %v6633_v10  ;;  %3289 = vmatprep.subr.bf16.mxu1 %v6724_v6  ;;  %v6957_v10 = vld [vmem:[#allocation156_spill] sm:$0xff] }
 0x936   : > { %3249 = vmatpush1.bf16.msra.mxu0 %v6725_v23  ;;  %3290 = vmatpush1.bf16.msra.mxu1 %v6726_v34 }
 0x937   : > { %3250 = vmatprep.subr.bf16.mxu0 %v6727_v7  ;;  %3291 = vmatprep.subr.bf16.mxu1 %v6728_v13 }
 0x93a   : > { %3251 = vmatpush1.bf16.msra.mxu0 %v6939_v55  ;;  %3292 = vmatpush1.bf16.msra.mxu1 %v6730_v38 }
 0x93b   : > { %3252 = vmatprep.subr.bf16.mxu0 %v6940_v42  ;;  %3293 = vmatprep.subr.bf16.mxu1 %v6732_v24  ;;  %v6958_v24 = vld [vmem:[#allocation77_spill] sm:$0xff] }
 0x93e   : > { %3253 = vmatpush1.bf16.msra.mxu0 %v6941_v35  ;;  %3294 = vmatpush1.bf16.msra.mxu1 %v6734_v1 }
 0x93f   : > { %3254 = vmatprep.subr.bf16.mxu0 %v6942_v50  ;;  %3295 = vmatprep.subr.bf16.mxu1 %v6646_v15 }
 0x942   : > { %3255 = vmatpush1.bf16.msra.mxu0 %v6943_v28  ;;  %3296 = vmatpush1.bf16.msra.mxu1 %v6648_v21 }
 0x943   : > { %3256 = vmatprep.subr.bf16.mxu0 %v6944_v29  ;;  %3297 = vmatprep.subr.bf16.mxu1 %v6827_v3 }
 0x946   : > { %3257 = vmatpush1.bf16.msra.mxu0 %v6945_v63  ;;  %3298 = vmatpush1.bf16.msra.mxu1 %v6829_v61  ;;  %v6959_v61 = vld [vmem:[#allocation75_spill] sm:$0xff] }
 0x947   : > { %3258 = vmatprep.subr.bf16.mxu0 %v6946_v56  ;;  %3299 = vmatprep.subr.bf16.mxu1 %v6917_v60 }
 0x94a   : > { %3259 = vmatpush1.bf16.msra.mxu0 %v6947_v43  ;;  %3300 = vmatpush1.bf16.msra.mxu1 %v6919_v14 }
 0x94b   : > { %3260 = vmatprep.subr.bf16.mxu0 %v6948_v47  ;;  %3301 = vmatprep.subr.bf16.mxu1 %v6921_v18 }
 0x94e   : > { %3261 = vmatpush1.bf16.msra.mxu0 %v6949_v49  ;;  %3302 = vmatpush1.bf16.msra.mxu1 %v6923_v54 }
 0x94f   : > { %3262 = vmatprep.subr.bf16.mxu0 %v6950_v53  ;;  %3303 = vmatprep.subr.bf16.mxu1 %v6925_v51 }
 0x952   : > { %3263 = vmatpush1.bf16.msra.mxu0 %v6951_v41  ;;  %3304 = vmatpush1.bf16.msra.mxu1 %v6927_v17 }
 0x953   : > { %3264 = vmatprep.subr.bf16.mxu0 %v6952_v48  ;;  %3305 = vmatprep.subr.bf16.mxu1 %v6929_v37 }
 0x956   : > { %3265 = vmatpush1.bf16.msra.mxu0 %v6953_v59  ;;  %3306 = vmatpush1.bf16.msra.mxu1 %v6845_v40 }
 0x957   : > { %3266 = vmatprep.subr.bf16.mxu0 %v6954_v36  ;;  %3307 = vmatprep.subr.bf16.mxu1 %v6932_v11  ;;  %v6960_v11 = vld [vmem:[#allocation85_spill] sm:$0xff] }
 0x95a   : > { %3267 = vmatpush1.bf16.msra.mxu0 %v6955_v4  ;;  %3308 = vmatpush1.bf16.msra.mxu1 %v6934_v44 }
 0x95b   : > { %3268 = vmatprep.subr.bf16.mxu0 %v6956_v5  ;;  %3309 = vmatprep.subr.bf16.mxu1 %v6936_v45 }
 0x95e   : > { %3269 = vmatpush1.bf16.msra.mxu0 %v6957_v10  ;;  %3310 = vmatpush1.bf16.msra.mxu1 %v6938_v20 }
 0x9b4   : > { %v3046_v15 = vpop.f32.mrb[12].mxu1  ;;  %v3128_v21 = vpop.f32.mrb[68].mxu0 }
 0x9b5   : > { %v3048_v6 = vpop.f32.mrb[13].mxu1  ;;  %v3130_v23 = vpop.f32.mrb[69].mxu0  ;;  %v3684_v1 = vadd.f32 %v3046_v15, %v6958_v24  ;;  %v3176_v3 = vadd.f32 %v3128_v21, %v5208_v46 }
 0x9b6   : > { %v3050_v34 = vpop.f32.mrb[14].mxu1  ;;  %v3132_v7 = vpop.f32.mrb[70].mxu0  ;;  %v3685_v12 = vadd.f32 %v3048_v6, %v6959_v61  ;;  %v3177_v40 = vadd.f32 %v3130_v23, %v5212_v27 }
 0x9b7   : > { %v3051_v13 = vpop.f32.mrb[15].mxu1  ;;  %v3133_v38 = vpop.f32.mrb[71].mxu0  ;;  %v3207_v39 = vsub.f32 0.0, %v3684_v1  ;;  %v3180_v16 = vsub.f32 0.0, %v3176_v3 }
 0x9b8   : > { %v3212_v30 = vsub.f32 0.0, %v3685_v12  ;;  %v3185_v60 = vsub.f32 0.0, %v3177_v40 }
 0x9b9   : > { %v3208_v33 = vmul.f32 1.442695, %v3207_v39  ;;  %v3181_v14 = vmul.f32 1.442695, %v3180_v16 }
 0x9ba   : > { %v3213_v26 = vmul.f32 1.442695, %v3212_v30  ;;  %v3186_v18 = vmul.f32 1.442695, %v3185_v60 }
 0x9bb   : > { %3947 = vpow2.f32 %v3208_v33 }
 0x9bc   : > { %3949 = vpow2.f32 %v3181_v14 }
 0x9bd   : > { %3951 = vpow2.f32 %v3213_v26 }
 0x9be   : > { %3953 = vpow2.f32 %v3186_v18 }
 0x9c5   : > { %v3948_v32 = vpop.eup %3947 }
 0x9c6   : > { %v3950_v54 = vpop.eup %3949  ;;  %v3210_v62 = vadd.f32 1.0, %v3948_v32 }
 0x9c7   : > { %v3952_v58 = vpop.eup %3951  ;;  %v3183_v17 = vadd.f32 1.0, %v3950_v54 }
 0x9c8   : > { %v3954_v51 = vpop.eup %3953  ;;  %v3215_v19 = vadd.f32 1.0, %v3952_v58  ;;  %3955 = vrcp.f32 %v3210_v62 }
 0x9c9   : > { %v3188_v37 = vadd.f32 1.0, %v3954_v51  ;;  %3957 = vrcp.f32 %v3183_v17 }
 0x9ca   : > { %3959 = vrcp.f32 %v3215_v19 }
 0x9cb   : > { %3961 = vrcp.f32 %v3188_v37 }
 0x9d2   : > { %v3956_v47 = vpop.eup %3955 }
 0x9d3   : > { %v3958_v49 = vpop.eup %3957 }
 0x9d4   : > { %v3960_v53 = vpop.eup %3959 }
 0x9d5   : > { %v3962_v41 = vpop.eup %3961  ;;  %v3223_v36 = vmul.f32 %v3960_v53, %v5834_v8 }
 0x9d6   : > { %v3196_v5 = vmul.f32 %v3962_v41, %v5842_v57  ;;  %v3642_v41 = vld [vmem:[#allocation3] ss:$0 sm:$0xff] }
 0x9f4   : > { %v3087_v25 = vpop.f32.mrb[28].mxu1  ;;  %v3169_v9 = vpop.f32.mrb[72].mxu0 }
 0x9f5   : > { %v3686_v2 = vadd.f32 %v3087_v25, %v6960_v11  ;;  %v3178_v44 = vadd.f32 %v3169_v9, %v5223_v0  ;;  %v3089_v22 = vpop.f32.mrb[29].mxu1  ;;  %v3171_v45 = vpop.f32.mrb[73].mxu0 }
 0x9f6   : > { %v3687_v20 = vadd.f32 %v3089_v22, %v6961_v52  ;;  %v3179_v55 = vadd.f32 %v3171_v45, %v5218_v31  ;;  %v3091_v42 = vpop.f32.mrb[30].mxu1  ;;  %v3173_v35 = vpop.f32.mrb[74].mxu0 }
 0x9f7   : > { %3963 = vtanh.f32 %v3686_v2  ;;  %v3092_v50 = vpop.f32.mrb[31].mxu1  ;;  %v3174_v28 = vpop.f32.mrb[75].mxu0 }
 0x9f8   : > { %3965 = vtanh.f32 %v3178_v44  ;;  %v3218_v29 = vsub.f32 0.0, %v3687_v20  ;;  %v3191_v63 = vsub.f32 0.0, %v3179_v55  ;;  %v3639_v28 = vld [vmem:[%s6026_s9] ss:$0 sm:$0xff] }
 0x9fa   : > { %v3219_v56 = vmul.f32 1.442695, %v3218_v29  ;;  %v3192_v43 = vmul.f32 1.442695, %v3191_v63  ;;  %v3640_v63 = vld [vmem:[%s6027_s10] ss:$0 sm:$0xff] }
 0x9fc   : > { %3967 = vpow2.f32 %v3219_v56 }
 0x9fd   : > { %3969 = vpow2.f32 %v3192_v43 }
 0xa01   : > { %v3964_v48 = vpop.eup %3963 }
 0xa02   : > { %v3966_v59 = vpop.eup %3965  ;;  %v3224_v4 = vmul.f32 %v3964_v48, %v3956_v47  ;;  %v3641_v47 = vld [vmem:[%s6028_s11] ss:$0 sm:$0xff] }
 0xa03   : > { %v3197_v10 = vmul.f32 %v3966_v59, %v3958_v49 }
 0xa04   : > { %v3225_v15 = vadd.f32 %v3224_v4, %v3223_v36 }
 0xa05   : > { %v3198_v21 = vadd.f32 %v3197_v10, %v3196_v5 }
 0xa06   : > { %v3968_v6 = vpop.eup %3967  ;;  %3971 = vtanh.f32 %v3225_v15 }
 0xa07   : > { %v3970_v23 = vpop.eup %3969  ;;  %v3221_v34 = vadd.f32 1.0, %v3968_v6  ;;  %3973 = vtanh.f32 %v3198_v21 }
 0xa08   : > { %v3194_v7 = vadd.f32 1.0, %v3970_v23 }
 0xa09   : > { %3975 = vrcp.f32 %v3221_v34 }
 0xa0a   : > { %3977 = vrcp.f32 %v3194_v7 }
 0xa10   : > { %v3972_v13 = vpop.eup %3971 }
 0xa11   : > { %v3974_v38 = vpop.eup %3973 }
 0xa13   : > { %v3976_v24 = vpop.eup %3975 }
 0xa14   : > { %v3978_v1 = vpop.eup %3977  ;;  %v3227_v3 = vmul.f32 %v3976_v24, %v3972_v13 }
 0xa15   : > { %v3200_v8 = vmul.f32 %v3978_v1, %v3974_v38 }
 0xa16   : > { %v3228_v61 = vpack.c.bf16 %v3227_v3, %v3227_v3 }
 0xa17   : > { %v3201_v12 = vpack.c.bf16 %v3200_v8, %v3200_v8 }
 0xa18   : > { %3229 = vst [vmem:[#allocation2] sm:$0xf] %v3228_v61 }
 0xa19   : > { %3202 = vst [vmem:[#allocation2 + $0x4] sm:$0xf] %v3201_v12 }
 0xa20   : > { %v3230_v57 = vld [vmem:[#allocation2] sm:$0xff] }
 0xa21   : > { %v3638_v40 = vcombine.high %v3230_v57, %v3230_v57  ;;  %v3637_v39 = vcombine.low %v3230_v57, %v3230_v57 }
 0xa23   : > { %3270 = vmatprep.mubr.bf16.mxu0 %v3638_v40  ;;  %3311 = vmatprep.mubr.bf16.mxu1 %v3638_v40 }
 0xa24   : > { %3271 = vmatmul.mubr.bf16.vlgmr.msra.gmra.mrb[76].mxu0 %v3637_v39  ;;  %3312 = vmatmul.mubr.bf16.vlgmr.msra.gmra.mrb[72].mxu1 %v3637_v39 }
 0xaf7   : > { %v3272_v16 = vpop.f32.mrb[76].mxu0  ;;  %v3313_v30 = vpop.f32.mrb[72].mxu1 }
 0xaf8   : > { %v3320_v60 = vadd.f32 %v3272_v16, %v5208_v46  ;;  %v3274_v33 = vpop.f32.mrb[77].mxu0  ;;  %v3315_v14 = vpop.f32.mrb[73].mxu1  ;;  %v3322_v46 = vadd.f32 %v3313_v30, %v5223_v0 }
 0xaf9   : > { %v3321_v26 = vadd.f32 %v3274_v33, %v5212_v27  ;;  %v3276_v18 = vpop.f32.mrb[78].mxu0  ;;  %v3317_v32 = vpop.f32.mrb[74].mxu1  ;;  %v3323_v37 = vadd.f32 %v3315_v14, %v5218_v31 }
 0xafa   : > { %v3324_v54 = vsub.f32 0.0, %v3320_v60  ;;  %v3277_v58 = vpop.f32.mrb[79].mxu0  ;;  %v3318_v51 = vpop.f32.mrb[75].mxu1 }
 0xafb   : > { %v3329_v62 = vsub.f32 0.0, %v3321_v26  ;;  %v3335_v25 = vsub.f32 0.0, %v3323_v37 }
 0xafc   : > { %v3325_v17 = vmul.f32 1.442695, %v3324_v54 }
 0xafd   : > { %v3330_v19 = vmul.f32 1.442695, %v3329_v62  ;;  %v3336_v9 = vmul.f32 1.442695, %v3335_v25 }
 0xafe   : > { %3979 = vpow2.f32 %v3325_v17 }
 0xaff   : > { %3981 = vpow2.f32 %v3330_v19 }
 0xb00   : > { %3983 = vpow2.f32 %v3336_v9 }
 0xb01   : > { %3985 = vtanh.f32 %v3322_v46 }
 0xb08   : > { %v3980_v11 = vpop.eup %3979 }
 0xb09   : > { %v3982_v2 = vpop.eup %3981  ;;  %v3327_v44 = vadd.f32 1.0, %v3980_v11 }
 0xb0a   : > { %v3332_v27 = vadd.f32 1.0, %v3982_v2  ;;  %v3984_v22 = vpop.eup %3983 }
 0xb0b   : > { %3987 = vrcp.f32 %v3327_v44  ;;  %v3986_v45 = vpop.eup %3985  ;;  %v3338_v31 = vadd.f32 1.0, %v3984_v22 }
 0xb0c   : > { %3989 = vrcp.f32 %v3332_v27 }
 0xb0d   : > { %3991 = vrcp.f32 %v3338_v31 }
 0xb15   : > { %v3988_v52 = vpop.eup %3987 }
 0xb16   : > { %v3990_v20 = vpop.eup %3989  ;;  %v3341_v55 = vmul.f32 %v3988_v52, %v3986_v45 }
 0xb17   : > { %v3340_v42 = vmul.f32 %v3990_v20, %v3198_v21  ;;  %v3992_v50 = vpop.eup %3991 }
 0xb19   : > { %v3342_v35 = vadd.f32 %v3341_v55, %v3340_v42 }
 0xb1b   : > { %3993 = vtanh.f32 %v3342_v35 }
 0xb25   : > { %v3994_v0 = vpop.eup %3993 }
 0xb26   : > { %v3344_v29 = vmul.f32 %v3994_v0, %v3992_v50 }
 0xb28   : > { %v3345_v56 = vpack.c.bf16 %v3344_v29, %v3344_v29  ;;  %v3354_v43 = vmul.f32 %v3639_v28, %v3344_v29 }
 0xb2a   : > { %3346 = vst [vmem:[#allocation2 + $0x4] sm:$0xf] %v3345_v56  ;;  %v3362_v49 = vadd.f32 %v3640_v63, %v3354_v43 }
 0xb2c   : > { %v3370_v53 = vmul.f32 %v3641_v47, %v3362_v49 }
 0xb2e   : > { %3371 = vadd.xlane.f32.xlu0 %v3370_v53 }
 0xbbb   : > { %v3372_v48 = vpop.xlane.xlu0 %3371 }
 0xbbc   : > { %v3380_v59 = vadd.f32 %v3642_v41, %v3372_v48 }
 0xbbe   : > { %v3643_v36 = vmul.f32 -1.442695, %v3380_v59 }
 0xbc0   : > { %3995 = vpow2.f32 %v3643_v36 }
 0xbca   : > { %v3996_v4 = vpop.eup %3995 }
 0xbcb   : > { %v3384_v5 = vadd.f32 1.0, %v3996_v4 }
 0xbcd   : > { %3997 = vrcp.f32 %v3384_v5 }
 0xbd7   : > { %v3998_v10 = vpop.eup %3997 }
 0xbd8   : > { %3388 = vst.msk [vmem:[%s533_s24] sm:$0xff] %vm3387_vm4, %v3998_v10 }
 0xbd9 PF: > { %p22_p9 = scmp.ge.s32.totalorder %s4116_s30, 4   ;;  %s6962_s27 = smov %s4017_s28 }
 0xbda   : > { %s6963_s28 = smov %s4125_s16  ;;  %s6964_s29 = smov %s4116_s30 }
 0xbdb   :  { %24 = sbr.rel (!%p22_p9) target bundleno = 5 (0x5), region = 148 }

</bundles_post_ra>
